<compile_context>
chip_gen: v7x
topology: tpu7x:2x2x1
jax: 0.10.0
libtpu: 0.0.40
codegen_flags: <defaults>
</compile_context>

<pallas_src>
import functools

import jax
import jax.numpy as jnp
from jax.experimental import pallas as pl
from jax.experimental.pallas import tpu as pltpu


def pointnet_kernel(x_ref, w15_ref, wk128_ref, wk16_ref, wk32_ref, bp_ref,
                    segp_ref, sege_ref, out_ref, *, compute_dtype):
    f32 = jnp.float32

    def dot(a, b):
        if compute_dtype != f32:
            a = a.astype(compute_dtype)
            b = b.astype(compute_dtype)
        return jnp.dot(a, b, preferred_element_type=f32)

    relu = lambda v: jnp.maximum(v, 0.0)

    xa = x_ref[...]                                                  # (3, L)

    # conv1[0] and conv3[0]'s x-part fused: one K=3 matmul, biases b1/b5 added
    # from the bias column (ones-row fold removed per review).
    h_both = dot(w15_ref[...], xa) + bp_ref[0:144, :]                # (144, L)
    h1 = relu(h_both[0:16, :])                                       # (16, L)   conv1[0]+ReLU
    x5 = h_both[16:144, :]                                           # (128, L)  conv3[0] x-part (b5 included)

    h2 = relu(dot(wk16_ref[0:128, :], h1) + bp_ref[144:272, :])      # (128, L)  conv1[2]
    h3 = relu(dot(wk128_ref[0:128, :], h2) + bp_ref[272:400, :])     # (128, L)  conv1[4]

    # avg_pool1d over each cloud == matmul with the precomputed (L, bt) segment
    # matrix carrying 1/N. Kept in f32 regardless of compute_dtype (precision).
    pool = jnp.dot(h3, segp_ref[...], preferred_element_type=f32)    # (128, bt)

    gf = relu(dot(wk128_ref[128:160, :], pool) + bp_ref[400:432, :]) # (32, bt)  conv2[0]
    gfe = dot(wk32_ref[...], gf)                                     # (128, bt) conv3[0] gf-part

    # gf.repeat(1,1,N) == matmul with the precomputed (bt, L) 0/1 expansion.
    h5 = relu(x5 + dot(gfe, sege_ref[...]))                          # (128, L)  conv3[0]+ReLU
    h6 = relu(dot(wk128_ref[160:176, :], h5) + bp_ref[432:448, :])   # (16, L)   conv3[2]
    logits = dot(wk16_ref[128:130, :], h6) + bp_ref[448:450, :]      # (2, L)    conv3[4]

    # LogSoftmax over the 2 channels (sublane axis == PyTorch dim=-2).
    m = jnp.max(logits, axis=0, keepdims=True)
    lse = m + jnp.log(jnp.sum(jnp.exp(logits - m), axis=0, keepdims=True))
    out_ref[...] = logits - lse


def pack_params(params):
    """Pack the 15 per-layer tensors into 5 kernel inputs, all in [Cout, Cin]
    (channels-on-sublanes) layout, grouped by contraction size K so the kernel
    never takes lane sub-slices."""
    (w1, b1, w2, b2, w3, b3, w4, b4, w5a, w5b, b5, w6, b6, w7, b7) = params

    # K=3 slab: conv1[0] and conv3[0]'s x-part fused -> (144, 3).
    w15 = jnp.concatenate([w1.T, w5a.T], axis=0)

    # K=128 slab: w3 (rows 0:128), w4 (128:160), w6 (160:176) -> (176, 128).
    wk128 = jnp.concatenate([w3.T, w4.T, w6.T], axis=0)
    # K=16 slab: w2 (rows 0:128), w7 (128:130) -> (130, 16).
    wk16 = jnp.concatenate([w2.T, w7.T], axis=0)
    # K=32 slab: w5b -> (128, 32).
    wk32 = w5b.T

    # Bias column (450, 1): [b1;b5] 0:144, b2 144:272, b3 272:400,
    # b4 400:432, b6 432:448, b7 448:450 (all sublane-8-aligned offsets).
    bp = jnp.concatenate([b1.T, b5.T, b2.T, b3.T, b4.T, b6.T, b7.T], axis=0)
    return w15, wk128, wk16, wk32, bp


def make_seg_matrices(n_pts, bt):
    """Host-side grid-invariant pool/expand matrices (fetched once in-kernel)."""
    L = bt * n_pts
    rows = jnp.arange(L, dtype=jnp.int32) // n_pts
    cols = jnp.arange(bt, dtype=jnp.int32)
    seg_pool = (rows[:, None] == cols[None, :]).astype(jnp.float32) * (1.0 / n_pts)  # (L, bt)
    seg_exp = (cols[:, None] == rows[None, :]).astype(jnp.float32)                   # (bt, L)
    return seg_pool, seg_exp


def _min_grid_steps():
    """>=2 steps on 2-TC v7x so ('parallel',) can shard the batch axis across
    cores; 1 step on single-TC v5e/v6e (per-step overhead dominates)."""
    try:
        kind = jax.devices()[0].device_kind.lower()
    except Exception:
        kind = ""
    return 2 if "v7" in kind else 1


def _pick_bt(batch, n_pts, min_steps):
    """Largest Bt dividing B with Bt*N a multiple of 128 (lane-dense blocks)
    while keeping >= min_steps grid steps."""
    max_bt = max(batch // max(min_steps, 1), 1)
    for bt in range(max_bt, 0, -1):
        if batch % bt == 0 and (bt * n_pts) % 128 == 0:
            return bt
    # Fallback: single step, block == full array (always legal, but lane-sparse
    # output store); prefer padding N to a multiple of 128/B in real use.
    return batch


def pointnet_forward(x, params, *, compute_dtype=jnp.float32):
    B, N, C = x.shape
    w15, wk128, wk16, wk32, bp = pack_params(params)
    bt = _pick_bt(B, N, _min_grid_steps())
    L = bt * N
    seg_pool, seg_exp = make_seg_matrices(N, bt)

    # Points on the lane axis: x -> (C, B*N). Only the transpose remains on the
    # wrapper side (no ones-row concat). TODO(synk): allow_input_fusion=[0] to
    # fuse this producer into the pallas_call for large point counts.
    x_t = jnp.transpose(x.reshape(B * N, C))

    const = lambda i: (0, 0)   # grid-invariant inputs: fetched once, no re-DMA

    out_flat = pl.pallas_call(
        functools.partial(pointnet_kernel, compute_dtype=compute_dtype),
        out_shape=jax.ShapeDtypeStruct((2, B * N), jnp.float32),
        grid_spec=pltpu.PrefetchScalarGridSpec(
            num_scalar_prefetch=0,
            grid=(B // bt,),
            in_specs=[
                pl.BlockSpec((C, L), lambda i: (0, i)),
                pl.BlockSpec(w15.shape, const),
                pl.BlockSpec(wk128.shape, const),
                pl.BlockSpec(wk16.shape, const),
                pl.BlockSpec(wk32.shape, const),
                pl.BlockSpec(bp.shape, const),
                pl.BlockSpec(seg_pool.shape, const),
                pl.BlockSpec(seg_exp.shape, const),
            ],
            out_specs=pl.BlockSpec((2, L), lambda i: (0, i)),
        ),
        compiler_params=pltpu.CompilerParams(
            dimension_semantics=("parallel",)),
    )(x_t, w15, wk128, wk16, wk32, bp, seg_pool, seg_exp)

    # (2, B*N) -> (B, N, 2), matching PyTorch's final transpose.
    return jnp.transpose(out_flat.reshape(2, B, N), (1, 2, 0))


def init_params(key):
    """Deterministic init mirroring PyTorch Conv1d defaults (uniform +-1/sqrt(fan_in)).
    Weights stored as [Cin, Cout]; biases as [1, Cout]."""
    def lin(k, cin, cout):
        kw, kb = jax.random.split(k)
        bound = 1.0 / float(cin) ** 0.5
        w = jax.random.uniform(kw, (cin, cout), jnp.float32, -bound, bound)
        b = jax.random.uniform(kb, (1, cout), jnp.float32, -bound, bound)
        return w, b

    keys = jax.random.split(key, 7)
    w1, b1 = lin(keys[0], 3, 16)        # conv1[0]
    w2, b2 = lin(keys[1], 16, 128)      # conv1[2]
    w3, b3 = lin(keys[2], 128, 128)     # conv1[4]
    w4, b4 = lin(keys[3], 128, 32)      # conv2[0]
    w5, b5 = lin(keys[4], 3 + 32, 128)  # conv3[0] on cat([x, gf])
    w5a, w5b = w5[:3], w5[3:]
    w6, b6 = lin(keys[5], 128, 16)      # conv3[2]
    w7, b7 = lin(keys[6], 16, 2)        # conv3[4]
    return [w1, b1, w2, b2, w3, b3, w4, b4, w5a, w5b, b5, w6, b6, w7, b7]


def pointnet_reference(x, params):
    """Pure-JAX reference mirroring the PyTorch forward (k=0)."""
    (w1, b1, w2, b2, w3, b3, w4, b4, w5a, w5b, b5, w6, b6, w7, b7) = params
    relu = lambda v: jnp.maximum(v, 0.0)
    h1 = relu(x @ w1 + b1)
    h2 = relu(h1 @ w2 + b2)
    h3 = relu(h2 @ w3 + b3)
    pool = jnp.mean(h3, axis=1, keepdims=True)
    gf = relu(pool @ w4 + b4)
    h5 = relu(x @ w5a + gf @ w5b + b5)
    h6 = relu(h5 @ w6 + b6)
    logits = h6 @ w7 + b7
    return jax.nn.log_softmax(logits, axis=-1)


if __name__ == "__main__":
    key = jax.random.PRNGKey(0)
    kx, kp = jax.random.split(key)

    # 32 clouds of 16 points -> one 512-point step on v5e/v6e, two 256-point
    # steps on v7x (both lane-dense).
    B, N, C = 32, 16, 3
    x = jax.random.normal(kx, (B, N, C), jnp.float32)
    params = init_params(kp)

    out = jax.block_until_ready(pointnet_forward(x, params))
    assert out.shape == (B, N, 2), out.shape

    ref = pointnet_reference(x, params)
    err = float(jnp.max(jnp.abs(out - ref)))
    assert jnp.allclose(out, ref, atol=2e-4, rtol=2e-4), err

    print("KERNEL_OK")
</pallas_src>

<mosaic_0001>
module attributes {stable_mosaic.version = 11 : i64} {
  func.func @pointnet_kernel(%arg0: i32, %arg1: memref<3x512xf32, #tpu.memory_space<vmem>>, %arg2: memref<144x3xf32, #tpu.memory_space<vmem>>, %arg3: memref<176x128xf32, #tpu.memory_space<vmem>>, %arg4: memref<130x16xf32, #tpu.memory_space<vmem>>, %arg5: memref<128x32xf32, #tpu.memory_space<vmem>>, %arg6: memref<450x1xf32, #tpu.memory_space<vmem>>, %arg7: memref<512x32xf32, #tpu.memory_space<vmem>>, %arg8: memref<32x512xf32, #tpu.memory_space<vmem>>, %arg9: memref<2x512xf32, #tpu.memory_space<vmem>>) attributes {dimension_semantics = [#tpu.dimension_semantics<parallel>], iteration_bounds = array<i64: 1>, scalar_prefetch = 0 : i64, scratch_operands = 0 : i64, tpu.core_type = #tpu.core_type<tc>, window_params = [{transform_indices = @transform_0, window_bounds = array<i64: 3, 512>}, {pipeline_mode = #tpu.pipeline_mode<synchronous>, transform_indices = @transform_1, window_bounds = array<i64: 144, 3>}, {pipeline_mode = #tpu.pipeline_mode<synchronous>, transform_indices = @transform_2, window_bounds = array<i64: 176, 128>}, {pipeline_mode = #tpu.pipeline_mode<synchronous>, transform_indices = @transform_3, window_bounds = array<i64: 130, 16>}, {pipeline_mode = #tpu.pipeline_mode<synchronous>, transform_indices = @transform_4, window_bounds = array<i64: 128, 32>}, {pipeline_mode = #tpu.pipeline_mode<synchronous>, transform_indices = @transform_5, window_bounds = array<i64: 450, 1>}, {pipeline_mode = #tpu.pipeline_mode<synchronous>, transform_indices = @transform_6, window_bounds = array<i64: 512, 32>}, {pipeline_mode = #tpu.pipeline_mode<synchronous>, transform_indices = @transform_7, window_bounds = array<i64: 32, 512>}, {transform_indices = @transform_8, window_bounds = array<i64: 2, 512>}]} {
    %c0 = arith.constant 0 : index
    %c0_0 = arith.constant 0 : index
    %0 = vector.load %arg1[%c0, %c0_0] : memref<3x512xf32, #tpu.memory_space<vmem>>, vector<3x512xf32>
    %c0_1 = arith.constant 0 : index
    %c0_2 = arith.constant 0 : index
    %1 = vector.load %arg2[%c0_1, %c0_2] : memref<144x3xf32, #tpu.memory_space<vmem>>, vector<144x3xf32>
    %cst = arith.constant dense<0.000000e+00> : vector<144x512xf32>
    %2 = tpu.matmul %1, %0, %cst {dimension_numbers = #tpu.dot_dimension_numbers<[1], [0], [0], [1], [0, 0, 1, 1], [], []>} : vector<144x3xf32>, vector<3x512xf32>, vector<144x512xf32> -> vector<144x512xf32>
    %c0_3 = arith.constant 0 : index
    %c0_4 = arith.constant 0 : index
    %3 = vector.load %arg6[%c0_3, %c0_4] : memref<450x1xf32, #tpu.memory_space<vmem>>, vector<144x1xf32>
    %4 = vector.broadcast %3 : vector<144x1xf32> to vector<144x512xf32>
    %5 = arith.addf %2, %4 : vector<144x512xf32>
    %6 = vector.extract_strided_slice %5 {offsets = [0, 0], sizes = [16, 512], strides = [1, 1]} : vector<144x512xf32> to vector<16x512xf32>
    %cst_5 = arith.constant 0.000000e+00 : f32
    %7 = vector.broadcast %cst_5 : f32 to vector<16x512xf32>
    %8 = arith.maximumf %6, %7 : vector<16x512xf32>
    %9 = vector.extract_strided_slice %5 {offsets = [16, 0], sizes = [128, 512], strides = [1, 1]} : vector<144x512xf32> to vector<128x512xf32>
    %c0_6 = arith.constant 0 : index
    %c0_7 = arith.constant 0 : index
    %10 = vector.load %arg4[%c0_6, %c0_7] : memref<130x16xf32, #tpu.memory_space<vmem>>, vector<128x16xf32>
    %cst_8 = arith.constant dense<0.000000e+00> : vector<128x512xf32>
    %11 = tpu.matmul %10, %8, %cst_8 {dimension_numbers = #tpu.dot_dimension_numbers<[1], [0], [0], [1], [0, 0, 1, 1], [], []>} : vector<128x16xf32>, vector<16x512xf32>, vector<128x512xf32> -> vector<128x512xf32>
    %c144 = arith.constant 144 : index
    %c0_9 = arith.constant 0 : index
    %12 = vector.load %arg6[%c144, %c0_9] : memref<450x1xf32, #tpu.memory_space<vmem>>, vector<128x1xf32>
    %13 = vector.broadcast %12 : vector<128x1xf32> to vector<128x512xf32>
    %14 = arith.addf %11, %13 : vector<128x512xf32>
    %cst_10 = arith.constant 0.000000e+00 : f32
    %15 = vector.broadcast %cst_10 : f32 to vector<128x512xf32>
    %16 = arith.maximumf %14, %15 : vector<128x512xf32>
    %c0_11 = arith.constant 0 : index
    %c0_12 = arith.constant 0 : index
    %17 = vector.load %arg3[%c0_11, %c0_12] : memref<176x128xf32, #tpu.memory_space<vmem>>, vector<128x128xf32>
    %cst_13 = arith.constant dense<0.000000e+00> : vector<128x512xf32>
    %18 = tpu.matmul %17, %16, %cst_13 {dimension_numbers = #tpu.dot_dimension_numbers<[1], [0], [0], [1], [0, 0, 1, 1], [], []>} : vector<128x128xf32>, vector<128x512xf32>, vector<128x512xf32> -> vector<128x512xf32>
    %c272 = arith.constant 272 : index
    %c0_14 = arith.constant 0 : index
    %19 = vector.load %arg6[%c272, %c0_14] : memref<450x1xf32, #tpu.memory_space<vmem>>, vector<128x1xf32>
    %20 = vector.broadcast %19 : vector<128x1xf32> to vector<128x512xf32>
    %21 = arith.addf %18, %20 : vector<128x512xf32>
    %cst_15 = arith.constant 0.000000e+00 : f32
    %22 = vector.broadcast %cst_15 : f32 to vector<128x512xf32>
    %23 = arith.maximumf %21, %22 : vector<128x512xf32>
    %c0_16 = arith.constant 0 : index
    %c0_17 = arith.constant 0 : index
    %24 = vector.load %arg7[%c0_16, %c0_17] : memref<512x32xf32, #tpu.memory_space<vmem>>, vector<512x32xf32>
    %cst_18 = arith.constant dense<0.000000e+00> : vector<128x32xf32>
    %25 = tpu.matmul %23, %24, %cst_18 {dimension_numbers = #tpu.dot_dimension_numbers<[1], [0], [0], [1], [0, 0, 1, 1], [], []>} : vector<128x512xf32>, vector<512x32xf32>, vector<128x32xf32> -> vector<128x32xf32>
    %c128 = arith.constant 128 : index
    %c0_19 = arith.constant 0 : index
    %26 = vector.load %arg3[%c128, %c0_19] : memref<176x128xf32, #tpu.memory_space<vmem>>, vector<32x128xf32>
    %cst_20 = arith.constant dense<0.000000e+00> : vector<32x32xf32>
    %27 = tpu.matmul %26, %25, %cst_20 {dimension_numbers = #tpu.dot_dimension_numbers<[1], [0], [0], [1], [0, 0, 1, 1], [], []>} : vector<32x128xf32>, vector<128x32xf32>, vector<32x32xf32> -> vector<32x32xf32>
    %c400 = arith.constant 400 : index
    %c0_21 = arith.constant 0 : index
    %28 = vector.load %arg6[%c400, %c0_21] : memref<450x1xf32, #tpu.memory_space<vmem>>, vector<32x1xf32>
    %29 = vector.broadcast %28 : vector<32x1xf32> to vector<32x32xf32>
    %30 = arith.addf %27, %29 : vector<32x32xf32>
    %cst_22 = arith.constant 0.000000e+00 : f32
    %31 = vector.broadcast %cst_22 : f32 to vector<32x32xf32>
    %32 = arith.maximumf %30, %31 : vector<32x32xf32>
    %c0_23 = arith.constant 0 : index
    %c0_24 = arith.constant 0 : index
    %33 = vector.load %arg5[%c0_23, %c0_24] : memref<128x32xf32, #tpu.memory_space<vmem>>, vector<128x32xf32>
    %cst_25 = arith.constant dense<0.000000e+00> : vector<128x32xf32>
    %34 = tpu.matmul %33, %32, %cst_25 {dimension_numbers = #tpu.dot_dimension_numbers<[1], [0], [0], [1], [0, 0, 1, 1], [], []>} : vector<128x32xf32>, vector<32x32xf32>, vector<128x32xf32> -> vector<128x32xf32>
    %c0_26 = arith.constant 0 : index
    %c0_27 = arith.constant 0 : index
    %35 = vector.load %arg8[%c0_26, %c0_27] : memref<32x512xf32, #tpu.memory_space<vmem>>, vector<32x512xf32>
    %cst_28 = arith.constant dense<0.000000e+00> : vector<128x512xf32>
    %36 = tpu.matmul %34, %35, %cst_28 {dimension_numbers = #tpu.dot_dimension_numbers<[1], [0], [0], [1], [0, 0, 1, 1], [], []>} : vector<128x32xf32>, vector<32x512xf32>, vector<128x512xf32> -> vector<128x512xf32>
    %37 = arith.addf %9, %36 : vector<128x512xf32>
    %cst_29 = arith.constant 0.000000e+00 : f32
    %38 = vector.broadcast %cst_29 : f32 to vector<128x512xf32>
    %39 = arith.maximumf %37, %38 : vector<128x512xf32>
    %c160 = arith.constant 160 : index
    %c0_30 = arith.constant 0 : index
    %40 = vector.load %arg3[%c160, %c0_30] : memref<176x128xf32, #tpu.memory_space<vmem>>, vector<16x128xf32>
    %cst_31 = arith.constant dense<0.000000e+00> : vector<16x512xf32>
    %41 = tpu.matmul %40, %39, %cst_31 {dimension_numbers = #tpu.dot_dimension_numbers<[1], [0], [0], [1], [0, 0, 1, 1], [], []>} : vector<16x128xf32>, vector<128x512xf32>, vector<16x512xf32> -> vector<16x512xf32>
    %c432 = arith.constant 432 : index
    %c0_32 = arith.constant 0 : index
    %42 = vector.load %arg6[%c432, %c0_32] : memref<450x1xf32, #tpu.memory_space<vmem>>, vector<16x1xf32>
    %43 = vector.broadcast %42 : vector<16x1xf32> to vector<16x512xf32>
    %44 = arith.addf %41, %43 : vector<16x512xf32>
    %cst_33 = arith.constant 0.000000e+00 : f32
    %45 = vector.broadcast %cst_33 : f32 to vector<16x512xf32>
    %46 = arith.maximumf %44, %45 : vector<16x512xf32>
    %c128_34 = arith.constant 128 : index
    %c0_35 = arith.constant 0 : index
    %47 = vector.load %arg4[%c128_34, %c0_35] : memref<130x16xf32, #tpu.memory_space<vmem>>, vector<2x16xf32>
    %cst_36 = arith.constant dense<0.000000e+00> : vector<2x512xf32>
    %48 = tpu.matmul %47, %46, %cst_36 {dimension_numbers = #tpu.dot_dimension_numbers<[1], [0], [0], [1], [0, 0, 1, 1], [], []>} : vector<2x16xf32>, vector<16x512xf32>, vector<2x512xf32> -> vector<2x512xf32>
    %c448 = arith.constant 448 : index
    %c0_37 = arith.constant 0 : index
    %49 = vector.load %arg6[%c448, %c0_37] : memref<450x1xf32, #tpu.memory_space<vmem>>, vector<2x1xf32>
    %50 = vector.broadcast %49 : vector<2x1xf32> to vector<2x512xf32>
    %51 = arith.addf %48, %50 : vector<2x512xf32>
    %cst_38 = arith.constant dense<0xFF800000> : vector<512xf32>
    %52 = vector.multi_reduction <maximumf>, %51, %cst_38 [0] : vector<2x512xf32> to vector<512xf32>
    %53 = vector.shape_cast %52 : vector<512xf32> to vector<1x512xf32>
    %54 = vector.broadcast %53 : vector<1x512xf32> to vector<2x512xf32>
    %55 = arith.subf %51, %54 : vector<2x512xf32>
    %56 = math.exp %55 : vector<2x512xf32>
    %cst_39 = arith.constant dense<0.000000e+00> : vector<512xf32>
    %57 = vector.multi_reduction <add>, %56, %cst_39 [0] : vector<2x512xf32> to vector<512xf32>
    %58 = vector.shape_cast %57 : vector<512xf32> to vector<1x512xf32>
    %59 = math.log %58 : vector<1x512xf32>
    %60 = arith.addf %53, %59 : vector<1x512xf32>
    %61 = vector.broadcast %60 : vector<1x512xf32> to vector<2x512xf32>
    %62 = arith.subf %51, %61 : vector<2x512xf32>
    %c0_40 = arith.constant 0 : index
    %c0_41 = arith.constant 0 : index
    %63 = vector.load %arg9[%c0_40, %c0_41] : memref<2x512xf32, #tpu.memory_space<vmem>>, vector<2x512xf32>
    tpu.vector_store %arg9[%c0_40, %c0_41], %62 {strides = array<i32>} : memref<2x512xf32, #tpu.memory_space<vmem>>, vector<2x512xf32>,
    return
  }
  func.func @transform_0(%arg0: i32) -> (i32, i32) {
    %c0_i32 = arith.constant 0 : i32
    %c0_i32_0 = arith.constant 0 : i32
    return %c0_i32, %arg0 : i32, i32
  }
  func.func @transform_1(%arg0: i32) -> (i32, i32) {
    %c0_i32 = arith.constant 0 : i32
    %c0_i32_0 = arith.constant 0 : i32
    %c0_i32_1 = arith.constant 0 : i32
    return %c0_i32, %c0_i32_0 : i32, i32
  }
  func.func @transform_2(%arg0: i32) -> (i32, i32) {
    %c0_i32 = arith.constant 0 : i32
    %c0_i32_0 = arith.constant 0 : i32
    %c0_i32_1 = arith.constant 0 : i32
    return %c0_i32, %c0_i32_0 : i32, i32
  }
  func.func @transform_3(%arg0: i32) -> (i32, i32) {
    %c0_i32 = arith.constant 0 : i32
    %c0_i32_0 = arith.constant 0 : i32
    %c0_i32_1 = arith.constant 0 : i32
    return %c0_i32, %c0_i32_0 : i32, i32
  }
  func.func @transform_4(%arg0: i32) -> (i32, i32) {
    %c0_i32 = arith.constant 0 : i32
    %c0_i32_0 = arith.constant 0 : i32
    %c0_i32_1 = arith.constant 0 : i32
    return %c0_i32, %c0_i32_0 : i32, i32
  }
  func.func @transform_5(%arg0: i32) -> (i32, i32) {
    %c0_i32 = arith.constant 0 : i32
    %c0_i32_0 = arith.constant 0 : i32
    %c0_i32_1 = arith.constant 0 : i32
    return %c0_i32, %c0_i32_0 : i32, i32
  }
  func.func @transform_6(%arg0: i32) -> (i32, i32) {
    %c0_i32 = arith.constant 0 : i32
    %c0_i32_0 = arith.constant 0 : i32
    %c0_i32_1 = arith.constant 0 : i32
    return %c0_i32, %c0_i32_0 : i32, i32
  }
  func.func @transform_7(%arg0: i32) -> (i32, i32) {
    %c0_i32 = arith.constant 0 : i32
    %c0_i32_0 = arith.constant 0 : i32
    %c0_i32_1 = arith.constant 0 : i32
    return %c0_i32, %c0_i32_0 : i32, i32
  }
  func.func @transform_8(%arg0: i32) -> (i32, i32) {
    %c0_i32 = arith.constant 0 : i32
    %c0_i32_0 = arith.constant 0 : i32
    return %c0_i32, %arg0 : i32, i32
  }
}

</mosaic_0001>

<bundles_post_ra>
// kernel: tpu_custom_call.1
= control target key start
LH: loop header
LB: loop body
LE: loop exit
PB: predicated region body
PF: predicated region fallthrough
CT: control target
= control target key end

     0   :  { %vm217_vm0 = vcmask 1042432   ;;  %v4104_v2 = vmov 0.0   ;;  %vm162_vm1 = vcmask 23552   ;;  %v4105_v4 = vmov 0   ;;  %s5454_s0 = inlined_call_operand.vmem [shape: f32[3,512], index: 0, kind: input, shape index: {}]   ;;  %s5455_s1 = inlined_call_operand.vmem [shape: f32[144,3], index: 1, kind: input, shape index: {}]   ;;  %s5456_s2 = inlined_call_operand.vmem [shape: f32[176,128], index: 2, kind: input, shape index: {}]   ;;  %s5457_s3 = inlined_call_operand.vmem [shape: f32[130,16], index: 3, kind: input, shape index: {}]   ;;  %s5458_s4 = inlined_call_operand.vmem [shape: f32[128,32], index: 4, kind: input, shape index: {}]   ;;  %s5459_s5 = inlined_call_operand.vmem [shape: f32[450,1], index: 5, kind: input, shape index: {}]   ;;  %s5460_s6 = inlined_call_operand.vmem [shape: f32[512,32], index: 6, kind: input, shape index: {}]   ;;  %s5461_s7 = inlined_call_operand.vmem [shape: f32[32,512], index: 7, kind: input, shape index: {}]   ;;  %s5462_s8 = inlined_call_operand.hbm [shape: f32[2,512], index: 8, kind: output, shape index: {}]  }
   0x1   :  { %v30_v0 = vld [vmem:[%s5454_s0] sm:$0x77]  ;;  %290 = vmatprep.mubr.f32.mxu0 %v4104_v2  ;;  %475 = vmatprep.mubr.f32.mxu1 %v4104_v2  ;;  %v4174_v6 = vld [vmem:[%s5455_s1 + $0x8] sm:$0xff]  ;;  %v34_v10 = vld [vmem:[%s5455_s1 + $0x10] sm:$0xff] }
   0x2   :  { %v160_v1 = vcombine.high %v30_v0, %v30_v0  ;;  %v4161_v3 = vld [vmem:[%s5455_s1] sm:$0xff]  ;;  %4060 = vset.pattern.permute.xlu0 %v4105_v4  ;;  %4061 = vset.pattern.permute.xlu1 %v4105_v4  ;;  %v51_v7 = vld [vmem:[%s5459_s5 + $0x8] sm:$0xff]  ;;  %v35_v12 = vld [vmem:[%s5455_s1 + $0x18] sm:$0xff] }
   0x3   :  { %v50_v5 = vld [vmem:[%s5459_s5] sm:$0xff]  ;;  %v31_v8 = vld [vmem:[%s5454_s0 + $0x8] sm:$0x77]  ;;  %v600_v13 = vld [vmem:[%s5459_s5 + $0xb0] sm:$0xff] }
   0x4   :  { %3270 = vmatprep.subr.msk.mxu0 %vm217_vm0, %v160_v1  ;;  %70 = vperm.xlu0 %4060, %v50_v5   ;;  %v161_v9 = vcombine.high %v31_v8, %v31_v8  ;;  %v598_v11 = vld [vmem:[%s5459_s5 + $0xa0] sm:$0xff] }
   0x5   :  { %3271 = vmatpush1.msk.msra.mxu0 %vm217_vm0, %v30_v0 }
   0x6   :  { %3272 = vmatmul.mubr.msk.f32.vlgmr.msra.gmra.mrb[0].mxu0 %vm162_vm1, %v4161_v3  ;;  %3290 = vmatprep.subr.msk.mxu0 %vm217_vm0, %v161_v9 }
   0x7   :  { %296 = vmatprep.mubr.f32.mxu0 %v4104_v2  ;;  %3291 = vmatpush1.msk.msra.mxu0 %vm217_vm0, %v31_v8 }
   0x8   :  { %75 = vperm.xlu0 %4060, %v51_v7   ;;  %3926 = vmatprep.subr.msk.mxu1 %vm217_vm0, %v161_v9 }
   0x9   :  { %3927 = vmatpush1.msk.msra.mxu1 %vm217_vm0, %v31_v8 }
   0xa   :  { %3273 = vmatmul.mubr.msk.f32.gmra.mrb[2].mxu0 %vm162_vm1, %v4174_v6  ;;  %3294 = vmatmul.mubr.msk.f32.vlgmr.msra.gmra.mrb[0].mxu1 %vm162_vm1, %v34_v10 }
   0xb   :  { %302 = vmatprep.mubr.f32.mxu0 %v4104_v2  ;;  %481 = vmatprep.mubr.f32.mxu1 %v4104_v2 }
   0xc   :  { %624 = vperm.xlu0 %4060, %v598_v11  }
   0xe   :  { %3274 = vmatmul.mubr.msk.f32.gmra.mrb[4].mxu0 %vm162_vm1, %v34_v10 }
   0xf   :  { %308 = vmatprep.mubr.f32.mxu0 %v4104_v2 }
  0x10   :  { %13 = vsyncpa [#allocation3], 0  ;;  %634 = vperm.xlu0 %4060, %v600_v13   ;;  %v36_v14 = vld [vmem:[%s5455_s1 + $0x20] sm:$0xff]  ;;  %3295 = vmatmul.mubr.msk.f32.gmra.mrb[2].mxu1 %vm162_vm1, %v35_v12  ;;  %v37_v16 = vld [vmem:[%s5455_s1 + $0x28] sm:$0xff]  ;;  %vm692_vm2 = vcmask 130048   ;;  %vm2112_vm3 = vcmask 261120  }
  0x11   :  { %v602_v15 = vld [vmem:[%s5459_s5 + $0xc0] sm:$0xff]  ;;  %487 = vmatprep.mubr.f32.mxu1 %v4104_v2  ;;  %v604_v17 = vld [vmem:[%s5459_s5 + $0xd0] sm:$0xff]  ;;  %v39_v20 = vld [vmem:[%s5455_s1 + $0x38] sm:$0xff]  ;;  %vm3148_vm4 = vcmask 1041408  }
  0x12   :  { %3275 = vmatmul.mubr.msk.f32.gmra.mrb[6].mxu0 %vm162_vm1, %v35_v12  ;;  %v38_v18 = vld [vmem:[%s5455_s1 + $0x30] sm:$0xff]  ;;  %v606_v19 = vld [vmem:[%s5459_s5 + $0xe0] sm:$0xff]  ;;  %v41_v24 = vld [vmem:[%s5455_s1 + $0x48] sm:$0xff] }
  0x13   :  { %314 = vmatprep.mubr.f32.mxu0 %v4104_v2  ;;  %v608_v21 = vld [vmem:[%s5459_s5 + $0xf0] sm:$0xff]  ;;  %v40_v22 = vld [vmem:[%s5455_s1 + $0x40] sm:$0xff]  ;;  %v43_v28 = vld [vmem:[%s5455_s1 + $0x58] sm:$0xff] }
  0x14   :  { %644 = vperm.xlu0 %4060, %v602_v15   ;;  %3296 = vmatmul.mubr.msk.f32.gmra.mrb[4].mxu1 %vm162_vm1, %v36_v14  ;;  %v610_v23 = vld [vmem:[%s5459_s5 + $0x100] sm:$0xff]  ;;  %v1143_v25 = vld [vmem:[%s5459_s5 + $0x110] sm:$0xff]  ;;  %v45_v32 = vld [vmem:[%s5455_s1 + $0x68] sm:$0xff] }
  0x15   :  { %493 = vmatprep.mubr.f32.mxu1 %v4104_v2  ;;  %v42_v26 = vld [vmem:[%s5455_s1 + $0x50] sm:$0xff]  ;;  %v1145_v27 = vld [vmem:[%s5459_s5 + $0x120] sm:$0xff]  ;;  %v47_v36 = vld [vmem:[%s5455_s1 + $0x78] sm:$0xff] }
  0x16   :  { %3276 = vmatmul.mubr.msk.f32.gmra.mrb[8].mxu0 %vm162_vm1, %v36_v14  ;;  %v1147_v29 = vld [vmem:[%s5459_s5 + $0x130] sm:$0xff]  ;;  %v44_v30 = vld [vmem:[%s5455_s1 + $0x60] sm:$0xff]  ;;  %v49_v40 = vld [vmem:[%s5455_s1 + $0x88] sm:$0xff] }
  0x17   :  { %320 = vmatprep.mubr.f32.mxu0 %v4104_v2  ;;  %v1149_v31 = vld [vmem:[%s5459_s5 + $0x140] sm:$0xff]  ;;  %v1151_v33 = vld [vmem:[%s5459_s5 + $0x150] sm:$0xff]  ;;  %v597_v54 = vld [vmem:[%s5459_s5 + $0x98] sm:$0xff] }
  0x18   :  { %654 = vperm.xlu0 %4060, %v604_v17   ;;  %3297 = vmatmul.mubr.msk.f32.gmra.mrb[6].mxu1 %vm162_vm1, %v37_v16  ;;  %v46_v34 = vld [vmem:[%s5455_s1 + $0x70] sm:$0xff]  ;;  %v1153_v35 = vld [vmem:[%s5459_s5 + $0x160] sm:$0xff]  ;;  %v599_v55 = vld [vmem:[%s5459_s5 + $0xa8] sm:$0xff] }
  0x19   :  { %499 = vmatprep.mubr.f32.mxu1 %v4104_v2  ;;  %v1155_v37 = vld [vmem:[%s5459_s5 + $0x170] sm:$0xff]  ;;  %v48_v38 = vld [vmem:[%s5455_s1 + $0x80] sm:$0xff]  ;;  %v601_v56 = vld [vmem:[%s5459_s5 + $0xb8] sm:$0xff] }
  0x1a   :  { %3277 = vmatmul.mubr.msk.f32.gmra.mrb[10].mxu0 %vm162_vm1, %v37_v16  ;;  %v1157_v39 = vld [vmem:[%s5459_s5 + $0x180] sm:$0xff]  ;;  %v1983_v41 = vld [vmem:[%s5459_s5 + $0x190] sm:$0xff]  ;;  %v603_v57 = vld [vmem:[%s5459_s5 + $0xc8] sm:$0xff] }
  0x1b   :  { %326 = vmatprep.mubr.f32.mxu0 %v4104_v2  ;;  %v1985_v42 = vld [vmem:[%s5459_s5 + $0x1a0] sm:$0xff]  ;;  %v52_v43 = vld [vmem:[%s5459_s5 + $0x10] sm:$0xff]  ;;  %v605_v58 = vld [vmem:[%s5459_s5 + $0xd8] sm:$0xff] }
  0x1c   :  { %664 = vperm.xlu0 %4060, %v606_v19   ;;  %3298 = vmatmul.mubr.msk.f32.gmra.mrb[8].mxu1 %vm162_vm1, %v38_v18  ;;  %v54_v44 = vld [vmem:[%s5459_s5 + $0x20] sm:$0xff]  ;;  %v56_v45 = vld [vmem:[%s5459_s5 + $0x30] sm:$0xff]  ;;  %v607_v59 = vld [vmem:[%s5459_s5 + $0xe8] sm:$0xff] }
  0x1d   :  { %505 = vmatprep.mubr.f32.mxu1 %v4104_v2  ;;  %v58_v46 = vld [vmem:[%s5459_s5 + $0x40] sm:$0xff]  ;;  %v60_v47 = vld [vmem:[%s5459_s5 + $0x50] sm:$0xff]  ;;  %v609_v60 = vld [vmem:[%s5459_s5 + $0xf8] sm:$0xff] }
  0x1e   :  { %3278 = vmatmul.mubr.msk.f32.gmra.mrb[12].mxu0 %vm162_vm1, %v38_v18  ;;  %v62_v48 = vld [vmem:[%s5459_s5 + $0x60] sm:$0xff]  ;;  %v64_v49 = vld [vmem:[%s5459_s5 + $0x70] sm:$0xff]  ;;  %v611_v61 = vld [vmem:[%s5459_s5 + $0x108] sm:$0xff] }
  0x1f   :  { %332 = vmatprep.mubr.f32.mxu0 %v4104_v2  ;;  %v66_v50 = vld [vmem:[%s5459_s5 + $0x80] sm:$0xff]  ;;  %v2822_v51 = vld [vmem:[%s5459_s5 + $0x1b0] sm:$0xff]  ;;  %v1144_v0 = vld [vmem:[%s5459_s5 + $0x118] sm:$0xff] }
  0x20   :  { %674 = vperm.xlu0 %4060, %v608_v21   ;;  %3299 = vmatmul.mubr.msk.f32.gmra.mrb[10].mxu1 %vm162_vm1, %v39_v20  ;;  %v2997_v52 = vld [vmem:[%s5459_s5 + $0x1c0] sm:$0x3]  ;;  %v596_v53 = vld [vmem:[%s5459_s5 + $0x90] sm:$0xff]  ;;  %v1146_v7 = vld [vmem:[%s5459_s5 + $0x128] sm:$0xff] }
  0x21   :  { %511 = vmatprep.mubr.f32.mxu1 %v4104_v2  ;;  %614 = vperm.xlu1 %4061, %v596_v53   ;;  %v1148_v15 = vld [vmem:[%s5459_s5 + $0x138] sm:$0xff]  ;;  %v1150_v18 = vld [vmem:[%s5459_s5 + $0x148] sm:$0xff]  ;;  %v4438_v19 = vld [vmem:[%s5457_s3] sm:$0xff] }
  0x22   :  { %3279 = vmatmul.mubr.msk.f32.gmra.mrb[14].mxu0 %vm162_vm1, %v39_v20  ;;  %v1152_v20 = vld [vmem:[%s5459_s5 + $0x158] sm:$0xff]  ;;  %v4449_v21 = vld [vmem:[%s5457_s3 + $0x8] sm:$0xff] }
  0x23   :  { %338 = vmatprep.mubr.f32.mxu0 %v4104_v2 }
  0x24   :  { %684 = vperm.xlu0 %4060, %v610_v23   ;;  %3300 = vmatmul.mubr.msk.f32.gmra.mrb[12].mxu1 %vm162_vm1, %v40_v22  ;;  %v4460_v23 = vld [vmem:[%s5457_s3 + $0x10] sm:$0xff] }
  0x25   :  { %517 = vmatprep.mubr.f32.mxu1 %v4104_v2  ;;  %619 = vperm.xlu1 %4061, %v597_v54  }
  0x26   :  { %3280 = vmatmul.mubr.msk.f32.gmra.mrb[16].mxu0 %vm162_vm1, %v40_v22  ;;  %v1154_v22 = vld [vmem:[%s5459_s5 + $0x168] sm:$0xff] }
  0x27   :  { %344 = vmatprep.mubr.f32.mxu0 %v4104_v2 }
  0x28   :  { %1161 = vperm.xlu0 %4060, %v1143_v25   ;;  %3301 = vmatmul.mubr.msk.f32.gmra.mrb[14].mxu1 %vm162_vm1, %v41_v24  ;;  %v4471_v25 = vld [vmem:[%s5457_s3 + $0x18] sm:$0xff] }
  0x29   :  { %523 = vmatprep.mubr.f32.mxu1 %v4104_v2  ;;  %629 = vperm.xlu1 %4061, %v599_v55  }
  0x2a   :  { %3281 = vmatmul.mubr.msk.f32.gmra.mrb[18].mxu0 %vm162_vm1, %v41_v24  ;;  %v1156_v24 = vld [vmem:[%s5459_s5 + $0x178] sm:$0xff] }
  0x2b   :  { %350 = vmatprep.mubr.f32.mxu0 %v4104_v2 }
  0x2c   :  { %1171 = vperm.xlu0 %4060, %v1145_v27   ;;  %3302 = vmatmul.mubr.msk.f32.gmra.mrb[16].mxu1 %vm162_vm1, %v42_v26  ;;  %v4482_v27 = vld [vmem:[%s5457_s3 + $0x20] sm:$0xff] }
  0x2d   :  { %529 = vmatprep.mubr.f32.mxu1 %v4104_v2  ;;  %639 = vperm.xlu1 %4061, %v601_v56  }
  0x2e   :  { %3282 = vmatmul.mubr.msk.f32.gmra.mrb[20].mxu0 %vm162_vm1, %v42_v26  ;;  %v1158_v26 = vld [vmem:[%s5459_s5 + $0x188] sm:$0xff] }
  0x2f   :  { %356 = vmatprep.mubr.f32.mxu0 %v4104_v2 }
  0x30   :  { %1181 = vperm.xlu0 %4060, %v1147_v29   ;;  %3303 = vmatmul.mubr.msk.f32.gmra.mrb[18].mxu1 %vm162_vm1, %v43_v28  ;;  %v4493_v29 = vld [vmem:[%s5457_s3 + $0x28] sm:$0xff] }
  0x31   :  { %535 = vmatprep.mubr.f32.mxu1 %v4104_v2  ;;  %649 = vperm.xlu1 %4061, %v603_v57  }
  0x32   :  { %3283 = vmatmul.mubr.msk.f32.gmra.mrb[22].mxu0 %vm162_vm1, %v43_v28  ;;  %v1984_v28 = vld [vmem:[%s5459_s5 + $0x198] sm:$0xff] }
  0x33   :  { %362 = vmatprep.mubr.f32.mxu0 %v4104_v2 }
  0x34   :  { %1191 = vperm.xlu0 %4060, %v1149_v31   ;;  %3304 = vmatmul.mubr.msk.f32.gmra.mrb[20].mxu1 %vm162_vm1, %v44_v30  ;;  %v4504_v31 = vld [vmem:[%s5457_s3 + $0x30] sm:$0xff] }
  0x35   :  { %541 = vmatprep.mubr.f32.mxu1 %v4104_v2  ;;  %659 = vperm.xlu1 %4061, %v605_v58  }
  0x36   :  { %3284 = vmatmul.mubr.msk.f32.gmra.mrb[24].mxu0 %vm162_vm1, %v44_v30  ;;  %v1986_v30 = vld [vmem:[%s5459_s5 + $0x1a8] sm:$0xff] }
  0x37   :  { %368 = vmatprep.mubr.f32.mxu0 %v4104_v2 }
  0x38   :  { %1201 = vperm.xlu0 %4060, %v1151_v33   ;;  %3305 = vmatmul.mubr.msk.f32.gmra.mrb[22].mxu1 %vm162_vm1, %v45_v32  ;;  %v4515_v33 = vld [vmem:[%s5457_s3 + $0x38] sm:$0xff] }
  0x39   :  { %547 = vmatprep.mubr.f32.mxu1 %v4104_v2  ;;  %669 = vperm.xlu1 %4061, %v607_v59  }
  0x3a   :  { %3285 = vmatmul.mubr.msk.f32.gmra.mrb[26].mxu0 %vm162_vm1, %v45_v32  ;;  %v53_v32 = vld [vmem:[%s5459_s5 + $0x18] sm:$0xff] }
  0x3b   :  { %374 = vmatprep.mubr.f32.mxu0 %v4104_v2 }
  0x3c   :  { %1211 = vperm.xlu0 %4060, %v1153_v35   ;;  %3306 = vmatmul.mubr.msk.f32.gmra.mrb[24].mxu1 %vm162_vm1, %v46_v34  ;;  %v4526_v35 = vld [vmem:[%s5457_s3 + $0x40] sm:$0xff] }
  0x3d   :  { %553 = vmatprep.mubr.f32.mxu1 %v4104_v2  ;;  %679 = vperm.xlu1 %4061, %v609_v60  }
  0x3e   :  { %3286 = vmatmul.mubr.msk.f32.gmra.mrb[28].mxu0 %vm162_vm1, %v46_v34  ;;  %v55_v34 = vld [vmem:[%s5459_s5 + $0x28] sm:$0xff] }
  0x3f   :  { %380 = vmatprep.mubr.f32.mxu0 %v4104_v2 }
  0x40   :  { %1221 = vperm.xlu0 %4060, %v1155_v37   ;;  %3307 = vmatmul.mubr.msk.f32.gmra.mrb[26].mxu1 %vm162_vm1, %v47_v36  ;;  %v4537_v37 = vld [vmem:[%s5457_s3 + $0x48] sm:$0xff] }
  0x41   :  { %559 = vmatprep.mubr.f32.mxu1 %v4104_v2  ;;  %689 = vperm.xlu1 %4061, %v611_v61  }
  0x42   :  { %3287 = vmatmul.mubr.msk.f32.gmra.mrb[30].mxu0 %vm162_vm1, %v47_v36  ;;  %v57_v36 = vld [vmem:[%s5459_s5 + $0x38] sm:$0xff] }
  0x43   :  { %386 = vmatprep.mubr.f32.mxu0 %v4104_v2 }
  0x44   :  { %1231 = vperm.xlu0 %4060, %v1157_v39   ;;  %3308 = vmatmul.mubr.msk.f32.gmra.mrb[28].mxu1 %vm162_vm1, %v48_v38  ;;  %v4548_v39 = vld [vmem:[%s5457_s3 + $0x50] sm:$0xff] }
  0x45   :  { %565 = vmatprep.mubr.f32.mxu1 %v4104_v2  ;;  %1166 = vperm.xlu1 %4061, %v1144_v0  }
  0x46   :  { %3288 = vmatmul.mubr.msk.f32.gmra.mrb[32].mxu0 %vm162_vm1, %v48_v38  ;;  %v59_v38 = vld [vmem:[%s5459_s5 + $0x48] sm:$0xff] }
  0x47   :  { %392 = vmatprep.mubr.f32.mxu0 %v4104_v2 }
  0x48   :  { %1989 = vperm.xlu0 %4060, %v1983_v41   ;;  %3309 = vmatmul.mubr.msk.f32.gmra.mrb[30].mxu1 %vm162_vm1, %v49_v40  ;;  %v591_v41 = vld [vmem:[%s5457_s3 + $0x58] sm:$0xff] }
  0x49   :  { %966 = vmatprep.mubr.f32.mxu1 %v4104_v2  ;;  %1176 = vperm.xlu1 %4061, %v1146_v7  }
  0x4a   :  { %3289 = vmatmul.mubr.msk.f32.gmra.mrb[34].mxu0 %vm162_vm1, %v49_v40  ;;  %v61_v40 = vld [vmem:[%s5459_s5 + $0x58] sm:$0xff] }
  0x4b   :  { %463 = vmatprep.mubr.f32.mxu0 %v4104_v2 }
  0x4c   :  { %1999 = vperm.xlu0 %4060, %v1985_v42   ;;  %v63_v42 = vld [vmem:[%s5459_s5 + $0x68] sm:$0xff] }
  0x4d   :  { %1186 = vperm.xlu1 %4061, %v1148_v15  }
  0x4e   :  { %3292 = vmatmul.mubr.msk.f32.vlgmr.msra.gmra.mrb[36].mxu0 %vm162_vm1, %v4161_v3 }
  0x4f   :  { %469 = vmatprep.mubr.f32.mxu0 %v4104_v2 }
  0x50   :  { %80 = vperm.xlu0 %4060, %v52_v43   ;;  %v592_v43 = vld [vmem:[%s5457_s3 + $0x60] sm:$0xff] }
  0x51   :  { %1196 = vperm.xlu1 %4061, %v1150_v18  }
  0x52   :  { %3293 = vmatmul.mubr.msk.f32.gmra.mrb[38].mxu0 %vm162_vm1, %v4174_v6 }
  0x53   :  { %805 = vmatprep.mubr.f32.mxu0 %v4104_v2 }
  0x54   :  { %90 = vperm.xlu0 %4060, %v54_v44   ;;  %v65_v44 = vld [vmem:[%s5459_s5 + $0x78] sm:$0xff] }
  0x55   :  { %1206 = vperm.xlu1 %4061, %v1152_v20  }
  0x58   :  { %100 = vperm.xlu0 %4060, %v56_v45   ;;  %v593_v45 = vld [vmem:[%s5457_s3 + $0x68] sm:$0xff] }
  0x59   :  { %1216 = vperm.xlu1 %4061, %v1154_v22  }
  0x5c   :  { %110 = vperm.xlu0 %4060, %v58_v46   ;;  %v67_v46 = vld [vmem:[%s5459_s5 + $0x88] sm:$0xff] }
  0x5d   :  { %1226 = vperm.xlu1 %4061, %v1156_v24  }
  0x60   :  { %120 = vperm.xlu0 %4060, %v60_v47   ;;  %v594_v47 = vld [vmem:[%s5457_s3 + $0x70] sm:$0xff] }
  0x61   :  { %1236 = vperm.xlu1 %4061, %v1158_v26  }
  0x64   :  { %130 = vperm.xlu0 %4060, %v62_v48   ;;  %v2823_v48 = vld [vmem:[%s5459_s5 + $0x1b8] sm:$0xff] }
  0x65   :  { %1994 = vperm.xlu1 %4061, %v1984_v28  }
  0x68   :  { %140 = vperm.xlu0 %4060, %v64_v49  }
  0x69   :  { %2004 = vperm.xlu1 %4061, %v1986_v30  }
  0x6c   :  { %150 = vperm.xlu0 %4060, %v66_v50  }
  0x6d   :  { %85 = vperm.xlu1 %4061, %v53_v32  }
  0x70   :  { %2826 = vperm.xlu0 %4060, %v2822_v51   ;;  %v595_v51 = vld [vmem:[%s5457_s3 + $0x78] sm:$0xff] }
  0x71   :  { %95 = vperm.xlu1 %4061, %v55_v34  }
  0x74   :  { %3000 = vperm.xlu0 %4060, %v2997_v52  }
  0x75   :  { %105 = vperm.xlu1 %4061, %v57_v36  }
  0x79   :  { %115 = vperm.xlu1 %4061, %v59_v38  }
  0x7d   :  { %125 = vperm.xlu1 %4061, %v61_v40  }
  0x81   :  { %135 = vperm.xlu1 %4061, %v63_v42  }
  0x83   :  { %v4415_v62 = vpop.permute.xlu0 %70 }
  0x85   :  { %145 = vperm.xlu1 %4061, %v65_v44  }
  0x87   :  { %v4421_v4 = vpop.permute.xlu0 %75 }
  0x89   :  { %155 = vperm.xlu1 %4061, %v67_v46  }
  0x8b   :  { %v4648_v18 = vpop.permute.xlu0 %624 }
  0x8d   :  { %2831 = vperm.xlu1 %4061, %v2823_v48  }
  0x8f   :  { %v4656_v34 = vpop.permute.xlu0 %634 }
  0xd9   :  { %v292_v63 = vpop.f32.mrb[0].mxu0 }
  0xda   :  { %v294_v1 = vpop.f32.mrb[1].mxu0  ;;  %v293_v3 = vadd.f32 %v292_v63, %v4415_v62 }
  0xdb   :  { %v295_v5 = vadd.f32 %v294_v1, %v4415_v62 }
  0xdc   :  { %v572_v11 = vmax.f32 %v293_v3, 0.0 }
  0xdd   :  { %v298_v6 = vpop.f32.mrb[2].mxu0  ;;  %v573_v13 = vmax.f32 %v295_v5, 0.0 }
  0xde   :  { %v299_v8 = vadd.f32 %v298_v6, %v4421_v4  ;;  %v300_v9 = vpop.f32.mrb[3].mxu0 }
  0xdf   :  { %v301_v10 = vadd.f32 %v300_v9, %v4421_v4 }
  0xe0   :  { %v576_v12 = vmax.f32 %v299_v8, 0.0 }
  0xe1   :  { %v577_v14 = vmax.f32 %v301_v10, 0.0 }
  0xe2   :  { %v3664_v16 = vpack.c.bf16 %v576_v12, %v572_v11 }
  0xe3   :  { %v3662_v17 = vpack.c.bf16 %v577_v14, %v573_v13 }
  0xe5   :  { %3663 = vmatprep.subr.bf16.mxu0 %v3662_v17 }
  0xe6   :  { %3665 = vmatpush1.bf16.msra.mxu0 %v3664_v16 }
  0xe9   :  { %3310 = vmatmul.mubr.msk.f32.vlgmr.msra.gmra.mrb[40].mxu0 %vm692_vm2, %v4438_v19 }
  0xea   :  { %811 = vmatprep.mubr.f32.mxu0 %v4104_v2 }
  0xed   :  { %3311 = vmatmul.mubr.msk.f32.gmra.mrb[42].mxu0 %vm692_vm2, %v4449_v21 }
  0xee   :  { %817 = vmatprep.mubr.f32.mxu0 %v4104_v2 }
  0xf1   :  { %3312 = vmatmul.mubr.msk.f32.gmra.mrb[44].mxu0 %vm692_vm2, %v4460_v23 }
  0xf2   :  { %823 = vmatprep.mubr.f32.mxu0 %v4104_v2 }
  0xf5   :  { %3313 = vmatmul.mubr.msk.f32.gmra.mrb[46].mxu0 %vm692_vm2, %v4471_v25 }
  0xf6   :  { %829 = vmatprep.mubr.f32.mxu0 %v4104_v2 }
  0xf9   :  { %3314 = vmatmul.mubr.msk.f32.gmra.mrb[48].mxu0 %vm692_vm2, %v4482_v27 }
  0xfa   :  { %835 = vmatprep.mubr.f32.mxu0 %v4104_v2 }
  0xfd   :  { %3315 = vmatmul.mubr.msk.f32.gmra.mrb[50].mxu0 %vm692_vm2, %v4493_v29 }
  0xfe   :  { %841 = vmatprep.mubr.f32.mxu0 %v4104_v2 }
 0x101   :  { %3316 = vmatmul.mubr.msk.f32.gmra.mrb[52].mxu0 %vm692_vm2, %v4504_v31 }
 0x102   :  { %847 = vmatprep.mubr.f32.mxu0 %v4104_v2 }
 0x105   :  { %3317 = vmatmul.mubr.msk.f32.gmra.mrb[54].mxu0 %vm692_vm2, %v4515_v33 }
 0x106   :  { %853 = vmatprep.mubr.f32.mxu0 %v4104_v2 }
 0x109   :  { %3318 = vmatmul.mubr.msk.f32.gmra.mrb[56].mxu0 %vm692_vm2, %v4526_v35 }
 0x10a   :  { %859 = vmatprep.mubr.f32.mxu0 %v4104_v2 }
 0x10d   :  { %3319 = vmatmul.mubr.msk.f32.gmra.mrb[58].mxu0 %vm692_vm2, %v4537_v37 }
 0x10e   :  { %865 = vmatprep.mubr.f32.mxu0 %v4104_v2 }
 0x111   :  { %3320 = vmatmul.mubr.msk.f32.gmra.mrb[60].mxu0 %vm692_vm2, %v4548_v39 }
 0x112   :  { %871 = vmatprep.mubr.f32.mxu0 %v4104_v2 }
 0x115   :  { %3321 = vmatmul.mubr.msk.f32.gmra.mrb[62].mxu0 %vm692_vm2, %v591_v41 }
 0x116   :  { %877 = vmatprep.mubr.f32.mxu0 %v4104_v2 }
 0x119   :  { %3322 = vmatmul.mubr.msk.f32.gmra.mrb[64].mxu0 %vm692_vm2, %v592_v43 }
 0x11a   :  { %883 = vmatprep.mubr.f32.mxu0 %v4104_v2 }
 0x11d   :  { %3323 = vmatmul.mubr.msk.f32.gmra.mrb[66].mxu0 %vm692_vm2, %v593_v45 }
 0x11e   :  { %889 = vmatprep.mubr.f32.mxu0 %v4104_v2 }
 0x121   :  { %v465_v49 = vpop.f32.mrb[36].mxu0  ;;  %3324 = vmatmul.mubr.msk.f32.gmra.mrb[68].mxu0 %vm692_vm2, %v594_v47 }
 0x122   :  { %v467_v50 = vpop.f32.mrb[37].mxu0  ;;  %895 = vmatprep.mubr.f32.mxu0 %v4104_v2  ;;  %v466_v52 = vadd.f32 %v465_v49, %v4415_v62 }
 0x123   :  { %v468_v53 = vadd.f32 %v467_v50, %v4415_v62  ;;  %v4640_v62 = vpop.permute.xlu1 %614  ;;  %v4664_v50 = vpop.permute.xlu0 %644 }
 0x124   :  { %v574_v58 = vmax.f32 %v466_v52, 0.0 }
 0x125   :  { %v471_v54 = vpop.f32.mrb[38].mxu0  ;;  %3325 = vmatmul.mubr.msk.f32.gmra.mrb[70].mxu0 %vm692_vm2, %v595_v51  ;;  %v575_v60 = vmax.f32 %v468_v53, 0.0 }
 0x126   :  { %v472_v55 = vadd.f32 %v471_v54, %v4421_v4  ;;  %v473_v56 = vpop.f32.mrb[39].mxu0  ;;  %1303 = vmatprep.mubr.f32.mxu0 %v4104_v2 }
 0x127   :  { %v474_v57 = vadd.f32 %v473_v56, %v4421_v4  ;;  %v4644_v6 = vpop.permute.xlu1 %619 }
 0x128   :  { %v578_v59 = vmax.f32 %v472_v55, 0.0 }
 0x129   :  { %v579_v61 = vmax.f32 %v474_v57, 0.0 }
 0x12a   :  { %v3668_v63 = vpack.c.bf16 %v578_v59, %v574_v58 }
 0x12b   :  { %v3666_v0 = vpack.c.bf16 %v579_v61, %v575_v60 }
 0x12d   :  { %3667 = vmatprep.subr.bf16.mxu1 %v3666_v0 }
 0x12e   :  { %3669 = vmatpush1.bf16.msra.mxu1 %v3668_v63 }
 0x131   :  { %3326 = vmatmul.mubr.msk.f32.vlgmr.msra.gmra.mrb[32].mxu1 %vm692_vm2, %v4438_v19 }
 0x132   :  { %972 = vmatprep.mubr.f32.mxu1 %v4104_v2 }
 0x135   :  { %3327 = vmatmul.mubr.msk.f32.gmra.mrb[34].mxu1 %vm692_vm2, %v4449_v21  ;;  %v4651_v21 = vpop.permute.xlu1 %629 }
 0x136   :  { %978 = vmatprep.mubr.f32.mxu1 %v4104_v2 }
 0x139   :  { %3328 = vmatmul.mubr.msk.f32.gmra.mrb[36].mxu1 %vm692_vm2, %v4460_v23 }
 0x13a   :  { %984 = vmatprep.mubr.f32.mxu1 %v4104_v2 }
 0x13d   :  { %3329 = vmatmul.mubr.msk.f32.gmra.mrb[38].mxu1 %vm692_vm2, %v4471_v25 }
 0x13e   :  { %990 = vmatprep.mubr.f32.mxu1 %v4104_v2 }
 0x141   :  { %3330 = vmatmul.mubr.msk.f32.gmra.mrb[40].mxu1 %vm692_vm2, %v4482_v27 }
 0x142   :  { %996 = vmatprep.mubr.f32.mxu1 %v4104_v2 }
 0x145   :  { %3331 = vmatmul.mubr.msk.f32.gmra.mrb[42].mxu1 %vm692_vm2, %v4493_v29 }
 0x146   :  { %1002 = vmatprep.mubr.f32.mxu1 %v4104_v2 }
 0x149   :  { %3332 = vmatmul.mubr.msk.f32.gmra.mrb[44].mxu1 %vm692_vm2, %v4504_v31 }
 0x14a   :  { %1008 = vmatprep.mubr.f32.mxu1 %v4104_v2 }
 0x14d   :  { %3333 = vmatmul.mubr.msk.f32.gmra.mrb[46].mxu1 %vm692_vm2, %v4515_v33 }
 0x14e   :  { %1014 = vmatprep.mubr.f32.mxu1 %v4104_v2 }
 0x151   :  { %3334 = vmatmul.mubr.msk.f32.gmra.mrb[48].mxu1 %vm692_vm2, %v4526_v35 }
 0x152   :  { %1020 = vmatprep.mubr.f32.mxu1 %v4104_v2 }
 0x155   :  { %3335 = vmatmul.mubr.msk.f32.gmra.mrb[50].mxu1 %vm692_vm2, %v4537_v37  ;;  %v4659_v37 = vpop.permute.xlu1 %639 }
 0x156   :  { %1026 = vmatprep.mubr.f32.mxu1 %v4104_v2 }
 0x159   :  { %3336 = vmatmul.mubr.msk.f32.gmra.mrb[52].mxu1 %vm692_vm2, %v4548_v39  ;;  %v4667_v53 = vpop.permute.xlu1 %649 }
 0x15a   :  { %1032 = vmatprep.mubr.f32.mxu1 %v4104_v2 }
 0x15d   :  { %3337 = vmatmul.mubr.msk.f32.gmra.mrb[54].mxu1 %vm692_vm2, %v591_v41 }
 0x15e   :  { %1038 = vmatprep.mubr.f32.mxu1 %v4104_v2 }
 0x161   :  { %3338 = vmatmul.mubr.msk.f32.gmra.mrb[56].mxu1 %vm692_vm2, %v592_v43 }
 0x162   :  { %1044 = vmatprep.mubr.f32.mxu1 %v4104_v2 }
 0x165   :  { %3339 = vmatmul.mubr.msk.f32.gmra.mrb[58].mxu1 %vm692_vm2, %v593_v45 }
 0x166   :  { %1050 = vmatprep.mubr.f32.mxu1 %v4104_v2 }
 0x169   :  { %3340 = vmatmul.mubr.msk.f32.gmra.mrb[60].mxu1 %vm692_vm2, %v594_v47 }
 0x16a   :  { %1056 = vmatprep.mubr.f32.mxu1 %v4104_v2 }
 0x16d   :  { %3341 = vmatmul.mubr.msk.f32.gmra.mrb[62].mxu1 %vm692_vm2, %v595_v51 }
 0x16e   :  { %1464 = vmatprep.mubr.f32.mxu1 %v4104_v2 }
 0x1bc   :  { %v807_v1 = vpop.f32.mrb[40].mxu0 }
 0x1bd   :  { %v808_v3 = vadd.f32 %v807_v1, %v4640_v62  ;;  %v809_v4 = vpop.f32.mrb[41].mxu0 }
 0x1be   :  { %v810_v5 = vadd.f32 %v809_v4, %v4640_v62  ;;  %v4672_v4 = vpop.permute.xlu0 %654 }
 0x1bf   :  { %v1063_v8 = vmax.f32 %v808_v3, 0.0 }
 0x1c0   :  { %v813_v7 = vpop.f32.mrb[42].mxu0  ;;  %v1064_v11 = vmax.f32 %v810_v5, 0.0 }
 0x1c1   :  { %v814_v9 = vadd.f32 %v813_v7, %v4644_v6  ;;  %v815_v10 = vpop.f32.mrb[43].mxu0 }
 0x1c2   :  { %v816_v12 = vadd.f32 %v815_v10, %v4644_v6 }
 0x1c3   :  { %v1067_v13 = vmax.f32 %v814_v9, 0.0 }
 0x1c4   :  { %v1068_v14 = vmax.f32 %v816_v12, 0.0  ;;  %v819_v15 = vpop.f32.mrb[44].mxu0 }
 0x1c5   :  { %v3672_v16 = vpack.c.bf16 %v1067_v13, %v1063_v8  ;;  %v821_v17 = vpop.f32.mrb[45].mxu0  ;;  %v820_v20 = vadd.f32 %v819_v15, %v4648_v18  ;;  %v4675_v8 = vpop.permute.xlu1 %659 }
 0x1c6   :  { %v3670_v19 = vpack.c.bf16 %v1068_v14, %v1064_v11  ;;  %v822_v22 = vadd.f32 %v821_v17, %v4648_v18 }
 0x1c7   :  { %v1071_v27 = vmax.f32 %v820_v20, 0.0 }
 0x1c8   :  { %v825_v23 = vpop.f32.mrb[46].mxu0  ;;  %3671 = vmatprep.subr.bf16.mxu0 %v3670_v19  ;;  %v1072_v29 = vmax.f32 %v822_v22, 0.0 }
 0x1c9   :  { %v826_v24 = vadd.f32 %v825_v23, %v4651_v21  ;;  %v827_v25 = vpop.f32.mrb[47].mxu0  ;;  %3673 = vmatpush1.bf16.msra.mxu0 %v3672_v16  ;;  %v4680_v23 = vpop.permute.xlu0 %664 }
 0x1ca   :  { %v828_v26 = vadd.f32 %v827_v25, %v4651_v21 }
 0x1cb   :  { %v1075_v28 = vmax.f32 %v826_v24, 0.0 }
 0x1cc   :  { %v1076_v30 = vmax.f32 %v828_v26, 0.0  ;;  %v831_v31 = vpop.f32.mrb[48].mxu0  ;;  %v4683_v26 = vpop.permute.xlu1 %669 }
 0x1cd   :  { %v3676_v32 = vpack.c.bf16 %v1075_v28, %v1071_v27  ;;  %v833_v33 = vpop.f32.mrb[49].mxu0  ;;  %v832_v36 = vadd.f32 %v831_v31, %v4656_v34 }
 0x1ce   :  { %v3674_v35 = vpack.c.bf16 %v1076_v30, %v1072_v29  ;;  %v834_v38 = vadd.f32 %v833_v33, %v4656_v34 }
 0x1cf   :  { %v1079_v43 = vmax.f32 %v832_v36, 0.0 }
 0x1d0   :  { %v837_v39 = vpop.f32.mrb[50].mxu0  ;;  %3675 = vmatprep.subr.bf16.mxu0 %v3674_v35  ;;  %v1080_v45 = vmax.f32 %v834_v38, 0.0 }
 0x1d1   :  { %v838_v40 = vadd.f32 %v837_v39, %v4659_v37  ;;  %v839_v41 = vpop.f32.mrb[51].mxu0  ;;  %3677 = vmatpush1.bf16.msra.mxu0 %v3676_v32 }
 0x1d2   :  { %v840_v42 = vadd.f32 %v839_v41, %v4659_v37  ;;  %v4688_v41 = vpop.permute.xlu0 %674 }
 0x1d3   :  { %v1083_v44 = vmax.f32 %v838_v40, 0.0 }
 0x1d4   :  { %v1084_v46 = vmax.f32 %v840_v42, 0.0  ;;  %v843_v47 = vpop.f32.mrb[52].mxu0 }
 0x1d5   :  { %v3680_v48 = vpack.c.bf16 %v1083_v44, %v1079_v43  ;;  %v845_v49 = vpop.f32.mrb[53].mxu0  ;;  %v844_v52 = vadd.f32 %v843_v47, %v4664_v50  ;;  %v4691_v44 = vpop.permute.xlu1 %679 }
 0x1d6   :  { %v3678_v51 = vpack.c.bf16 %v1084_v46, %v1080_v45  ;;  %v846_v54 = vadd.f32 %v845_v49, %v4664_v50 }
 0x1d7   :  { %v1087_v59 = vmax.f32 %v844_v52, 0.0 }
 0x1d8   :  { %v849_v55 = vpop.f32.mrb[54].mxu0  ;;  %3679 = vmatprep.subr.bf16.mxu0 %v3678_v51  ;;  %v1088_v61 = vmax.f32 %v846_v54, 0.0 }
 0x1d9   :  { %v850_v56 = vadd.f32 %v849_v55, %v4667_v53  ;;  %v851_v57 = vpop.f32.mrb[55].mxu0  ;;  %3681 = vmatpush1.bf16.msra.mxu0 %v3680_v48 }
 0x1da   :  { %v852_v58 = vadd.f32 %v851_v57, %v4667_v53 }
 0x1db   :  { %v1091_v60 = vmax.f32 %v850_v56, 0.0 }
 0x1dc   :  { %v1092_v63 = vmax.f32 %v852_v58, 0.0  ;;  %v855_v0 = vpop.f32.mrb[56].mxu0 }
 0x1dd   :  { %v3684_v1 = vpack.c.bf16 %v1091_v60, %v1087_v59  ;;  %v857_v3 = vpop.f32.mrb[57].mxu0  ;;  %v856_v7 = vadd.f32 %v855_v0, %v4672_v4  ;;  %v4696_v59 = vpop.permute.xlu0 %684 }
 0x1de   :  { %v3682_v5 = vpack.c.bf16 %v1092_v63, %v1088_v61  ;;  %v858_v9 = vadd.f32 %v857_v3, %v4672_v4  ;;  %v4699_v63 = vpop.permute.xlu1 %689 }
 0x1df   :  { %v1095_v14 = vmax.f32 %v856_v7, 0.0 }
 0x1e0   :  { %v861_v10 = vpop.f32.mrb[58].mxu0  ;;  %3683 = vmatprep.subr.bf16.mxu0 %v3682_v5  ;;  %v1096_v16 = vmax.f32 %v858_v9, 0.0 }
 0x1e1   :  { %v862_v11 = vadd.f32 %v861_v10, %v4675_v8  ;;  %v863_v12 = vpop.f32.mrb[59].mxu0  ;;  %3685 = vmatpush1.bf16.msra.mxu0 %v3684_v1 }
 0x1e2   :  { %v864_v13 = vadd.f32 %v863_v12, %v4675_v8 }
 0x1e3   :  { %v1099_v15 = vmax.f32 %v862_v11, 0.0 }
 0x1e4   :  { %v1100_v17 = vmax.f32 %v864_v13, 0.0  ;;  %v867_v19 = vpop.f32.mrb[60].mxu0 }
 0x1e5   :  { %v3688_v20 = vpack.c.bf16 %v1099_v15, %v1095_v14  ;;  %v869_v22 = vpop.f32.mrb[61].mxu0  ;;  %v868_v25 = vadd.f32 %v867_v19, %v4680_v23  ;;  %v4707_v15 = vld [vmem:[%s5456_s2] sm:$0xff]  ;;  %v4714_v19 = vld [vmem:[%s5456_s2 + $0x8] sm:$0xff] }
 0x1e6   :  { %v3686_v24 = vpack.c.bf16 %v1100_v17, %v1096_v16  ;;  %v870_v27 = vadd.f32 %v869_v22, %v4680_v23  ;;  %v4720_v22 = vld [vmem:[%s5456_s2 + $0x10] sm:$0xff] }
 0x1e7   :  { %v1103_v32 = vmax.f32 %v868_v25, 0.0 }
 0x1e8   :  { %v873_v28 = vpop.f32.mrb[62].mxu0  ;;  %3687 = vmatprep.subr.bf16.mxu0 %v3686_v24  ;;  %v1104_v35 = vmax.f32 %v870_v27, 0.0  ;;  %v1641_v27 = vld [vmem:[%s5460_s6 + $0x80] sm:$0xff] }
 0x1e9   :  { %v874_v29 = vadd.f32 %v873_v28, %v4683_v26  ;;  %v875_v30 = vpop.f32.mrb[63].mxu0  ;;  %3689 = vmatpush1.bf16.msra.mxu0 %v3688_v20  ;;  %v1642_v28 = vld [vmem:[%s5460_s6 + $0x88] sm:$0xff] }
 0x1ea   :  { %v876_v31 = vadd.f32 %v875_v30, %v4683_v26 }
 0x1eb   :  { %v1107_v33 = vmax.f32 %v874_v29, 0.0  ;;  %v1625_v29 = vld [vmem:[%s5460_s6] sm:$0xff] }
 0x1ec   :  { %v1108_v36 = vmax.f32 %v876_v31, 0.0  ;;  %v879_v38 = vpop.f32.mrb[64].mxu0 }
 0x1ed   :  { %v3692_v39 = vpack.c.bf16 %v1107_v33, %v1103_v32  ;;  %v881_v40 = vpop.f32.mrb[65].mxu0  ;;  %v880_v43 = vadd.f32 %v879_v38, %v4688_v41  ;;  %v1626_v32 = vld [vmem:[%s5460_s6 + $0x8] sm:$0xff]  ;;  %v1643_v33 = vld [vmem:[%s5460_s6 + $0x90] sm:$0xff] }
 0x1ee   :  { %v3690_v42 = vpack.c.bf16 %v1108_v36, %v1104_v35  ;;  %v882_v45 = vadd.f32 %v881_v40, %v4688_v41  ;;  %v1644_v35 = vld [vmem:[%s5460_s6 + $0x98] sm:$0xff]  ;;  %v3736_v38 = vpack.c.bf16 %v1626_v32, %v1625_v29 }
 0x1ef   :  { %v1111_v51 = vmax.f32 %v880_v43, 0.0  ;;  %v1627_v43 = vld [vmem:[%s5460_s6 + $0x10] sm:$0xff] }
 0x1f0   :  { %v885_v46 = vpop.f32.mrb[66].mxu0  ;;  %3691 = vmatprep.subr.bf16.mxu0 %v3690_v42  ;;  %v1112_v54 = vmax.f32 %v882_v45, 0.0  ;;  %v1628_v45 = vld [vmem:[%s5460_s6 + $0x18] sm:$0xff] }
 0x1f1   :  { %v886_v47 = vadd.f32 %v885_v46, %v4691_v44  ;;  %v887_v48 = vpop.f32.mrb[67].mxu0  ;;  %3693 = vmatpush1.bf16.msra.mxu0 %v3692_v39  ;;  %v3738_v39 = vpack.c.bf16 %v1644_v35, %v1643_v33  ;;  %v1633_v35 = vld [vmem:[%s5460_s6 + $0x40] sm:$0xff] }
 0x1f2   :  { %v888_v49 = vadd.f32 %v887_v48, %v4691_v44 }
 0x1f3   :  { %v1115_v52 = vmax.f32 %v886_v47, 0.0 }
 0x1f4   :  { %v1116_v55 = vmax.f32 %v888_v49, 0.0  ;;  %v891_v56 = vpop.f32.mrb[68].mxu0  ;;  %v1646_v49 = vld [vmem:[%s5460_s6 + $0xa8] sm:$0xff] }
 0x1f5   :  { %v3696_v57 = vpack.c.bf16 %v1115_v52, %v1111_v51  ;;  %v893_v58 = vpop.f32.mrb[69].mxu0  ;;  %v892_v61 = vadd.f32 %v891_v56, %v4696_v59  ;;  %v3740_v56 = vpack.c.bf16 %v1628_v45, %v1627_v43 }
 0x1f6   :  { %v3694_v60 = vpack.c.bf16 %v1116_v55, %v1112_v54  ;;  %v894_v0 = vadd.f32 %v893_v58, %v4696_v59  ;;  %v4762_v54 = vld [vmem:[%s5456_s2 + $0x18] sm:$0xff] }
 0x1f7   :  { %v1119_v9 = vmax.f32 %v892_v61, 0.0  ;;  %v1630_v61 = vld [vmem:[%s5460_s6 + $0x28] sm:$0xff] }
 0x1f8   :  { %v897_v1 = vpop.f32.mrb[70].mxu0  ;;  %3695 = vmatprep.subr.bf16.mxu0 %v3694_v60  ;;  %v1120_v11 = vmax.f32 %v894_v0, 0.0  ;;  %v1629_v60 = vld [vmem:[%s5460_s6 + $0x20] sm:$0xff] }
 0x1f9   :  { %v898_v3 = vadd.f32 %v897_v1, %v4699_v63  ;;  %v899_v5 = vpop.f32.mrb[71].mxu0  ;;  %3697 = vmatpush1.bf16.msra.mxu0 %v3696_v57 }
 0x1fa   :  { %v900_v7 = vadd.f32 %v899_v5, %v4699_v63  ;;  %v1648_v5 = vld [vmem:[%s5460_s6 + $0xb8] sm:$0xff] }
 0x1fb   :  { %v1123_v10 = vmax.f32 %v898_v3, 0.0  ;;  %v1647_v3 = vld [vmem:[%s5460_s6 + $0xb0] sm:$0xff] }
 0x1fc   :  { %v1124_v12 = vmax.f32 %v900_v7, 0.0 }
 0x1fd   :  { %v3700_v13 = vpack.c.bf16 %v1123_v10, %v1119_v9 }
 0x1fe   :  { %v3698_v14 = vpack.c.bf16 %v1124_v12, %v1120_v11  ;;  %v3744_v11 = vpack.c.bf16 %v1630_v61, %v1629_v60 }
 0x200   :  { %3699 = vmatprep.subr.bf16.mxu0 %v3698_v14  ;;  %v3746_v14 = vpack.c.bf16 %v1648_v5, %v1647_v3 }
 0x201   :  { %3701 = vmatpush1.bf16.msra.mxu0 %v3700_v13 }
 0x204   :  { %1304 = vmatmul.mubr.f32.vlgmr.msra.gmra.mrb[72].mxu0 %v4707_v15  ;;  %v968_v16 = vpop.f32.mrb[32].mxu1 }
 0x205   :  { %v970_v17 = vpop.f32.mrb[33].mxu1  ;;  %1309 = vmatprep.mubr.f32.mxu0 %v4104_v2  ;;  %v969_v20 = vadd.f32 %v968_v16, %v4640_v62  ;;  %v1631_v16 = vld [vmem:[%s5460_s6 + $0x30] sm:$0xff] }
 0x206   :  { %v971_v24 = vadd.f32 %v970_v17, %v4640_v62  ;;  %v3734_v62 = vpack.c.bf16 %v1642_v28, %v1641_v27  ;;  %v1632_v17 = vld [vmem:[%s5460_s6 + $0x38] sm:$0xff]  ;;  %v1650_v27 = vld [vmem:[%s5460_s6 + $0xc8] sm:$0xff] }
 0x207   :  { %v1065_v40 = vmax.f32 %v969_v20, 0.0 }
 0x208   :  { %v974_v25 = vpop.f32.mrb[34].mxu1  ;;  %1310 = vmatmul.mubr.f32.gmra.mrb[74].mxu0 %v4714_v19  ;;  %3735 = vmatprep.subr.bf16.mxu0 %v3734_v62  ;;  %v1066_v46 = vmax.f32 %v971_v24, 0.0  ;;  %v3748_v62 = vpack.c.bf16 %v1632_v17, %v1631_v16 }
 0x209   :  { %v975_v30 = vadd.f32 %v974_v25, %v4644_v6  ;;  %v976_v31 = vpop.f32.mrb[35].mxu1  ;;  %1315 = vmatprep.mubr.f32.mxu0 %v4104_v2  ;;  %3737 = vmatpush3.bf16.msra.mxu0 %v3736_v38 }
 0x20a   :  { %v977_v36 = vadd.f32 %v976_v31, %v4644_v6  ;;  %v1645_v6 = vld [vmem:[%s5460_s6 + $0xa0] sm:$0xff]  ;;  %3739 = vmatprep.subr.bf16.mxu0 %v3738_v39 }
 0x20b   :  { %v1069_v42 = vmax.f32 %v975_v30, 0.0  ;;  %v3742_v58 = vpack.c.bf16 %v1646_v49, %v1645_v6  ;;  %v4804_v30 = vld [vmem:[%s5456_s2 + $0x28] sm:$0xff] }
 0x20c   :  { %v1070_v47 = vmax.f32 %v977_v36, 0.0  ;;  %v980_v48 = vpop.f32.mrb[36].mxu1  ;;  %1316 = vmatmul.mubr.f32.gmra.mrb[76].mxu0 %v4720_v22  ;;  %v1634_v36 = vld [vmem:[%s5460_s6 + $0x48] sm:$0xff] }
 0x20d   :  { %v3704_v51 = vpack.c.bf16 %v1069_v42, %v1065_v40  ;;  %v982_v52 = vpop.f32.mrb[37].mxu1  ;;  %1321 = vmatprep.mubr.f32.mxu0 %v4104_v2  ;;  %v981_v57 = vadd.f32 %v980_v48, %v4648_v18  ;;  %3741 = vmatpush3.bf16.msra.mxu0 %v3740_v56  ;;  %v1651_v40 = vld [vmem:[%s5460_s6 + $0xd0] sm:$0xff]  ;;  %v1652_v42 = vld [vmem:[%s5460_s6 + $0xd8] sm:$0xff] }
 0x20e   :  { %v3702_v55 = vpack.c.bf16 %v1070_v47, %v1066_v46  ;;  %v983_v0 = vadd.f32 %v982_v52, %v4648_v18  ;;  %v4784_v18 = vld [vmem:[%s5456_s2 + $0x20] sm:$0xff]  ;;  %3743 = vmatprep.subr.bf16.mxu0 %v3742_v58  ;;  %v3752_v47 = vpack.c.bf16 %v1634_v36, %v1633_v35  ;;  %v3754_v49 = vpack.c.bf16 %v1652_v42, %v1651_v40  ;;  %v1636_v52 = vld [vmem:[%s5460_s6 + $0x58] sm:$0xff]  ;;  %v1654_v58 = vld [vmem:[%s5460_s6 + $0xe8] sm:$0xff] }
 0x20f   :  { %v1073_v12 = vmax.f32 %v981_v57, 0.0 }
 0x210   :  { %v986_v1 = vpop.f32.mrb[38].mxu1  ;;  %1322 = vmatmul.mubr.f32.gmra.mrb[78].mxu0 %v4762_v54  ;;  %3703 = vmatprep.subr.bf16.mxu1 %v3702_v55  ;;  %v1074_v20 = vmax.f32 %v983_v0, 0.0  ;;  %v4846_v0 = vld [vmem:[%s5456_s2 + $0x38] sm:$0xff] }
 0x211   :  { %v987_v7 = vadd.f32 %v986_v1, %v4651_v21  ;;  %v988_v9 = vpop.f32.mrb[39].mxu1  ;;  %3705 = vmatpush1.bf16.msra.mxu1 %v3704_v51  ;;  %1327 = vmatprep.mubr.f32.mxu0 %v4104_v2  ;;  %v1635_v51 = vld [vmem:[%s5460_s6 + $0x50] sm:$0xff] }
 0x212   :  { %v989_v10 = vadd.f32 %v988_v9, %v4651_v21  ;;  %v1649_v21 = vld [vmem:[%s5460_s6 + $0xc0] sm:$0xff]  ;;  %3745 = vmatpush3.bf16.msra.mxu0 %v3744_v11  ;;  %v3756_v3 = vpack.c.bf16 %v1636_v52, %v1635_v51 }
 0x213   :  { %v1077_v13 = vmax.f32 %v987_v7, 0.0  ;;  %3747 = vmatprep.subr.bf16.mxu0 %v3746_v14  ;;  %v3750_v33 = vpack.c.bf16 %v1650_v27, %v1649_v21  ;;  %v4864_v27 = vld [vmem:[%s5456_s2 + $0x48] sm:$0xff]  ;;  %v4892_v51 = vld [vmem:[%s5456_s2 + $0x60] sm:$0xff] }
 0x214   :  { %v1078_v24 = vmax.f32 %v989_v10, 0.0  ;;  %v992_v25 = vpop.f32.mrb[40].mxu1  ;;  %1328 = vmatmul.mubr.f32.gmra.mrb[80].mxu0 %v4784_v18 }
 0x215   :  { %v3708_v28 = vpack.c.bf16 %v1077_v13, %v1073_v12  ;;  %v994_v29 = vpop.f32.mrb[41].mxu1  ;;  %1333 = vmatprep.mubr.f32.mxu0 %v4104_v2  ;;  %v993_v32 = vadd.f32 %v992_v25, %v4656_v34  ;;  %v4856_v13 = vld [vmem:[%s5456_s2 + $0x40] sm:$0xff] }
 0x216   :  { %v3706_v31 = vpack.c.bf16 %v1078_v24, %v1074_v20  ;;  %v995_v38 = vadd.f32 %v994_v29, %v4656_v34  ;;  %v4826_v34 = vld [vmem:[%s5456_s2 + $0x30] sm:$0xff]  ;;  %3749 = vmatpush3.bf16.msra.mxu0 %v3748_v62 }
 0x217   :  { %v1081_v48 = vmax.f32 %v993_v32, 0.0  ;;  %3751 = vmatprep.subr.bf16.mxu0 %v3750_v33  ;;  %v4874_v33 = vld [vmem:[%s5456_s2 + $0x50] sm:$0xff] }
 0x218   :  { %v998_v39 = vpop.f32.mrb[42].mxu1  ;;  %1334 = vmatmul.mubr.f32.gmra.mrb[82].mxu0 %v4804_v30  ;;  %3707 = vmatprep.subr.bf16.mxu1 %v3706_v31  ;;  %v1082_v55 = vmax.f32 %v995_v38, 0.0 }
 0x219   :  { %v999_v43 = vadd.f32 %v998_v39, %v4659_v37  ;;  %v1000_v45 = vpop.f32.mrb[43].mxu1  ;;  %3709 = vmatpush1.bf16.msra.mxu1 %v3708_v28  ;;  %1339 = vmatprep.mubr.f32.mxu0 %v4104_v2 }
 0x21a   :  { %v1001_v46 = vadd.f32 %v1000_v45, %v4659_v37  ;;  %v1653_v37 = vld [vmem:[%s5460_s6 + $0xe0] sm:$0xff]  ;;  %3753 = vmatpush3.bf16.msra.mxu0 %v3752_v47  ;;  %v4882_v45 = vld [vmem:[%s5456_s2 + $0x58] sm:$0xff] }
 0x21b   :  { %v1085_v6 = vmax.f32 %v999_v43, 0.0  ;;  %3755 = vmatprep.subr.bf16.mxu0 %v3754_v49  ;;  %v3758_v7 = vpack.c.bf16 %v1654_v58, %v1653_v37 }
 0x21c   :  { %v1086_v56 = vmax.f32 %v1001_v46, 0.0  ;;  %v1004_v57 = vpop.f32.mrb[44].mxu1  ;;  %1340 = vmatmul.mubr.f32.gmra.mrb[84].mxu0 %v4826_v34 }
 0x21d   :  { %v3712_v60 = vpack.c.bf16 %v1085_v6, %v1081_v48  ;;  %v1006_v61 = vpop.f32.mrb[45].mxu1  ;;  %1345 = vmatprep.mubr.f32.mxu0 %v4104_v2  ;;  %v1005_v5 = vadd.f32 %v1004_v57, %v4664_v50 }
 0x21e   :  { %v3710_v1 = vpack.c.bf16 %v1086_v56, %v1082_v55  ;;  %v1007_v9 = vadd.f32 %v1006_v61, %v4664_v50  ;;  %3757 = vmatpush3.bf16.msra.mxu0 %v3756_v3  ;;  %v4900_v61 = vld [vmem:[%s5456_s2 + $0x68] sm:$0xff] }
 0x21f   :  { %v1089_v16 = vmax.f32 %v1005_v5, 0.0  ;;  %3759 = vmatprep.subr.bf16.mxu0 %v3758_v7 }
 0x220   :  { %v1010_v10 = vpop.f32.mrb[46].mxu1  ;;  %1346 = vmatmul.mubr.f32.gmra.mrb[86].mxu0 %v4846_v0  ;;  %3711 = vmatprep.subr.bf16.mxu1 %v3710_v1  ;;  %v1090_v17 = vmax.f32 %v1007_v9, 0.0 }
 0x221   :  { %v1011_v11 = vadd.f32 %v1010_v10, %v4667_v53  ;;  %v1012_v12 = vpop.f32.mrb[47].mxu1  ;;  %3713 = vmatpush1.bf16.msra.mxu1 %v3712_v60  ;;  %1351 = vmatprep.mubr.f32.mxu0 %v4104_v2  ;;  %v4910_v10 = vld [vmem:[%s5456_s2 + $0x70] sm:$0xff] }
 0x222   :  { %v1013_v14 = vadd.f32 %v1012_v12, %v4667_v53 }
 0x223   :  { %v1093_v50 = vmax.f32 %v1011_v11, 0.0 }
 0x224   :  { %v1094_v20 = vmax.f32 %v1013_v14, 0.0  ;;  %v1016_v24 = vpop.f32.mrb[48].mxu1  ;;  %1352 = vmatmul.mubr.f32.gmra.mrb[88].mxu0 %v4856_v13 }
 0x225   :  { %v3716_v25 = vpack.c.bf16 %v1093_v50, %v1089_v16  ;;  %v1018_v21 = vpop.f32.mrb[49].mxu1  ;;  %1357 = vmatprep.mubr.f32.mxu0 %v4104_v2  ;;  %v1017_v53 = vadd.f32 %v1016_v24, %v4672_v4  ;;  %v4918_v24 = vld [vmem:[%s5456_s2 + $0x78] sm:$0xff] }
 0x226   :  { %v3714_v28 = vpack.c.bf16 %v1094_v20, %v1090_v17  ;;  %v1019_v29 = vadd.f32 %v1018_v21, %v4672_v4 }
 0x227   :  { %v1097_v36 = vmax.f32 %v1017_v53, 0.0 }
 0x228   :  { %v1022_v31 = vpop.f32.mrb[50].mxu1  ;;  %1358 = vmatmul.mubr.f32.gmra.mrb[90].mxu0 %v4864_v27  ;;  %3715 = vmatprep.subr.bf16.mxu1 %v3714_v28  ;;  %v1098_v4 = vmax.f32 %v1019_v29, 0.0 }
 0x229   :  { %v1023_v62 = vadd.f32 %v1022_v31, %v4675_v8  ;;  %v1024_v32 = vpop.f32.mrb[51].mxu1  ;;  %3717 = vmatpush1.bf16.msra.mxu1 %v3716_v25  ;;  %1363 = vmatprep.mubr.f32.mxu0 %v4104_v2 }
 0x22a   :  { %v1025_v35 = vadd.f32 %v1024_v32, %v4675_v8 }
 0x22b   :  { %v1101_v38 = vmax.f32 %v1023_v62, 0.0 }
 0x22c   :  { %v1102_v39 = vmax.f32 %v1025_v35, 0.0  ;;  %v1028_v40 = vpop.f32.mrb[52].mxu1  ;;  %1364 = vmatmul.mubr.f32.gmra.mrb[92].mxu0 %v4874_v33 }
 0x22d   :  { %v3720_v42 = vpack.c.bf16 %v1101_v38, %v1097_v36  ;;  %v1030_v43 = vpop.f32.mrb[53].mxu1  ;;  %1369 = vmatprep.mubr.f32.mxu0 %v4104_v2  ;;  %v1029_v47 = vadd.f32 %v1028_v40, %v4680_v23  ;;  %v1639_v40 = vld [vmem:[%s5460_s6 + $0x70] sm:$0xff] }
 0x22e   :  { %v3718_v46 = vpack.c.bf16 %v1102_v39, %v1098_v4  ;;  %v1031_v8 = vadd.f32 %v1030_v43, %v4680_v23 }
 0x22f   :  { %v1105_v55 = vmax.f32 %v1029_v47, 0.0  ;;  %v1660_v47 = vld [vmem:[%s5460_s6 + $0x118] sm:$0xff] }
 0x230   :  { %v1034_v48 = vpop.f32.mrb[54].mxu1  ;;  %1370 = vmatmul.mubr.f32.gmra.mrb[94].mxu0 %v4882_v45  ;;  %3719 = vmatprep.subr.bf16.mxu1 %v3718_v46  ;;  %v1106_v23 = vmax.f32 %v1031_v8, 0.0  ;;  %v1659_v46 = vld [vmem:[%s5460_s6 + $0x110] sm:$0xff] }
 0x231   :  { %v1035_v6 = vadd.f32 %v1034_v48, %v4683_v26  ;;  %v1036_v49 = vpop.f32.mrb[55].mxu1  ;;  %3721 = vmatpush1.bf16.msra.mxu1 %v3720_v42  ;;  %1375 = vmatprep.mubr.f32.mxu0 %v4104_v2  ;;  %v1640_v42 = vld [vmem:[%s5460_s6 + $0x78] sm:$0xff]  ;;  %v3772_v8 = vpack.c.bf16 %v1660_v47, %v1659_v46  ;;  %v1677_v48 = vld [vmem:[%s5460_s6 + $0x1a0] sm:$0xff] }
 0x232   :  { %v1037_v52 = vadd.f32 %v1036_v49, %v4683_v26  ;;  %v3764_v43 = vpack.c.bf16 %v1640_v42, %v1639_v40 }
 0x233   :  { %v1109_v56 = vmax.f32 %v1035_v6, 0.0  ;;  %v1678_v6 = vld [vmem:[%s5460_s6 + $0x1a8] sm:$0xff] }
 0x234   :  { %v1110_v57 = vmax.f32 %v1037_v52, 0.0  ;;  %v1040_v37 = vpop.f32.mrb[56].mxu1  ;;  %1376 = vmatmul.mubr.f32.gmra.mrb[96].mxu0 %v4892_v51  ;;  %v3774_v49 = vpack.c.bf16 %v1678_v6, %v1677_v48  ;;  %v1662_v52 = vld [vmem:[%s5460_s6 + $0x128] sm:$0xff] }
 0x235   :  { %v3724_v58 = vpack.c.bf16 %v1109_v56, %v1105_v55  ;;  %v1042_v60 = vpop.f32.mrb[57].mxu1  ;;  %1381 = vmatprep.mubr.f32.mxu0 %v4104_v2  ;;  %v1041_v3 = vadd.f32 %v1040_v37, %v4688_v41  ;;  %v1679_v56 = vld [vmem:[%s5460_s6 + $0x1b0] sm:$0xff] }
 0x236   :  { %v3722_v1 = vpack.c.bf16 %v1110_v57, %v1106_v23  ;;  %v1043_v26 = vadd.f32 %v1042_v60, %v4688_v41  ;;  %v1680_v23 = vld [vmem:[%s5460_s6 + $0x1b8] sm:$0xff]  ;;  %v1663_v37 = vld [vmem:[%s5460_s6 + $0x130] sm:$0xff] }
 0x237   :  { %v1113_v12 = vmax.f32 %v1041_v3, 0.0  ;;  %v3778_v57 = vpack.c.bf16 %v1680_v23, %v1679_v56 }
 0x238   :  { %v1046_v5 = vpop.f32.mrb[58].mxu1  ;;  %1382 = vmatmul.mubr.f32.gmra.mrb[98].mxu0 %v4900_v61  ;;  %3723 = vmatprep.subr.bf16.mxu1 %v3722_v1  ;;  %v1114_v41 = vmax.f32 %v1043_v26, 0.0  ;;  %v1682_v1 = vld [vmem:[%s5460_s6 + $0x1c8] sm:$0xff]  ;;  %v1665_v26 = vld [vmem:[%s5460_s6 + $0x140] sm:$0xff] }
 0x239   :  { %v1047_v7 = vadd.f32 %v1046_v5, %v4691_v44  ;;  %v1048_v9 = vpop.f32.mrb[59].mxu1  ;;  %3725 = vmatpush1.bf16.msra.mxu1 %v3724_v58  ;;  %1387 = vmatprep.mubr.f32.mxu0 %v4104_v2  ;;  %v1664_v58 = vld [vmem:[%s5460_s6 + $0x138] sm:$0xff]  ;;  %v1666_v5 = vld [vmem:[%s5460_s6 + $0x148] sm:$0xff] }
 0x23a   :  { %v1049_v11 = vadd.f32 %v1048_v9, %v4691_v44  ;;  %v3780_v60 = vpack.c.bf16 %v1664_v58, %v1663_v37  ;;  %v1683_v9 = vld [vmem:[%s5460_s6 + $0x1d0] sm:$0xff] }
 0x23b   :  { %v1117_v14 = vmax.f32 %v1047_v7, 0.0  ;;  %v3784_v7 = vpack.c.bf16 %v1666_v5, %v1665_v26 }
 0x23c   :  { %v1118_v16 = vmax.f32 %v1049_v11, 0.0  ;;  %v1052_v50 = vpop.f32.mrb[60].mxu1  ;;  %1388 = vmatmul.mubr.f32.gmra.mrb[100].mxu0 %v4910_v10 }
 0x23d   :  { %v3728_v17 = vpack.c.bf16 %v1117_v14, %v1113_v12  ;;  %v1054_v20 = vpop.f32.mrb[61].mxu1  ;;  %1393 = vmatprep.mubr.f32.mxu0 %v4104_v2  ;;  %v1053_v21 = vadd.f32 %v1052_v50, %v4696_v59  ;;  %v1667_v12 = vld [vmem:[%s5460_s6 + $0x150] sm:$0xff]  ;;  %v1668_v14 = vld [vmem:[%s5460_s6 + $0x158] sm:$0xff]  ;;  %v1686_v50 = vld [vmem:[%s5460_s6 + $0x1e8] sm:$0xff] }
 0x23e   :  { %v3726_v25 = vpack.c.bf16 %v1118_v16, %v1114_v41  ;;  %v1055_v44 = vadd.f32 %v1054_v20, %v4696_v59  ;;  %v1637_v59 = vld [vmem:[%s5460_s6 + $0x60] sm:$0xff]  ;;  %v3788_v41 = vpack.c.bf16 %v1668_v14, %v1667_v12 }
 0x23f   :  { %v1121_v62 = vmax.f32 %v1053_v21, 0.0  ;;  %v1685_v16 = vld [vmem:[%s5460_s6 + $0x1e0] sm:$0xff]  ;;  %v1687_v21 = vld [vmem:[%s5460_s6 + $0x1f0] sm:$0xff] }
 0x240   :  { %v1058_v28 = vpop.f32.mrb[62].mxu1  ;;  %1394 = vmatmul.mubr.f32.gmra.mrb[102].mxu0 %v4918_v24  ;;  %3727 = vmatprep.subr.bf16.mxu1 %v3726_v25  ;;  %v1122_v35 = vmax.f32 %v1055_v44, 0.0  ;;  %v1669_v20 = vld [vmem:[%s5460_s6 + $0x160] sm:$0xff]  ;;  %v1688_v44 = vld [vmem:[%s5460_s6 + $0x1f8] sm:$0xff] }
 0x241   :  { %v1059_v53 = vadd.f32 %v1058_v28, %v4699_v63  ;;  %v1060_v29 = vpop.f32.mrb[63].mxu1  ;;  %3729 = vmatpush1.bf16.msra.mxu1 %v3728_v17  ;;  %v3790_v17 = vpack.c.bf16 %v1686_v50, %v1685_v16  ;;  %v3794_v28 = vpack.c.bf16 %v1688_v44, %v1687_v21 }
 0x242   :  { %v1061_v31 = vadd.f32 %v1060_v29, %v4699_v63  ;;  %v1638_v63 = vld [vmem:[%s5460_s6 + $0x68] sm:$0xff]  ;;  %v1672_v29 = vld [vmem:[%s5460_s6 + $0x178] sm:$0xff] }
 0x243   :  { %v1125_v32 = vmax.f32 %v1059_v53, 0.0  ;;  %v3760_v39 = vpack.c.bf16 %v1638_v63, %v1637_v59  ;;  %v1671_v53 = vld [vmem:[%s5460_s6 + $0x170] sm:$0xff] }
 0x244   :  { %v1126_v36 = vmax.f32 %v1061_v31, 0.0  ;;  %v3796_v31 = vpack.c.bf16 %v1672_v29, %v1671_v53 }
 0x245   :  { %v3732_v38 = vpack.c.bf16 %v1125_v32, %v1121_v62  ;;  %3761 = vmatpush3.bf16.msra.mxu0 %v3760_v39  ;;  %v5070_v62 = vpop.permute.xlu0 %1161 }
 0x246   :  { %v3730_v4 = vpack.c.bf16 %v1126_v36, %v1122_v35 }
 0x248   :  { %3731 = vmatprep.subr.bf16.mxu1 %v3730_v4  ;;  %v5074_v4 = vpop.permute.xlu1 %1166 }
 0x249   :  { %3733 = vmatpush1.bf16.msra.mxu1 %v3732_v38  ;;  %v5078_v40 = vpop.permute.xlu0 %1171 }
 0x24c   :  { %1465 = vmatmul.mubr.f32.vlgmr.msra.gmra.mrb[64].mxu1 %v4707_v15  ;;  %v1655_v15 = vld [vmem:[%s5460_s6 + $0xf0] sm:$0xff] }
 0x24d   :  { %1470 = vmatprep.mubr.f32.mxu1 %v4104_v2 }
 0x250   :  { %1471 = vmatmul.mubr.f32.gmra.mrb[66].mxu1 %v4714_v19  ;;  %v1656_v19 = vld [vmem:[%s5460_s6 + $0xf8] sm:$0xff] }
 0x251   :  { %1476 = vmatprep.mubr.f32.mxu1 %v4104_v2 }
 0x254   :  { %1477 = vmatmul.mubr.f32.gmra.mrb[68].mxu1 %v4720_v22  ;;  %v3762_v22 = vpack.c.bf16 %v1656_v19, %v1655_v15 }
 0x255   :  { %1482 = vmatprep.mubr.f32.mxu1 %v4104_v2 }
 0x256   :  { %3763 = vmatprep.subr.bf16.mxu0 %v3762_v22 }
 0x257   :  { %3765 = vmatpush3.bf16.msra.mxu0 %v3764_v43 }
 0x258   :  { %1483 = vmatmul.mubr.f32.gmra.mrb[70].mxu1 %v4762_v54  ;;  %v1673_v54 = vld [vmem:[%s5460_s6 + $0x180] sm:$0xff] }
 0x259   :  { %1488 = vmatprep.mubr.f32.mxu1 %v4104_v2 }
 0x25c   :  { %1489 = vmatmul.mubr.f32.gmra.mrb[72].mxu1 %v4784_v18  ;;  %v1674_v18 = vld [vmem:[%s5460_s6 + $0x188] sm:$0xff] }
 0x25d   :  { %1494 = vmatprep.mubr.f32.mxu1 %v4104_v2 }
 0x260   :  { %1495 = vmatmul.mubr.f32.gmra.mrb[74].mxu1 %v4804_v30  ;;  %v3766_v30 = vpack.c.bf16 %v1674_v18, %v1673_v54 }
 0x261   :  { %1500 = vmatprep.mubr.f32.mxu1 %v4104_v2 }
 0x262   :  { %3767 = vmatprep.subr.bf16.mxu1 %v3766_v30 }
 0x264   :  { %1501 = vmatmul.mubr.f32.gmra.mrb[76].mxu1 %v4826_v34  ;;  %v1657_v34 = vld [vmem:[%s5460_s6 + $0x100] sm:$0xff] }
 0x265   :  { %1506 = vmatprep.mubr.f32.mxu1 %v4104_v2 }
 0x268   :  { %1507 = vmatmul.mubr.f32.gmra.mrb[78].mxu1 %v4846_v0  ;;  %v1658_v0 = vld [vmem:[%s5460_s6 + $0x108] sm:$0xff] }
 0x269   :  { %1512 = vmatprep.mubr.f32.mxu1 %v4104_v2 }
 0x26c   :  { %1513 = vmatmul.mubr.f32.gmra.mrb[80].mxu1 %v4856_v13  ;;  %v3768_v13 = vpack.c.bf16 %v1658_v0, %v1657_v34  ;;  %v5082_v0 = vpop.permute.xlu1 %1176 }
 0x26d   :  { %1518 = vmatprep.mubr.f32.mxu1 %v4104_v2 }
 0x26e   :  { %3769 = vmatpush3.bf16.msra.mxu1 %v3768_v13 }
 0x270   :  { %1519 = vmatmul.mubr.f32.gmra.mrb[82].mxu1 %v4864_v27  ;;  %v1675_v27 = vld [vmem:[%s5460_s6 + $0x190] sm:$0xff]  ;;  %v5090_v56 = vpop.permute.xlu1 %1186 }
 0x271   :  { %1524 = vmatprep.mubr.f32.mxu1 %v4104_v2 }
 0x274   :  { %1525 = vmatmul.mubr.f32.gmra.mrb[84].mxu1 %v4874_v33  ;;  %v1676_v33 = vld [vmem:[%s5460_s6 + $0x198] sm:$0xff] }
 0x275   :  { %1530 = vmatprep.mubr.f32.mxu1 %v4104_v2 }
 0x278   :  { %1531 = vmatmul.mubr.f32.gmra.mrb[86].mxu1 %v4882_v45  ;;  %v3770_v45 = vpack.c.bf16 %v1676_v33, %v1675_v27 }
 0x279   :  { %1536 = vmatprep.mubr.f32.mxu1 %v4104_v2 }
 0x27a   :  { %3771 = vmatprep.subr.bf16.mxu1 %v3770_v45 }
 0x27b   :  { %3773 = vmatpush3.bf16.msra.mxu1 %v3772_v8  ;;  %v5086_v8 = vpop.permute.xlu0 %1181 }
 0x27c   :  { %1537 = vmatmul.mubr.f32.gmra.mrb[88].mxu1 %v4892_v51  ;;  %v1661_v51 = vld [vmem:[%s5460_s6 + $0x120] sm:$0xff]  ;;  %3775 = vmatprep.subr.bf16.mxu1 %v3774_v49 }
 0x27d   :  { %1542 = vmatprep.mubr.f32.mxu1 %v4104_v2  ;;  %v3776_v55 = vpack.c.bf16 %v1662_v52, %v1661_v51 }
 0x27f   :  { %3777 = vmatpush3.bf16.msra.mxu1 %v3776_v55 }
 0x280   :  { %1543 = vmatmul.mubr.f32.gmra.mrb[90].mxu1 %v4900_v61  ;;  %3779 = vmatprep.subr.bf16.mxu1 %v3778_v57  ;;  %v1681_v61 = vld [vmem:[%s5460_s6 + $0x1c0] sm:$0xff] }
 0x281   :  { %1548 = vmatprep.mubr.f32.mxu1 %v4104_v2  ;;  %v3782_v3 = vpack.c.bf16 %v1682_v1, %v1681_v61  ;;  %v5094_v1 = vpop.permute.xlu0 %1191 }
 0x283   :  { %3781 = vmatpush3.bf16.msra.mxu1 %v3780_v60 }
 0x284   :  { %1549 = vmatmul.mubr.f32.gmra.mrb[92].mxu1 %v4910_v10  ;;  %3783 = vmatprep.subr.bf16.mxu1 %v3782_v3  ;;  %v1684_v10 = vld [vmem:[%s5460_s6 + $0x1d8] sm:$0xff] }
 0x285   :  { %1554 = vmatprep.mubr.f32.mxu1 %v4104_v2  ;;  %v3786_v11 = vpack.c.bf16 %v1684_v10, %v1683_v9 }
 0x287   :  { %3785 = vmatpush3.bf16.msra.mxu1 %v3784_v7 }
 0x288   :  { %1555 = vmatmul.mubr.f32.gmra.mrb[94].mxu1 %v4918_v24  ;;  %3787 = vmatprep.subr.bf16.mxu1 %v3786_v11  ;;  %v1670_v24 = vld [vmem:[%s5460_s6 + $0x168] sm:$0xff]  ;;  %v5098_v11 = vpop.permute.xlu1 %1196 }
 0x289   :  { %v3792_v25 = vpack.c.bf16 %v1670_v24, %v1669_v20  ;;  %v5102_v20 = vpop.permute.xlu0 %1201 }
 0x28b   :  { %3789 = vmatpush3.bf16.msra.mxu1 %v3788_v41 }
 0x28c   :  { %3791 = vmatprep.subr.bf16.mxu1 %v3790_v17  ;;  %v5106_v29 = vpop.permute.xlu1 %1206 }
 0x28f   :  { %3793 = vmatpush3.bf16.msra.mxu1 %v3792_v25 }
 0x290   :  { %3795 = vmatprep.subr.bf16.mxu1 %v3794_v28 }
 0x293   :  { %3797 = vmatpush3.bf16.msra.mxu1 %v3796_v31 }
 0x2d7   :  { %v1305_v32 = vpop.f32.mrb[72].mxu0 }
 0x2d8   :  { %v1306_v35 = vadd.f32 %v1305_v32, %v5070_v62  ;;  %v1307_v36 = vpop.f32.mrb[73].mxu0 }
 0x2d9   :  { %v1308_v38 = vadd.f32 %v1307_v36, %v5070_v62 }
 0x2da   :  { %v1561_v39 = vmax.f32 %v1306_v35, 0.0 }
 0x2db   :  { %v1562_v59 = vmax.f32 %v1308_v38, 0.0  ;;  %v1311_v63 = vpop.f32.mrb[74].mxu0 }
 0x2dc   :  { %v1312_v15 = vadd.f32 %v1311_v63, %v5074_v4  ;;  %v1313_v19 = vpop.f32.mrb[75].mxu0  ;;  %v5110_v63 = vpop.permute.xlu0 %1211 }
 0x2dd   :  { %v1314_v22 = vadd.f32 %v1313_v19, %v5074_v4  ;;  %1753 = vmatprep.mubr.f32.mxu0 %v1562_v59 }
 0x2de   :  { %1754 = vmatmul.mubr.f32.vlgmr.msra.gmra.mrb[104].mxu0 %v1561_v39  ;;  %v1565_v54 = vmax.f32 %v1312_v15, 0.0 }
 0x2df   :  { %v1566_v42 = vmax.f32 %v1314_v22, 0.0  ;;  %v1317_v43 = vpop.f32.mrb[76].mxu0 }
 0x2e0   :  { %v1318_v18 = vadd.f32 %v1317_v43, %v5078_v40  ;;  %v1319_v30 = vpop.f32.mrb[77].mxu0 }
 0x2e1   :  { %v1320_v34 = vadd.f32 %v1319_v30, %v5078_v40  ;;  %1758 = vmatprep.mubr.f32.mxu0 %v1566_v42 }
 0x2e2   :  { %1759 = vmatmul.mubr.f32.gmra.mrb[106].mxu0 %v1565_v54  ;;  %v1569_v33 = vmax.f32 %v1318_v18, 0.0  ;;  %v5114_v54 = vpop.permute.xlu1 %1216 }
 0x2e3   :  { %v1570_v13 = vmax.f32 %v1320_v34, 0.0  ;;  %v1323_v27 = vpop.f32.mrb[78].mxu0 }
 0x2e4   :  { %v1324_v45 = vadd.f32 %v1323_v27, %v5082_v0  ;;  %v1325_v46 = vpop.f32.mrb[79].mxu0 }
 0x2e5   :  { %v1326_v47 = vadd.f32 %v1325_v46, %v5082_v0  ;;  %1763 = vmatprep.mubr.f32.mxu0 %v1570_v13 }
 0x2e6   :  { %1764 = vmatmul.mubr.f32.gmra.mrb[108].mxu0 %v1569_v33  ;;  %v1573_v49 = vmax.f32 %v1324_v45, 0.0  ;;  %v5118_v45 = vpop.permute.xlu0 %1221 }
 0x2e7   :  { %v1574_v48 = vmax.f32 %v1326_v47, 0.0  ;;  %v1329_v6 = vpop.f32.mrb[80].mxu0 }
 0x2e8   :  { %v1330_v51 = vadd.f32 %v1329_v6, %v5086_v8  ;;  %v1331_v52 = vpop.f32.mrb[81].mxu0 }
 0x2e9   :  { %v1332_v55 = vadd.f32 %v1331_v52, %v5086_v8  ;;  %1768 = vmatprep.mubr.f32.mxu0 %v1574_v48  ;;  %v5122_v52 = vpop.permute.xlu1 %1226 }
 0x2ea   :  { %1769 = vmatmul.mubr.f32.gmra.mrb[110].mxu0 %v1573_v49  ;;  %v1577_v37 = vmax.f32 %v1330_v51, 0.0 }
 0x2eb   :  { %v1578_v23 = vmax.f32 %v1332_v55, 0.0  ;;  %v1335_v57 = vpop.f32.mrb[82].mxu0 }
 0x2ec   :  { %v1336_v58 = vadd.f32 %v1335_v57, %v5090_v56  ;;  %v1337_v60 = vpop.f32.mrb[83].mxu0 }
 0x2ed   :  { %v1338_v61 = vadd.f32 %v1337_v60, %v5090_v56  ;;  %1773 = vmatprep.mubr.f32.mxu0 %v1578_v23 }
 0x2ee   :  { %1774 = vmatmul.mubr.f32.gmra.mrb[112].mxu0 %v1577_v37  ;;  %v1581_v5 = vmax.f32 %v1336_v58, 0.0 }
 0x2ef   :  { %v1582_v3 = vmax.f32 %v1338_v61, 0.0  ;;  %v1341_v26 = vpop.f32.mrb[84].mxu0  ;;  %v5126_v61 = vpop.permute.xlu0 %1231 }
 0x2f0   :  { %v1342_v7 = vadd.f32 %v1341_v26, %v5094_v1  ;;  %v1343_v9 = vpop.f32.mrb[85].mxu0 }
 0x2f1   :  { %v1344_v10 = vadd.f32 %v1343_v9, %v5094_v1  ;;  %1778 = vmatprep.mubr.f32.mxu0 %v1582_v3 }
 0x2f2   :  { %1779 = vmatmul.mubr.f32.gmra.mrb[114].mxu0 %v1581_v5  ;;  %v1585_v41 = vmax.f32 %v1342_v7, 0.0 }
 0x2f3   :  { %v1586_v12 = vmax.f32 %v1344_v10, 0.0  ;;  %v1347_v14 = vpop.f32.mrb[86].mxu0 }
 0x2f4   :  { %v1348_v16 = vadd.f32 %v1347_v14, %v5098_v11  ;;  %v1349_v50 = vpop.f32.mrb[87].mxu0 }
 0x2f5   :  { %v1350_v17 = vadd.f32 %v1349_v50, %v5098_v11  ;;  %1783 = vmatprep.mubr.f32.mxu0 %v1586_v12  ;;  %v5130_v12 = vpop.permute.xlu1 %1236 }
 0x2f6   :  { %1784 = vmatmul.mubr.f32.gmra.mrb[116].mxu0 %v1585_v41  ;;  %v1589_v21 = vmax.f32 %v1348_v16, 0.0 }
 0x2f7   :  { %v1590_v24 = vmax.f32 %v1350_v17, 0.0  ;;  %v1353_v25 = vpop.f32.mrb[88].mxu0 }
 0x2f8   :  { %v1354_v44 = vadd.f32 %v1353_v25, %v5102_v20  ;;  %v1355_v28 = vpop.f32.mrb[89].mxu0 }
 0x2f9   :  { %v1356_v53 = vadd.f32 %v1355_v28, %v5102_v20  ;;  %1788 = vmatprep.mubr.f32.mxu0 %v1590_v24 }
 0x2fa   :  { %1789 = vmatmul.mubr.f32.gmra.mrb[118].mxu0 %v1589_v21  ;;  %v1593_v35 = vmax.f32 %v1354_v44, 0.0 }
 0x2fb   :  { %v1594_v31 = vmax.f32 %v1356_v53, 0.0  ;;  %v1359_v32 = vpop.f32.mrb[90].mxu0 }
 0x2fc   :  { %v1360_v36 = vadd.f32 %v1359_v32, %v5106_v29  ;;  %v1361_v38 = vpop.f32.mrb[91].mxu0 }
 0x2fd   :  { %v1362_v59 = vadd.f32 %v1361_v38, %v5106_v29  ;;  %1793 = vmatprep.mubr.f32.mxu0 %v1594_v31 }
 0x2fe   :  { %1794 = vmatmul.mubr.f32.gmra.mrb[120].mxu0 %v1593_v35  ;;  %v1597_v19 = vmax.f32 %v1360_v36, 0.0 }
 0x2ff   :  { %v1598_v39 = vmax.f32 %v1362_v59, 0.0  ;;  %v1365_v15 = vpop.f32.mrb[92].mxu0 }
 0x300   :  { %v1366_v22 = vadd.f32 %v1365_v15, %v5110_v63  ;;  %v1367_v42 = vpop.f32.mrb[93].mxu0 }
 0x301   :  { %v1368_v43 = vadd.f32 %v1367_v42, %v5110_v63  ;;  %1798 = vmatprep.mubr.f32.mxu0 %v1598_v39 }
 0x302   :  { %1799 = vmatmul.mubr.f32.gmra.mrb[122].mxu0 %v1597_v19  ;;  %v1601_v34 = vmax.f32 %v1366_v22, 0.0 }
 0x303   :  { %v1602_v18 = vmax.f32 %v1368_v43, 0.0  ;;  %v1371_v30 = vpop.f32.mrb[94].mxu0 }
 0x304   :  { %v1372_v13 = vadd.f32 %v1371_v30, %v5114_v54  ;;  %v1373_v27 = vpop.f32.mrb[95].mxu0 }
 0x305   :  { %v1374_v33 = vadd.f32 %v1373_v27, %v5114_v54  ;;  %1803 = vmatprep.mubr.f32.mxu0 %v1602_v18 }
 0x306   :  { %1804 = vmatmul.mubr.f32.gmra.mrb[124].mxu0 %v1601_v34  ;;  %v1605_v48 = vmax.f32 %v1372_v13, 0.0 }
 0x307   :  { %v1606_v46 = vmax.f32 %v1374_v33, 0.0  ;;  %v1377_v47 = vpop.f32.mrb[96].mxu0 }
 0x308   :  { %v1378_v6 = vadd.f32 %v1377_v47, %v5118_v45  ;;  %v1379_v49 = vpop.f32.mrb[97].mxu0 }
 0x309   :  { %v1380_v51 = vadd.f32 %v1379_v49, %v5118_v45  ;;  %1808 = vmatprep.mubr.f32.mxu0 %v1606_v46 }
 0x30a   :  { %1809 = vmatmul.mubr.f32.gmra.mrb[126].mxu0 %v1605_v48  ;;  %v1609_v57 = vmax.f32 %v1378_v6, 0.0 }
 0x30b   :  { %v1610_v55 = vmax.f32 %v1380_v51, 0.0  ;;  %v1383_v23 = vpop.f32.mrb[98].mxu0 }
 0x30c   :  { %v1384_v37 = vadd.f32 %v1383_v23, %v5122_v52  ;;  %v1385_v58 = vpop.f32.mrb[99].mxu0 }
 0x30d   :  { %v1386_v60 = vadd.f32 %v1385_v58, %v5122_v52  ;;  %1813 = vmatprep.mubr.f32.mxu0 %v1610_v55 }
 0x30e   :  { %1814 = vmatmul.mubr.f32.gmra.mrb[128].mxu0 %v1609_v57  ;;  %v1613_v5 = vmax.f32 %v1384_v37, 0.0 }
 0x30f   :  { %v1614_v3 = vmax.f32 %v1386_v60, 0.0  ;;  %v1389_v26 = vpop.f32.mrb[100].mxu0 }
 0x310   :  { %v1390_v7 = vadd.f32 %v1389_v26, %v5126_v61  ;;  %v1391_v9 = vpop.f32.mrb[101].mxu0 }
 0x311   :  { %v1392_v10 = vadd.f32 %v1391_v9, %v5126_v61  ;;  %1818 = vmatprep.mubr.f32.mxu0 %v1614_v3 }
 0x312   :  { %1819 = vmatmul.mubr.f32.gmra.mrb[130].mxu0 %v1613_v5  ;;  %v1617_v16 = vmax.f32 %v1390_v7, 0.0 }
 0x313   :  { %v1618_v14 = vmax.f32 %v1392_v10, 0.0  ;;  %v1395_v41 = vpop.f32.mrb[102].mxu0 }
 0x314   :  { %v1396_v50 = vadd.f32 %v1395_v41, %v5130_v12  ;;  %v1397_v17 = vpop.f32.mrb[103].mxu0 }
 0x315   :  { %v1398_v24 = vadd.f32 %v1397_v17, %v5130_v12  ;;  %1823 = vmatprep.mubr.f32.mxu0 %v1618_v14 }
 0x316   :  { %1824 = vmatmul.mubr.f32.gmra.mrb[132].mxu0 %v1617_v16  ;;  %v1621_v21 = vmax.f32 %v1396_v50, 0.0 }
 0x317   :  { %v1622_v25 = vmax.f32 %v1398_v24, 0.0 }
 0x319   :  { %1828 = vmatprep.mubr.f32.mxu0 %v1622_v25 }
 0x31a   :  { %1829 = vmatmul.mubr.f32.gmra.mrb[134].mxu0 %v1621_v21 }
 0x31f   :  { %v1466_v44 = vpop.f32.mrb[64].mxu1 }
 0x320   :  { %v1467_v28 = vadd.f32 %v1466_v44, %v5070_v62  ;;  %v1468_v53 = vpop.f32.mrb[65].mxu1 }
 0x321   :  { %v1469_v31 = vadd.f32 %v1468_v53, %v5070_v62 }
 0x322   :  { %v1563_v36 = vmax.f32 %v1467_v28, 0.0 }
 0x323   :  { %v1564_v32 = vmax.f32 %v1469_v31, 0.0  ;;  %v1472_v35 = vpop.f32.mrb[66].mxu1 }
 0x324   :  { %v1473_v38 = vadd.f32 %v1472_v35, %v5074_v4  ;;  %v1474_v59 = vpop.f32.mrb[67].mxu1 }
 0x325   :  { %v1475_v39 = vadd.f32 %v1474_v59, %v5074_v4  ;;  %1898 = vmatprep.mubr.f32.mxu1 %v1564_v32 }
 0x326   :  { %1899 = vmatmul.mubr.f32.vlgmr.msra.gmra.mrb[96].mxu1 %v1563_v36  ;;  %v1567_v22 = vmax.f32 %v1473_v38, 0.0 }
 0x327   :  { %v1568_v15 = vmax.f32 %v1475_v39, 0.0  ;;  %v1478_v19 = vpop.f32.mrb[68].mxu1 }
 0x328   :  { %v1479_v42 = vadd.f32 %v1478_v19, %v5078_v40  ;;  %v1480_v43 = vpop.f32.mrb[69].mxu1 }
 0x329   :  { %v1481_v18 = vadd.f32 %v1480_v43, %v5078_v40  ;;  %1903 = vmatprep.mubr.f32.mxu1 %v1568_v15 }
 0x32a   :  { %1904 = vmatmul.mubr.f32.gmra.mrb[98].mxu1 %v1567_v22  ;;  %v1571_v34 = vmax.f32 %v1479_v42, 0.0 }
 0x32b   :  { %v1572_v62 = vmax.f32 %v1481_v18, 0.0  ;;  %v1484_v30 = vpop.f32.mrb[70].mxu1 }
 0x32c   :  { %v1485_v13 = vadd.f32 %v1484_v30, %v5082_v0  ;;  %v1486_v27 = vpop.f32.mrb[71].mxu1 }
 0x32d   :  { %v1487_v4 = vadd.f32 %v1486_v27, %v5082_v0  ;;  %1908 = vmatprep.mubr.f32.mxu1 %v1572_v62 }
 0x32e   :  { %1909 = vmatmul.mubr.f32.gmra.mrb[100].mxu1 %v1571_v34  ;;  %v1575_v47 = vmax.f32 %v1485_v13, 0.0 }
 0x32f   :  { %v1576_v33 = vmax.f32 %v1487_v4, 0.0  ;;  %v1490_v46 = vpop.f32.mrb[72].mxu1 }
 0x330   :  { %v1491_v48 = vadd.f32 %v1490_v46, %v5086_v8  ;;  %v1492_v6 = vpop.f32.mrb[73].mxu1 }
 0x331   :  { %v1493_v40 = vadd.f32 %v1492_v6, %v5086_v8  ;;  %1913 = vmatprep.mubr.f32.mxu1 %v1576_v33 }
 0x332   :  { %1914 = vmatmul.mubr.f32.gmra.mrb[102].mxu1 %v1575_v47  ;;  %v1579_v55 = vmax.f32 %v1491_v48, 0.0 }
 0x333   :  { %v1580_v49 = vmax.f32 %v1493_v40, 0.0  ;;  %v1496_v51 = vpop.f32.mrb[74].mxu1 }
 0x334   :  { %v1497_v23 = vadd.f32 %v1496_v51, %v5090_v56  ;;  %v1498_v57 = vpop.f32.mrb[75].mxu1 }
 0x335   :  { %v1499_v0 = vadd.f32 %v1498_v57, %v5090_v56  ;;  %1918 = vmatprep.mubr.f32.mxu1 %v1580_v49 }
 0x336   :  { %1919 = vmatmul.mubr.f32.gmra.mrb[104].mxu1 %v1579_v55  ;;  %v1583_v60 = vmax.f32 %v1497_v23, 0.0 }
 0x337   :  { %v1584_v37 = vmax.f32 %v1499_v0, 0.0  ;;  %v1502_v58 = vpop.f32.mrb[76].mxu1 }
 0x338   :  { %v1503_v3 = vadd.f32 %v1502_v58, %v5094_v1  ;;  %v1504_v26 = vpop.f32.mrb[77].mxu1 }
 0x339   :  { %v1505_v8 = vadd.f32 %v1504_v26, %v5094_v1  ;;  %1923 = vmatprep.mubr.f32.mxu1 %v1584_v37 }
 0x33a   :  { %1924 = vmatmul.mubr.f32.gmra.mrb[106].mxu1 %v1583_v60  ;;  %v1587_v9 = vmax.f32 %v1503_v3, 0.0 }
 0x33b   :  { %v1588_v5 = vmax.f32 %v1505_v8, 0.0  ;;  %v1508_v7 = vpop.f32.mrb[78].mxu1 }
 0x33c   :  { %v1509_v10 = vadd.f32 %v1508_v7, %v5098_v11  ;;  %v1510_v14 = vpop.f32.mrb[79].mxu1 }
 0x33d   :  { %v1511_v56 = vadd.f32 %v1510_v14, %v5098_v11  ;;  %1928 = vmatprep.mubr.f32.mxu1 %v1588_v5 }
 0x33e   :  { %1929 = vmatmul.mubr.f32.gmra.mrb[108].mxu1 %v1587_v9  ;;  %v1591_v50 = vmax.f32 %v1509_v10, 0.0 }
 0x33f   :  { %v1592_v41 = vmax.f32 %v1511_v56, 0.0  ;;  %v1514_v16 = vpop.f32.mrb[80].mxu1 }
 0x340   :  { %v1515_v17 = vadd.f32 %v1514_v16, %v5102_v20  ;;  %v1516_v24 = vpop.f32.mrb[81].mxu1 }
 0x341   :  { %v1517_v1 = vadd.f32 %v1516_v24, %v5102_v20  ;;  %1933 = vmatprep.mubr.f32.mxu1 %v1592_v41 }
 0x342   :  { %1934 = vmatmul.mubr.f32.gmra.mrb[110].mxu1 %v1591_v50  ;;  %v1595_v44 = vmax.f32 %v1515_v17, 0.0 }
 0x343   :  { %v1596_v25 = vmax.f32 %v1517_v1, 0.0  ;;  %v1520_v21 = vpop.f32.mrb[82].mxu1 }
 0x344   :  { %v1521_v28 = vadd.f32 %v1520_v21, %v5106_v29  ;;  %v1522_v53 = vpop.f32.mrb[83].mxu1 }
 0x345   :  { %v1523_v11 = vadd.f32 %v1522_v53, %v5106_v29  ;;  %1938 = vmatprep.mubr.f32.mxu1 %v1596_v25 }
 0x346   :  { %1939 = vmatmul.mubr.f32.gmra.mrb[112].mxu1 %v1595_v44  ;;  %v1599_v35 = vmax.f32 %v1521_v28, 0.0 }
 0x347   :  { %v1600_v31 = vmax.f32 %v1523_v11, 0.0  ;;  %v1526_v32 = vpop.f32.mrb[84].mxu1 }
 0x348   :  { %v1527_v36 = vadd.f32 %v1526_v32, %v5110_v63  ;;  %v1528_v38 = vpop.f32.mrb[85].mxu1 }
 0x349   :  { %v1529_v20 = vadd.f32 %v1528_v38, %v5110_v63  ;;  %1943 = vmatprep.mubr.f32.mxu1 %v1600_v31 }
 0x34a   :  { %1944 = vmatmul.mubr.f32.gmra.mrb[114].mxu1 %v1599_v35  ;;  %v1603_v15 = vmax.f32 %v1527_v36, 0.0 }
 0x34b   :  { %v1604_v59 = vmax.f32 %v1529_v20, 0.0  ;;  %v1532_v39 = vpop.f32.mrb[86].mxu1 }
 0x34c   :  { %v1533_v19 = vadd.f32 %v1532_v39, %v5114_v54  ;;  %v1534_v22 = vpop.f32.mrb[87].mxu1 }
 0x34d   :  { %v1535_v29 = vadd.f32 %v1534_v22, %v5114_v54  ;;  %1948 = vmatprep.mubr.f32.mxu1 %v1604_v59 }
 0x34e   :  { %1949 = vmatmul.mubr.f32.gmra.mrb[116].mxu1 %v1603_v15  ;;  %v1607_v18 = vmax.f32 %v1533_v19, 0.0 }
 0x34f   :  { %v1608_v42 = vmax.f32 %v1535_v29, 0.0  ;;  %v1538_v43 = vpop.f32.mrb[88].mxu1 }
 0x350   :  { %v1539_v62 = vadd.f32 %v1538_v43, %v5118_v45  ;;  %v1540_v30 = vpop.f32.mrb[89].mxu1 }
 0x351   :  { %v1541_v63 = vadd.f32 %v1540_v30, %v5118_v45  ;;  %1953 = vmatprep.mubr.f32.mxu1 %v1608_v42 }
 0x352   :  { %1954 = vmatmul.mubr.f32.gmra.mrb[118].mxu1 %v1607_v18  ;;  %v1611_v27 = vmax.f32 %v1539_v62, 0.0 }
 0x353   :  { %v1612_v34 = vmax.f32 %v1541_v63, 0.0  ;;  %v1544_v13 = vpop.f32.mrb[90].mxu1 }
 0x354   :  { %v1545_v4 = vadd.f32 %v1544_v13, %v5122_v52  ;;  %v1546_v33 = vpop.f32.mrb[91].mxu1 }
 0x355   :  { %v1547_v54 = vadd.f32 %v1546_v33, %v5122_v52  ;;  %1958 = vmatprep.mubr.f32.mxu1 %v1612_v34 }
 0x356   :  { %1959 = vmatmul.mubr.f32.gmra.mrb[120].mxu1 %v1611_v27  ;;  %v1615_v48 = vmax.f32 %v1545_v4, 0.0 }
 0x357   :  { %v1616_v46 = vmax.f32 %v1547_v54, 0.0  ;;  %v1550_v47 = vpop.f32.mrb[92].mxu1 }
 0x358   :  { %v1551_v6 = vadd.f32 %v1550_v47, %v5126_v61  ;;  %v1552_v40 = vpop.f32.mrb[93].mxu1 }
 0x359   :  { %v1553_v45 = vadd.f32 %v1552_v40, %v5126_v61  ;;  %1963 = vmatprep.mubr.f32.mxu1 %v1616_v46 }
 0x35a   :  { %1964 = vmatmul.mubr.f32.gmra.mrb[122].mxu1 %v1615_v48  ;;  %v1619_v55 = vmax.f32 %v1551_v6, 0.0 }
 0x35b   :  { %v1620_v49 = vmax.f32 %v1553_v45, 0.0  ;;  %v1556_v51 = vpop.f32.mrb[94].mxu1 }
 0x35c   :  { %v1557_v23 = vadd.f32 %v1556_v51, %v5130_v12  ;;  %v1558_v57 = vpop.f32.mrb[95].mxu1 }
 0x35d   :  { %v1559_v52 = vadd.f32 %v1558_v57, %v5130_v12  ;;  %1968 = vmatprep.mubr.f32.mxu1 %v1620_v49  ;;  %v1979_v12 = vld [vmem:[%s5456_s2 + $0x80] sm:$0xff] }
 0x35e   :  { %1969 = vmatmul.mubr.f32.gmra.mrb[124].mxu1 %v1619_v55  ;;  %v1623_v37 = vmax.f32 %v1557_v23, 0.0  ;;  %3624 = vmatprep.mubr.f32.mxu0 %v1979_v12 }
 0x35f   :  { %v1624_v0 = vmax.f32 %v1559_v52, 0.0 }
 0x361   :  { %1973 = vmatprep.mubr.f32.mxu1 %v1624_v0 }
 0x362   :  { %1974 = vmatmul.mubr.f32.gmra.mrb[126].mxu1 %v1623_v37 }
 0x3b1   :  { %v3424_v58 = vpop.f32.mrb[104].mxu0 }
 0x3b2   :  { %v3425_v60 = vpop.f32.mrb[105].mxu0 }
 0x3b3   :  { %v3426_v3 = vadd.f32 %v3425_v60, %v3424_v58 }
 0x3b5   :  { %v3427_v61 = vpop.f32.mrb[106].mxu0 }
 0x3b6   :  { %v3428_v26 = vpop.f32.mrb[107].mxu0 }
 0x3b7   :  { %v3429_v8 = vadd.f32 %v3428_v26, %v3427_v61 }
 0x3b9   :  { %v3430_v5 = vpop.f32.mrb[108].mxu0 }
 0x3ba   :  { %v3431_v7 = vpop.f32.mrb[109].mxu0 }
 0x3bb   :  { %v3432_v9 = vadd.f32 %v3431_v7, %v3430_v5 }
 0x3bd   :  { %v3433_v10 = vpop.f32.mrb[110].mxu0 }
 0x3be   :  { %v3434_v14 = vpop.f32.mrb[111].mxu0 }
 0x3bf   :  { %v3435_v56 = vadd.f32 %v3434_v14, %v3433_v10 }
 0x3c1   :  { %v3436_v41 = vpop.f32.mrb[112].mxu0 }
 0x3c2   :  { %v3437_v16 = vpop.f32.mrb[113].mxu0 }
 0x3c3   :  { %v3438_v50 = vadd.f32 %v3437_v16, %v3436_v41 }
 0x3c5   :  { %v3439_v17 = vpop.f32.mrb[114].mxu0 }
 0x3c6   :  { %v3440_v24 = vpop.f32.mrb[115].mxu0 }
 0x3c7   :  { %v3441_v1 = vadd.f32 %v3440_v24, %v3439_v17 }
 0x3c9   :  { %v3442_v25 = vpop.f32.mrb[116].mxu0 }
 0x3ca   :  { %v3443_v21 = vpop.f32.mrb[117].mxu0 }
 0x3cb   :  { %v3444_v44 = vadd.f32 %v3443_v21, %v3442_v25 }
 0x3cd   :  { %v3445_v28 = vpop.f32.mrb[118].mxu0 }
 0x3ce   :  { %v3446_v53 = vpop.f32.mrb[119].mxu0 }
 0x3cf   :  { %v5169_v11 = vadd.f32 %v3446_v53, %v3445_v28 }
 0x3d1   :  { %v3448_v31 = vpop.f32.mrb[120].mxu0 }
 0x3d2   :  { %v3449_v32 = vpop.f32.mrb[121].mxu0 }
 0x3d3   :  { %v5171_v35 = vadd.f32 %v3449_v32, %v3448_v31 }
 0x3d5   :  { %v3451_v36 = vpop.f32.mrb[122].mxu0 }
 0x3d6   :  { %v3452_v38 = vpop.f32.mrb[123].mxu0 }
 0x3d7   :  { %v5173_v20 = vadd.f32 %v3452_v38, %v3451_v36 }
 0x3d9   :  { %v3454_v59 = vpop.f32.mrb[124].mxu0 }
 0x3da   :  { %v3455_v39 = vpop.f32.mrb[125].mxu0 }
 0x3db   :  { %v5175_v15 = vadd.f32 %v3455_v39, %v3454_v59 }
 0x3dd   :  { %v3457_v19 = vpop.f32.mrb[126].mxu0 }
 0x3de   :  { %v3458_v22 = vpop.f32.mrb[127].mxu0 }
 0x3df   :  { %v5177_v29 = vadd.f32 %v3458_v22, %v3457_v19 }
 0x3e1   :  { %v3460_v42 = vpop.f32.mrb[128].mxu0 }
 0x3e2   :  { %v3461_v43 = vpop.f32.mrb[129].mxu0 }
 0x3e3   :  { %v5179_v18 = vadd.f32 %v3461_v43, %v3460_v42 }
 0x3e5   :  { %v3463_v62 = vpop.f32.mrb[130].mxu0 }
 0x3e6   :  { %v3464_v30 = vpop.f32.mrb[131].mxu0 }
 0x3e7   :  { %v5181_v63 = vadd.f32 %v3464_v30, %v3463_v62 }
 0x3e9   :  { %v3466_v34 = vpop.f32.mrb[132].mxu0 }
 0x3ea   :  { %v3467_v13 = vpop.f32.mrb[133].mxu0 }
 0x3eb   :  { %v5183_v27 = vadd.f32 %v3467_v13, %v3466_v34 }
 0x3ed   :  { %v3469_v4 = vpop.f32.mrb[134].mxu0 }
 0x3ee   :  { %v3470_v33 = vpop.f32.mrb[135].mxu0 }
 0x3ef   :  { %v5185_v54 = vadd.f32 %v3470_v33, %v3469_v4 }
 0x3f9   :  { %v3504_v46 = vpop.f32.mrb[96].mxu1 }
 0x3fa   :  { %v3505_v47 = vpop.f32.mrb[97].mxu1 }
 0x3fb   :  { %v3506_v48 = vadd.f32 %v3505_v47, %v3504_v46 }
 0x3fd   :  { %v1901_v6 = vadd.f32 %v3506_v48, %v3426_v3  ;;  %v3507_v40 = vpop.f32.mrb[98].mxu1 }
 0x3fe   :  { %v3508_v45 = vpop.f32.mrb[99].mxu1 }
 0x3ff   :  { %v3509_v49 = vadd.f32 %v3508_v45, %v3507_v40 }
 0x401   :  { %v1906_v51 = vadd.f32 %v3509_v49, %v3429_v8  ;;  %v3510_v55 = vpop.f32.mrb[100].mxu1 }
 0x402   :  { %v3511_v23 = vpop.f32.mrb[101].mxu1 }
 0x403   :  { %v3512_v57 = vadd.f32 %v3511_v23, %v3510_v55  ;;  %v3798_v52 = vpack.c.bf16 %v1906_v51, %v1901_v6 }
 0x405   :  { %v1911_v0 = vadd.f32 %v3512_v57, %v3432_v9  ;;  %v3513_v37 = vpop.f32.mrb[102].mxu1  ;;  %3799 = vmatprep.subr.bf16.mxu0 %v3798_v52 }
 0x406   :  { %v3514_v58 = vpop.f32.mrb[103].mxu1  ;;  %3801 = vmatpush3.bf16.msra.mxu0 %v3798_v52 }
 0x407   :  { %v3515_v60 = vadd.f32 %v3514_v58, %v3513_v37  ;;  %v2307_v37 = vld [vmem:[%s5461_s7 + $0x8] sm:$0xff] }
 0x408   :  { %v2311_v58 = vld [vmem:[%s5461_s7 + $0x28] sm:$0xff] }
 0x409   :  { %v1916_v61 = vadd.f32 %v3515_v60, %v3435_v56  ;;  %v3516_v26 = vpop.f32.mrb[104].mxu1  ;;  %v3838_v60 = vpack.c.bf16 %v2311_v58, %v2307_v37 }
 0x40a   :  { %v3517_v5 = vpop.f32.mrb[105].mxu1 }
 0x40b   :  { %v3518_v7 = vadd.f32 %v3517_v5, %v3516_v26  ;;  %v3802_v10 = vpack.c.bf16 %v1916_v61, %v1911_v0  ;;  %v1981_v0 = vld [vmem:[%s5456_s2 + $0x90] sm:$0xff]  ;;  %v2306_v61 = vld [vmem:[%s5461_s7] sm:$0xff] }
 0x40c   :  { %v2310_v26 = vld [vmem:[%s5461_s7 + $0x20] sm:$0xff] }
 0x40d   :  { %v1921_v3 = vadd.f32 %v3518_v7, %v3438_v50  ;;  %v3519_v14 = vpop.f32.mrb[106].mxu1  ;;  %3803 = vmatprep.subr.bf16.mxu0 %v3802_v10  ;;  %v3840_v5 = vpack.c.bf16 %v2310_v26, %v2306_v61  ;;  %v2315_v7 = vld [vmem:[%s5461_s7 + $0x48] sm:$0xff] }
 0x40e   :  { %v3520_v12 = vpop.f32.mrb[107].mxu1  ;;  %3805 = vmatpush3.bf16.msra.mxu0 %v3802_v10  ;;  %v2319_v10 = vld [vmem:[%s5461_s7 + $0x68] sm:$0xff] }
 0x40f   :  { %v3521_v8 = vadd.f32 %v3520_v12, %v3519_v14  ;;  %v2314_v14 = vld [vmem:[%s5461_s7 + $0x40] sm:$0xff] }
 0x410   :  { %v2318_v12 = vld [vmem:[%s5461_s7 + $0x60] sm:$0xff] }
 0x411   :  { %v1926_v41 = vadd.f32 %v3521_v8, %v3441_v1  ;;  %v3522_v16 = vpop.f32.mrb[108].mxu1  ;;  %v3844_v8 = vpack.c.bf16 %v2318_v12, %v2314_v14 }
 0x412   :  { %v3523_v17 = vpop.f32.mrb[109].mxu1 }
 0x413   :  { %v3524_v9 = vadd.f32 %v3523_v17, %v3522_v16  ;;  %v3806_v24 = vpack.c.bf16 %v1926_v41, %v1921_v3  ;;  %v3842_v3 = vpack.c.bf16 %v2319_v10, %v2315_v7  ;;  %v1995_v41 = vpop.permute.xlu1 %1994  ;;  %v1990_v16 = vpop.permute.xlu0 %1989 }
 0x415   :  { %v1931_v25 = vadd.f32 %v3524_v9, %v3444_v44  ;;  %v3525_v21 = vpop.f32.mrb[110].mxu1  ;;  %3807 = vmatprep.subr.bf16.mxu0 %v3806_v24 }
 0x416   :  { %v3526_v28 = vpop.f32.mrb[111].mxu1  ;;  %3809 = vmatpush3.bf16.msra.mxu0 %v3806_v24 }
 0x417   :  { %v3527_v56 = vadd.f32 %v3526_v28, %v3525_v21  ;;  %v2005_v28 = vpop.permute.xlu1 %2004 }
 0x419   :  { %v1936_v53 = vadd.f32 %v3527_v56, %v5169_v11  ;;  %v3528_v31 = vpop.f32.mrb[112].mxu1 }
 0x41a   :  { %v3529_v50 = vpop.f32.mrb[113].mxu1 }
 0x41b   :  { %v3530_v32 = vadd.f32 %v3529_v50, %v3528_v31  ;;  %v3810_v36 = vpack.c.bf16 %v1936_v53, %v1931_v25  ;;  %v2000_v31 = vpop.permute.xlu0 %1999 }
 0x41d   :  { %v1941_v38 = vadd.f32 %v3530_v32, %v5171_v35  ;;  %v3531_v59 = vpop.f32.mrb[114].mxu1  ;;  %3811 = vmatprep.subr.bf16.mxu0 %v3810_v36 }
 0x41e   :  { %v3532_v1 = vpop.f32.mrb[115].mxu1  ;;  %3813 = vmatpush3.bf16.msra.mxu0 %v3810_v36 }
 0x41f   :  { %v3533_v39 = vadd.f32 %v3532_v1, %v3531_v59  ;;  %v2309_v1 = vld [vmem:[%s5461_s7 + $0x18] sm:$0xff] }
 0x421   :  { %v1946_v44 = vadd.f32 %v3533_v39, %v5173_v20  ;;  %v3534_v19 = vpop.f32.mrb[116].mxu1  ;;  %v2313_v39 = vld [vmem:[%s5461_s7 + $0x38] sm:$0xff] }
 0x422   :  { %v3535_v22 = vpop.f32.mrb[117].mxu1 }
 0x423   :  { %v3536_v42 = vadd.f32 %v3535_v22, %v3534_v19  ;;  %v3814_v43 = vpack.c.bf16 %v1946_v44, %v1941_v38  ;;  %v3846_v22 = vpack.c.bf16 %v2313_v39, %v2309_v1 }
 0x425   :  { %v1951_v62 = vadd.f32 %v3536_v42, %v5175_v15  ;;  %v3537_v11 = vpop.f32.mrb[118].mxu1  ;;  %3815 = vmatprep.subr.bf16.mxu0 %v3814_v43  ;;  %v2308_v42 = vld [vmem:[%s5461_s7 + $0x10] sm:$0xff] }
 0x426   :  { %v3538_v30 = vpop.f32.mrb[119].mxu1  ;;  %3817 = vmatpush3.bf16.msra.mxu0 %v3814_v43  ;;  %v2312_v43 = vld [vmem:[%s5461_s7 + $0x30] sm:$0xff] }
 0x427   :  { %v3539_v34 = vadd.f32 %v3538_v30, %v3537_v11  ;;  %v2321_v11 = vld [vmem:[%s5461_s7 + $0x78] sm:$0xff]  ;;  %v2097_v30 = vld [vmem:[%s5458_s4 + $0x8] sm:$0xff] }
 0x429   :  { %v1956_v35 = vadd.f32 %v3539_v34, %v5177_v29  ;;  %v3540_v13 = vpop.f32.mrb[120].mxu1  ;;  %v3848_v34 = vpack.c.bf16 %v2312_v43, %v2308_v42 }
 0x42a   :  { %v3541_v4 = vpop.f32.mrb[121].mxu1 }
 0x42b   :  { %v3542_v33 = vadd.f32 %v3541_v4, %v3540_v13  ;;  %v3818_v46 = vpack.c.bf16 %v1956_v35, %v1951_v62  ;;  %v2317_v62 = vld [vmem:[%s5461_s7 + $0x58] sm:$0xff]  ;;  %v2098_v35 = vld [vmem:[%s5458_s4 + $0x10] sm:$0xff] }
 0x42c   :  { %v3850_v13 = vpack.c.bf16 %v2321_v11, %v2317_v62  ;;  %v2316_v4 = vld [vmem:[%s5461_s7 + $0x50] sm:$0xff] }
 0x42d   :  { %v1961_v47 = vadd.f32 %v3542_v33, %v5179_v18  ;;  %v3543_v20 = vpop.f32.mrb[122].mxu1  ;;  %3819 = vmatprep.subr.bf16.mxu0 %v3818_v46  ;;  %v2320_v33 = vld [vmem:[%s5461_s7 + $0x70] sm:$0xff] }
 0x42e   :  { %v3544_v48 = vpop.f32.mrb[123].mxu1  ;;  %3821 = vmatpush3.bf16.msra.mxu0 %v3818_v46  ;;  %v2099_v46 = vld [vmem:[%s5458_s4 + $0x18] sm:$0xff] }
 0x42f   :  { %v3545_v6 = vadd.f32 %v3544_v48, %v3543_v20  ;;  %v2100_v20 = vld [vmem:[%s5458_s4 + $0x20] sm:$0xff]  ;;  %v2101_v48 = vld [vmem:[%s5458_s4 + $0x28] sm:$0xff] }
 0x431   :  { %v1966_v15 = vadd.f32 %v3545_v6, %v5181_v63  ;;  %v3546_v40 = vpop.f32.mrb[124].mxu1  ;;  %v1980_v63 = vld [vmem:[%s5456_s2 + $0x88] sm:$0xff]  ;;  %v2102_v6 = vld [vmem:[%s5458_s4 + $0x30] sm:$0xff] }
 0x432   :  { %v3547_v45 = vpop.f32.mrb[125].mxu1 }
 0x433   :  { %v3548_v49 = vadd.f32 %v3547_v45, %v3546_v40  ;;  %v3822_v51 = vpack.c.bf16 %v1966_v15, %v1961_v47  ;;  %v3852_v47 = vpack.c.bf16 %v2320_v33, %v2316_v4  ;;  %v2103_v15 = vld [vmem:[%s5458_s4 + $0x38] sm:$0xff]  ;;  %v2104_v40 = vld [vmem:[%s5458_s4 + $0x40] sm:$0xff]  ;;  %v2105_v45 = vld [vmem:[%s5458_s4 + $0x48] sm:$0xff] }
 0x435   :  { %v1971_v55 = vadd.f32 %v3548_v49, %v5183_v27  ;;  %v3549_v29 = vpop.f32.mrb[126].mxu1  ;;  %3823 = vmatprep.subr.bf16.mxu0 %v3822_v51  ;;  %v1982_v27 = vld [vmem:[%s5456_s2 + $0x98] sm:$0xff]  ;;  %v2106_v49 = vld [vmem:[%s5458_s4 + $0x50] sm:$0xff] }
 0x436   :  { %v3550_v23 = vpop.f32.mrb[127].mxu1  ;;  %3825 = vmatpush3.bf16.msra.mxu0 %v3822_v51  ;;  %v2107_v51 = vld [vmem:[%s5458_s4 + $0x58] sm:$0xff] }
 0x437   :  { %v3551_v57 = vadd.f32 %v3550_v23, %v3549_v29  ;;  %v2109_v29 = vld [vmem:[%s5458_s4 + $0x68] sm:$0xff]  ;;  %v2110_v23 = vld [vmem:[%s5458_s4 + $0x70] sm:$0xff] }
 0x439   :  { %v1976_v18 = vadd.f32 %v3551_v57, %v5185_v54  ;;  %v2096_v54 = vld [vmem:[%s5458_s4] sm:$0xff]  ;;  %v2111_v57 = vld [vmem:[%s5458_s4 + $0x78] sm:$0xff] }
 0x43a   :  { %3638 = vmatprep.mubr.msk.f32.mxu1 %vm2112_vm3, %v2096_v54 }
 0x43b   :  { %v3826_v52 = vpack.c.bf16 %v1976_v18, %v1971_v55  ;;  %v2108_v55 = vld [vmem:[%s5458_s4 + $0x60] sm:$0xff] }
 0x43d   :  { %3827 = vmatprep.subr.bf16.mxu0 %v3826_v52 }
 0x43e   :  { %3829 = vmatpush3.bf16.msra.mxu0 %v3826_v52 }
 0x43f   :  { %3839 = vmatprep.subr.bf16.mxu0 %v3838_v60 }
 0x441   :  { %3625 = vmatmul.mubr.f32.vlgmr.msra.gmra.mrb[136].mxu0 %v1980_v63 }
 0x442   :  { %3627 = vmatprep.mubr.f32.mxu0 %v1981_v0  ;;  %3841 = vmatpush1.bf16.msra.mxu0 %v3840_v5 }
 0x443   :  { %3843 = vmatprep.subr.bf16.mxu0 %v3842_v3 }
 0x445   :  { %3628 = vmatmul.mubr.f32.gmra.mrb[138].mxu0 %v1982_v27 }
 0x446   :  { %2434 = vmatprep.mubr.f32.mxu0 %v4104_v2  ;;  %3845 = vmatpush1.bf16.msra.mxu0 %v3844_v8 }
 0x514   :  { %v3626_v17 = vpop.f32.mrb[136].mxu0 }
 0x515   :  { %v2079_v9 = vadd.f32 %v3626_v17, %v1995_v41  ;;  %v2073_v24 = vpop.f32.mrb[137].mxu0  ;;  %v81_v17 = vpop.permute.xlu0 %80 }
 0x516   :  { %v2074_v25 = vadd.f32 %v2073_v24, %v1990_v16 }
 0x517   :  { %v2093_v21 = vmax.f32 %v2079_v9, 0.0  ;;  %v86_v9 = vpop.permute.xlu1 %85 }
 0x518   :  { %v2092_v56 = vmax.f32 %v2074_v25, 0.0  ;;  %v3629_v53 = vpop.f32.mrb[138].mxu0 }
 0x519   :  { %v2089_v50 = vadd.f32 %v3629_v53, %v2005_v28  ;;  %v2083_v32 = vpop.f32.mrb[139].mxu0  ;;  %v91_v33 = vpop.permute.xlu0 %90 }
 0x51a   :  { %v3830_v36 = vpack.c.bf16 %v2093_v21, %v2092_v56  ;;  %v2084_v38 = vadd.f32 %v2083_v32, %v2000_v31 }
 0x51b   :  { %v2095_v59 = vmax.f32 %v2089_v50, 0.0 }
 0x51c   :  { %v2094_v44 = vmax.f32 %v2084_v38, 0.0  ;;  %3831 = vmatprep.subr.bf16.mxu1 %v3830_v36 }
 0x51d   :  { %3833 = vmatpush3.bf16.msra.mxu1 %v3830_v36 }
 0x51e   :  { %v3834_v19 = vpack.c.bf16 %v2095_v59, %v2094_v44 }
 0x520   :  { %3835 = vmatprep.subr.bf16.mxu1 %v3834_v19 }
 0x521   :  { %3837 = vmatpush3.bf16.msra.mxu1 %v3834_v19 }
 0x522   :  { %3847 = vmatprep.subr.bf16.mxu1 %v3846_v22 }
 0x524   :  { %3639 = vmatmul.mubr.msk.f32.vlgmr.msra.gmra.mrb[128].mxu1 %vm2112_vm3, %v2097_v30 }
 0x525   :  { %3641 = vmatprep.mubr.msk.f32.mxu1 %vm2112_vm3, %v2098_v35  ;;  %3849 = vmatpush1.bf16.msra.mxu1 %v3848_v34 }
 0x526   :  { %3851 = vmatprep.subr.bf16.mxu1 %v3850_v13 }
 0x528   :  { %3642 = vmatmul.mubr.msk.f32.gmra.mrb[130].mxu1 %vm2112_vm3, %v2099_v46 }
 0x529   :  { %3644 = vmatprep.mubr.msk.f32.mxu1 %vm2112_vm3, %v2100_v20  ;;  %3853 = vmatpush1.bf16.msra.mxu1 %v3852_v47  ;;  %v96_v20 = vpop.permute.xlu1 %95 }
 0x52c   :  { %3645 = vmatmul.mubr.msk.f32.gmra.mrb[132].mxu1 %vm2112_vm3, %v2101_v48 }
 0x52d   :  { %3647 = vmatprep.mubr.msk.f32.mxu1 %vm2112_vm3, %v2102_v6 }
 0x530   :  { %3648 = vmatmul.mubr.msk.f32.gmra.mrb[134].mxu1 %vm2112_vm3, %v2103_v15 }
 0x531   :  { %3650 = vmatprep.mubr.msk.f32.mxu1 %vm2112_vm3, %v2104_v40 }
 0x534   :  { %3651 = vmatmul.mubr.msk.f32.gmra.mrb[136].mxu1 %vm2112_vm3, %v2105_v45 }
 0x535   :  { %3653 = vmatprep.mubr.msk.f32.mxu1 %vm2112_vm3, %v2106_v49 }
 0x538   :  { %3654 = vmatmul.mubr.msk.f32.gmra.mrb[138].mxu1 %vm2112_vm3, %v2107_v51 }
 0x539   :  { %3656 = vmatprep.mubr.msk.f32.mxu1 %vm2112_vm3, %v2108_v55 }
 0x53c   :  { %3657 = vmatmul.mubr.msk.f32.gmra.mrb[140].mxu1 %vm2112_vm3, %v2109_v29 }
 0x53d   :  { %3659 = vmatprep.mubr.msk.f32.mxu1 %vm2112_vm3, %v2110_v23 }
 0x540   :  { %3660 = vmatmul.mubr.msk.f32.gmra.mrb[142].mxu1 %vm2112_vm3, %v2111_v57 }
 0x541   :  { %2595 = vmatprep.mubr.f32.mxu1 %v4104_v2 }
 0x5f7   :  { %v3640_v18 = vpop.f32.mrb[128].mxu1 }
 0x5f8   :  { %v2227_v52 = vpop.f32.mrb[129].mxu1 }
 0x5f9   :  { %3358 = vmatmul.mubr.msk.f32.vlgmr.msra.gmra.mrb[4].mxu0 %vm2112_vm3, %v2227_v52  ;;  %3374 = vmatmul.mubr.msk.f32.vlgmr.msra.gmra.mrb[0].mxu1 %vm2112_vm3, %v2227_v52 }
 0x5fa   :  { %2440 = vmatprep.mubr.f32.mxu0 %v4104_v2  ;;  %2601 = vmatprep.mubr.f32.mxu1 %v4104_v2 }
 0x5fb   :  { %v3643_v63 = vpop.f32.mrb[130].mxu1 }
 0x5fc   :  { %v2237_v0 = vpop.f32.mrb[131].mxu1 }
 0x5fd   :  { %3359 = vmatmul.mubr.msk.f32.gmra.mrb[6].mxu0 %vm2112_vm3, %v3640_v18  ;;  %3375 = vmatmul.mubr.msk.f32.gmra.mrb[2].mxu1 %vm2112_vm3, %v3640_v18 }
 0x5fe   :  { %2446 = vmatprep.mubr.f32.mxu0 %v4104_v2  ;;  %2607 = vmatprep.mubr.f32.mxu1 %v4104_v2 }
 0x5ff   :  { %v3646_v27 = vpop.f32.mrb[132].mxu1 }
 0x600   :  { %v2247_v54 = vpop.f32.mrb[133].mxu1 }
 0x601   :  { %3360 = vmatmul.mubr.msk.f32.gmra.mrb[8].mxu0 %vm2112_vm3, %v2237_v0  ;;  %3376 = vmatmul.mubr.msk.f32.gmra.mrb[4].mxu1 %vm2112_vm3, %v2237_v0 }
 0x602   :  { %2452 = vmatprep.mubr.f32.mxu0 %v4104_v2  ;;  %2613 = vmatprep.mubr.f32.mxu1 %v4104_v2 }
 0x603   :  { %v3649_v37 = vpop.f32.mrb[134].mxu1 }
 0x604   :  { %v2257_v58 = vpop.f32.mrb[135].mxu1 }
 0x605   :  { %3361 = vmatmul.mubr.msk.f32.gmra.mrb[10].mxu0 %vm2112_vm3, %v3643_v63  ;;  %3377 = vmatmul.mubr.msk.f32.gmra.mrb[6].mxu1 %vm2112_vm3, %v3643_v63 }
 0x606   :  { %2458 = vmatprep.mubr.f32.mxu0 %v4104_v2  ;;  %2619 = vmatprep.mubr.f32.mxu1 %v4104_v2 }
 0x607   :  { %v3652_v60 = vpop.f32.mrb[136].mxu1 }
 0x608   :  { %v2267_v61 = vpop.f32.mrb[137].mxu1 }
 0x609   :  { %3362 = vmatmul.mubr.msk.f32.gmra.mrb[12].mxu0 %vm2112_vm3, %v2247_v54  ;;  %3378 = vmatmul.mubr.msk.f32.gmra.mrb[8].mxu1 %vm2112_vm3, %v2247_v54 }
 0x60a   :  { %2464 = vmatprep.mubr.f32.mxu0 %v4104_v2  ;;  %2625 = vmatprep.mubr.f32.mxu1 %v4104_v2 }
 0x60b   :  { %v3655_v26 = vpop.f32.mrb[138].mxu1 }
 0x60c   :  { %v2277_v5 = vpop.f32.mrb[139].mxu1 }
 0x60d   :  { %3363 = vmatmul.mubr.msk.f32.gmra.mrb[14].mxu0 %vm2112_vm3, %v3646_v27  ;;  %3379 = vmatmul.mubr.msk.f32.gmra.mrb[10].mxu1 %vm2112_vm3, %v3646_v27 }
 0x60e   :  { %2470 = vmatprep.mubr.f32.mxu0 %v4104_v2  ;;  %2631 = vmatprep.mubr.f32.mxu1 %v4104_v2 }
 0x60f   :  { %v3658_v7 = vpop.f32.mrb[140].mxu1 }
 0x610   :  { %v2287_v10 = vpop.f32.mrb[141].mxu1 }
 0x611   :  { %3364 = vmatmul.mubr.msk.f32.gmra.mrb[16].mxu0 %vm2112_vm3, %v2257_v58  ;;  %3380 = vmatmul.mubr.msk.f32.gmra.mrb[12].mxu1 %vm2112_vm3, %v2257_v58 }
 0x612   :  { %2476 = vmatprep.mubr.f32.mxu0 %v4104_v2  ;;  %2637 = vmatprep.mubr.f32.mxu1 %v4104_v2 }
 0x613   :  { %v3661_v3 = vpop.f32.mrb[142].mxu1 }
 0x614   :  { %v2297_v14 = vpop.f32.mrb[143].mxu1 }
 0x615   :  { %3365 = vmatmul.mubr.msk.f32.gmra.mrb[18].mxu0 %vm2112_vm3, %v3649_v37  ;;  %3381 = vmatmul.mubr.msk.f32.gmra.mrb[14].mxu1 %vm2112_vm3, %v3649_v37 }
 0x616   :  { %2482 = vmatprep.mubr.f32.mxu0 %v4104_v2  ;;  %2643 = vmatprep.mubr.f32.mxu1 %v4104_v2 }
 0x619   :  { %3366 = vmatmul.mubr.msk.f32.gmra.mrb[20].mxu0 %vm2112_vm3, %v2267_v61  ;;  %3382 = vmatmul.mubr.msk.f32.gmra.mrb[16].mxu1 %vm2112_vm3, %v2267_v61 }
 0x61a   :  { %2488 = vmatprep.mubr.f32.mxu0 %v4104_v2  ;;  %2649 = vmatprep.mubr.f32.mxu1 %v4104_v2 }
 0x61d   :  { %3367 = vmatmul.mubr.msk.f32.gmra.mrb[22].mxu0 %vm2112_vm3, %v3652_v60  ;;  %3383 = vmatmul.mubr.msk.f32.gmra.mrb[18].mxu1 %vm2112_vm3, %v3652_v60 }
 0x61e   :  { %2494 = vmatprep.mubr.f32.mxu0 %v4104_v2  ;;  %2655 = vmatprep.mubr.f32.mxu1 %v4104_v2 }
 0x621   :  { %3368 = vmatmul.mubr.msk.f32.gmra.mrb[24].mxu0 %vm2112_vm3, %v2277_v5  ;;  %3384 = vmatmul.mubr.msk.f32.gmra.mrb[20].mxu1 %vm2112_vm3, %v2277_v5 }
 0x622   :  { %2500 = vmatprep.mubr.f32.mxu0 %v4104_v2  ;;  %2661 = vmatprep.mubr.f32.mxu1 %v4104_v2 }
 0x625   :  { %3369 = vmatmul.mubr.msk.f32.gmra.mrb[26].mxu0 %vm2112_vm3, %v3655_v26  ;;  %3385 = vmatmul.mubr.msk.f32.gmra.mrb[22].mxu1 %vm2112_vm3, %v3655_v26 }
 0x626   :  { %2506 = vmatprep.mubr.f32.mxu0 %v4104_v2  ;;  %2667 = vmatprep.mubr.f32.mxu1 %v4104_v2 }
 0x629   :  { %3370 = vmatmul.mubr.msk.f32.gmra.mrb[28].mxu0 %vm2112_vm3, %v2287_v10  ;;  %3386 = vmatmul.mubr.msk.f32.gmra.mrb[24].mxu1 %vm2112_vm3, %v2287_v10 }
 0x62a   :  { %2512 = vmatprep.mubr.f32.mxu0 %v4104_v2  ;;  %2673 = vmatprep.mubr.f32.mxu1 %v4104_v2 }
 0x62d   :  { %3371 = vmatmul.mubr.msk.f32.gmra.mrb[30].mxu0 %vm2112_vm3, %v3658_v7  ;;  %3387 = vmatmul.mubr.msk.f32.gmra.mrb[26].mxu1 %vm2112_vm3, %v3658_v7 }
 0x62e   :  { %2518 = vmatprep.mubr.f32.mxu0 %v4104_v2  ;;  %2679 = vmatprep.mubr.f32.mxu1 %v4104_v2 }
 0x631   :  { %3372 = vmatmul.mubr.msk.f32.gmra.mrb[32].mxu0 %vm2112_vm3, %v2297_v14  ;;  %3388 = vmatmul.mubr.msk.f32.gmra.mrb[28].mxu1 %vm2112_vm3, %v2297_v14  ;;  %v101_v14 = vpop.permute.xlu0 %100 }
 0x632   :  { %2524 = vmatprep.mubr.f32.mxu0 %v4104_v2  ;;  %2685 = vmatprep.mubr.f32.mxu1 %v4104_v2 }
 0x635   :  { %3373 = vmatmul.mubr.msk.f32.gmra.mrb[34].mxu0 %vm2112_vm3, %v3661_v3  ;;  %3389 = vmatmul.mubr.msk.f32.gmra.mrb[30].mxu1 %vm2112_vm3, %v3661_v3 }
 0x636   :  { %2898 = vmatprep.mubr.f32.mxu0 %v4104_v2  ;;  %2975 = vmatprep.mubr.f32.mxu1 %v4104_v2 }
 0x6cc   :  { %v2436_v12 = vpop.f32.mrb[4].mxu0  ;;  %v2597_v8 = vpop.f32.mrb[0].mxu1 }
 0x6cd   :  { %v2438_v41 = vpop.f32.mrb[5].mxu0  ;;  %v2599_v16 = vpop.f32.mrb[1].mxu1  ;;  %v3928_v24 = vadd.f32 %v2436_v12, %v81_v17  ;;  %v3960_v25 = vadd.f32 %v2597_v8, %v81_v17 }
 0x6ce   :  { %v3929_v21 = vadd.f32 %v2438_v41, %v81_v17  ;;  %v3961_v28 = vadd.f32 %v2599_v16, %v81_v17  ;;  %v106_v41 = vpop.permute.xlu1 %105 }
 0x6cf   :  { %v2756_v1 = vmax.f32 %v3928_v24, 0.0  ;;  %v2758_v39 = vmax.f32 %v3960_v25, 0.0 }
 0x6d0   :  { %v2442_v56 = vpop.f32.mrb[6].mxu0  ;;  %v2603_v53 = vpop.f32.mrb[2].mxu1  ;;  %v2757_v22 = vmax.f32 %v3929_v21, 0.0  ;;  %v2759_v42 = vmax.f32 %v3961_v28, 0.0 }
 0x6d1   :  { %v3930_v31 = vadd.f32 %v2442_v56, %v86_v9  ;;  %v3962_v50 = vadd.f32 %v2603_v53, %v86_v9  ;;  %v2444_v32 = vpop.f32.mrb[7].mxu0  ;;  %v2605_v36 = vpop.f32.mrb[3].mxu1 }
 0x6d2   :  { %v3931_v38 = vadd.f32 %v2444_v32, %v86_v9  ;;  %v3963_v59 = vadd.f32 %v2605_v36, %v86_v9 }
 0x6d3   :  { %v2760_v44 = vmax.f32 %v3930_v31, 0.0  ;;  %v2762_v19 = vmax.f32 %v3962_v50, 0.0 }
 0x6d4   :  { %v2761_v43 = vmax.f32 %v3931_v38, 0.0  ;;  %v2763_v62 = vmax.f32 %v3963_v59, 0.0  ;;  %v2448_v11 = vpop.f32.mrb[8].mxu0  ;;  %v2609_v30 = vpop.f32.mrb[4].mxu1 }
 0x6d5   :  { %v3856_v34 = vpack.c.bf16 %v2760_v44, %v2756_v1  ;;  %v3888_v35 = vpack.c.bf16 %v2762_v19, %v2758_v39  ;;  %v2450_v13 = vpop.f32.mrb[9].mxu0  ;;  %v2611_v4 = vpop.f32.mrb[5].mxu1  ;;  %v3932_v48 = vadd.f32 %v2448_v11, %v91_v33  ;;  %v3964_v6 = vadd.f32 %v2609_v30, %v91_v33 }
 0x6d6   :  { %v3854_v46 = vpack.c.bf16 %v2761_v43, %v2757_v22  ;;  %v3886_v47 = vpack.c.bf16 %v2763_v62, %v2759_v42  ;;  %v3933_v15 = vadd.f32 %v2450_v13, %v91_v33  ;;  %v3965_v40 = vadd.f32 %v2611_v4, %v91_v33  ;;  %v116_v33 = vpop.permute.xlu1 %115 }
 0x6d7   :  { %v2764_v52 = vmax.f32 %v3932_v48, 0.0  ;;  %v2766_v63 = vmax.f32 %v3964_v6, 0.0 }
 0x6d8   :  { %v2454_v45 = vpop.f32.mrb[10].mxu0  ;;  %v2615_v49 = vpop.f32.mrb[6].mxu1  ;;  %3855 = vmatprep.subr.bf16.mxu0 %v3854_v46  ;;  %3887 = vmatprep.subr.bf16.mxu1 %v3886_v47  ;;  %v2765_v54 = vmax.f32 %v3933_v15, 0.0  ;;  %v2767_v37 = vmax.f32 %v3965_v40, 0.0 }
 0x6d9   :  { %v3934_v51 = vadd.f32 %v2454_v45, %v96_v20  ;;  %v3966_v55 = vadd.f32 %v2615_v49, %v96_v20  ;;  %v2456_v29 = vpop.f32.mrb[11].mxu0  ;;  %v2617_v23 = vpop.f32.mrb[7].mxu1  ;;  %3857 = vmatpush1.bf16.msra.mxu0 %v3856_v34  ;;  %3889 = vmatpush1.bf16.msra.mxu1 %v3888_v35 }
 0x6da   :  { %v3935_v57 = vadd.f32 %v2456_v29, %v96_v20  ;;  %v3967_v18 = vadd.f32 %v2617_v23, %v96_v20  ;;  %v111_v35 = vpop.permute.xlu0 %110 }
 0x6db   :  { %v2768_v0 = vmax.f32 %v3934_v51, 0.0  ;;  %v2770_v27 = vmax.f32 %v3966_v55, 0.0 }
 0x6dc   :  { %v2769_v58 = vmax.f32 %v3935_v57, 0.0  ;;  %v2771_v60 = vmax.f32 %v3967_v18, 0.0  ;;  %v2460_v61 = vpop.f32.mrb[12].mxu0  ;;  %v2621_v26 = vpop.f32.mrb[8].mxu1 }
 0x6dd   :  { %v3860_v5 = vpack.c.bf16 %v2768_v0, %v2764_v52  ;;  %v3892_v7 = vpack.c.bf16 %v2770_v27, %v2766_v63  ;;  %v2462_v10 = vpop.f32.mrb[13].mxu0  ;;  %v2623_v3 = vpop.f32.mrb[9].mxu1  ;;  %v3936_v16 = vadd.f32 %v2460_v61, %v101_v14  ;;  %v3968_v17 = vadd.f32 %v2621_v26, %v101_v14 }
 0x6de   :  { %v3858_v12 = vpack.c.bf16 %v2769_v58, %v2765_v54  ;;  %v3890_v8 = vpack.c.bf16 %v2771_v60, %v2767_v37  ;;  %v3937_v9 = vadd.f32 %v2462_v10, %v101_v14  ;;  %v3969_v24 = vadd.f32 %v2623_v3, %v101_v14  ;;  %v126_v14 = vpop.permute.xlu1 %125 }
 0x6df   :  { %v2772_v36 = vmax.f32 %v3936_v16, 0.0  ;;  %v2774_v38 = vmax.f32 %v3968_v17, 0.0 }
 0x6e0   :  { %v2466_v25 = vpop.f32.mrb[14].mxu0  ;;  %v2627_v21 = vpop.f32.mrb[10].mxu1  ;;  %3859 = vmatprep.subr.bf16.mxu0 %v3858_v12  ;;  %3891 = vmatprep.subr.bf16.mxu1 %v3890_v8  ;;  %v2773_v39 = vmax.f32 %v3937_v9, 0.0  ;;  %v2775_v44 = vmax.f32 %v3969_v24, 0.0 }
 0x6e1   :  { %v3938_v28 = vadd.f32 %v2466_v25, %v106_v41  ;;  %v3970_v56 = vadd.f32 %v2627_v21, %v106_v41  ;;  %v2468_v53 = vpop.f32.mrb[15].mxu0  ;;  %v2629_v31 = vpop.f32.mrb[11].mxu1  ;;  %3861 = vmatpush1.bf16.msra.mxu0 %v3860_v5  ;;  %3893 = vmatpush1.bf16.msra.mxu1 %v3892_v7 }
 0x6e2   :  { %v3939_v50 = vadd.f32 %v2468_v53, %v106_v41  ;;  %v3971_v32 = vadd.f32 %v2629_v31, %v106_v41  ;;  %v121_v7 = vpop.permute.xlu0 %120 }
 0x6e3   :  { %v2776_v59 = vmax.f32 %v3938_v28, 0.0  ;;  %v2778_v1 = vmax.f32 %v3970_v56, 0.0 }
 0x6e4   :  { %v2777_v19 = vmax.f32 %v3939_v50, 0.0  ;;  %v2779_v22 = vmax.f32 %v3971_v32, 0.0  ;;  %v2472_v42 = vpop.f32.mrb[16].mxu0  ;;  %v2633_v43 = vpop.f32.mrb[12].mxu1 }
 0x6e5   :  { %v3864_v62 = vpack.c.bf16 %v2776_v59, %v2772_v36  ;;  %v3896_v11 = vpack.c.bf16 %v2778_v1, %v2774_v38  ;;  %v2474_v30 = vpop.f32.mrb[17].mxu0  ;;  %v2635_v34 = vpop.f32.mrb[13].mxu1  ;;  %v3940_v46 = vadd.f32 %v2472_v42, %v111_v35  ;;  %v3972_v47 = vadd.f32 %v2633_v43, %v111_v35 }
 0x6e6   :  { %v3862_v13 = vpack.c.bf16 %v2777_v19, %v2773_v39  ;;  %v3894_v4 = vpack.c.bf16 %v2779_v22, %v2775_v44  ;;  %v3941_v20 = vadd.f32 %v2474_v30, %v111_v35  ;;  %v3973_v48 = vadd.f32 %v2635_v34, %v111_v35  ;;  %v136_v35 = vpop.permute.xlu1 %135 }
 0x6e7   :  { %v2780_v23 = vmax.f32 %v3940_v46, 0.0  ;;  %v2782_v57 = vmax.f32 %v3972_v47, 0.0 }
 0x6e8   :  { %v2478_v6 = vpop.f32.mrb[18].mxu0  ;;  %v2639_v15 = vpop.f32.mrb[14].mxu1  ;;  %3863 = vmatprep.subr.bf16.mxu0 %v3862_v13  ;;  %3895 = vmatprep.subr.bf16.mxu1 %v3894_v4  ;;  %v2781_v63 = vmax.f32 %v3941_v20, 0.0  ;;  %v2783_v0 = vmax.f32 %v3973_v48, 0.0 }
 0x6e9   :  { %v3942_v40 = vadd.f32 %v2478_v6, %v116_v33  ;;  %v3974_v45 = vadd.f32 %v2639_v15, %v116_v33  ;;  %v2480_v49 = vpop.f32.mrb[19].mxu0  ;;  %v2641_v51 = vpop.f32.mrb[15].mxu1  ;;  %3865 = vmatpush1.bf16.msra.mxu0 %v3864_v62  ;;  %3897 = vmatpush1.bf16.msra.mxu1 %v3896_v11 }
 0x6ea   :  { %v3943_v55 = vadd.f32 %v2480_v49, %v116_v33  ;;  %v3975_v29 = vadd.f32 %v2641_v51, %v116_v33  ;;  %v131_v11 = vpop.permute.xlu0 %130 }
 0x6eb   :  { %v2784_v18 = vmax.f32 %v3942_v40, 0.0  ;;  %v2786_v52 = vmax.f32 %v3974_v45, 0.0 }
 0x6ec   :  { %v2785_v27 = vmax.f32 %v3943_v55, 0.0  ;;  %v2787_v54 = vmax.f32 %v3975_v29, 0.0  ;;  %v2484_v37 = vpop.f32.mrb[20].mxu0  ;;  %v2645_v58 = vpop.f32.mrb[16].mxu1 }
 0x6ed   :  { %v3868_v60 = vpack.c.bf16 %v2784_v18, %v2780_v23  ;;  %v3900_v61 = vpack.c.bf16 %v2786_v52, %v2782_v57  ;;  %v2486_v26 = vpop.f32.mrb[21].mxu0  ;;  %v2647_v5 = vpop.f32.mrb[17].mxu1  ;;  %v3944_v12 = vadd.f32 %v2484_v37, %v121_v7  ;;  %v3976_v8 = vadd.f32 %v2645_v58, %v121_v7 }
 0x6ee   :  { %v3866_v10 = vpack.c.bf16 %v2785_v27, %v2781_v63  ;;  %v3898_v3 = vpack.c.bf16 %v2787_v54, %v2783_v0  ;;  %v3945_v41 = vadd.f32 %v2486_v26, %v121_v7  ;;  %v3977_v16 = vadd.f32 %v2647_v5, %v121_v7  ;;  %v146_v7 = vpop.permute.xlu1 %145 }
 0x6ef   :  { %v2788_v31 = vmax.f32 %v3944_v12, 0.0  ;;  %v2790_v50 = vmax.f32 %v3976_v8, 0.0 }
 0x6f0   :  { %v2490_v17 = vpop.f32.mrb[22].mxu0  ;;  %v2651_v9 = vpop.f32.mrb[18].mxu1  ;;  %3867 = vmatprep.subr.bf16.mxu0 %v3866_v10  ;;  %3899 = vmatprep.subr.bf16.mxu1 %v3898_v3  ;;  %v2789_v38 = vmax.f32 %v3945_v41, 0.0  ;;  %v2791_v59 = vmax.f32 %v3977_v16, 0.0 }
 0x6f1   :  { %v3946_v24 = vadd.f32 %v2490_v17, %v126_v14  ;;  %v3978_v25 = vadd.f32 %v2651_v9, %v126_v14  ;;  %v2492_v21 = vpop.f32.mrb[23].mxu0  ;;  %v2653_v28 = vpop.f32.mrb[19].mxu1  ;;  %3869 = vmatpush1.bf16.msra.mxu0 %v3868_v60  ;;  %3901 = vmatpush1.bf16.msra.mxu1 %v3900_v61 }
 0x6f2   :  { %v3947_v56 = vadd.f32 %v2492_v21, %v126_v14  ;;  %v3979_v53 = vadd.f32 %v2653_v28, %v126_v14  ;;  %v141_v61 = vpop.permute.xlu0 %140 }
 0x6f3   :  { %v2792_v32 = vmax.f32 %v3946_v24, 0.0  ;;  %v2794_v36 = vmax.f32 %v3978_v25, 0.0 }
 0x6f4   :  { %v2793_v1 = vmax.f32 %v3947_v56, 0.0  ;;  %v2795_v39 = vmax.f32 %v3979_v53, 0.0  ;;  %v2496_v44 = vpop.f32.mrb[24].mxu0  ;;  %v2657_v19 = vpop.f32.mrb[20].mxu1 }
 0x6f5   :  { %v3872_v22 = vpack.c.bf16 %v2792_v32, %v2788_v31  ;;  %v3904_v42 = vpack.c.bf16 %v2794_v36, %v2790_v50  ;;  %v2498_v43 = vpop.f32.mrb[25].mxu0  ;;  %v2659_v62 = vpop.f32.mrb[21].mxu1  ;;  %v3948_v13 = vadd.f32 %v2496_v44, %v131_v11  ;;  %v3980_v4 = vadd.f32 %v2657_v19, %v131_v11 }
 0x6f6   :  { %v3870_v30 = vpack.c.bf16 %v2793_v1, %v2789_v38  ;;  %v3902_v34 = vpack.c.bf16 %v2795_v39, %v2791_v59  ;;  %v3949_v33 = vadd.f32 %v2498_v43, %v131_v11  ;;  %v3981_v46 = vadd.f32 %v2659_v62, %v131_v11  ;;  %v156_v11 = vpop.permute.xlu1 %155 }
 0x6f7   :  { %v2796_v51 = vmax.f32 %v3948_v13, 0.0  ;;  %v2798_v55 = vmax.f32 %v3980_v4, 0.0 }
 0x6f8   :  { %v2502_v47 = vpop.f32.mrb[26].mxu0  ;;  %v2663_v20 = vpop.f32.mrb[22].mxu1  ;;  %3871 = vmatprep.subr.bf16.mxu0 %v3870_v30  ;;  %3903 = vmatprep.subr.bf16.mxu1 %v3902_v34  ;;  %v2797_v57 = vmax.f32 %v3949_v33, 0.0  ;;  %v2799_v18 = vmax.f32 %v3981_v46, 0.0 }
 0x6f9   :  { %v3950_v48 = vadd.f32 %v2502_v47, %v136_v35  ;;  %v3982_v6 = vadd.f32 %v2663_v20, %v136_v35  ;;  %v2504_v15 = vpop.f32.mrb[27].mxu0  ;;  %v2665_v40 = vpop.f32.mrb[23].mxu1  ;;  %3873 = vmatpush1.bf16.msra.mxu0 %v3872_v22  ;;  %3905 = vmatpush1.bf16.msra.mxu1 %v3904_v42 }
 0x6fa   :  { %v3951_v45 = vadd.f32 %v2504_v15, %v136_v35  ;;  %v3983_v49 = vadd.f32 %v2665_v40, %v136_v35  ;;  %v151_v42 = vpop.permute.xlu0 %150 }
 0x6fb   :  { %v2800_v29 = vmax.f32 %v3950_v48, 0.0  ;;  %v2802_v23 = vmax.f32 %v3982_v6, 0.0 }
 0x6fc   :  { %v2801_v52 = vmax.f32 %v3951_v45, 0.0  ;;  %v2803_v63 = vmax.f32 %v3983_v49, 0.0  ;;  %v2508_v0 = vpop.f32.mrb[28].mxu0  ;;  %v2669_v27 = vpop.f32.mrb[24].mxu1 }
 0x6fd   :  { %v3876_v54 = vpack.c.bf16 %v2800_v29, %v2796_v51  ;;  %v3908_v37 = vpack.c.bf16 %v2802_v23, %v2798_v55  ;;  %v2510_v58 = vpop.f32.mrb[29].mxu0  ;;  %v2671_v60 = vpop.f32.mrb[25].mxu1  ;;  %v3952_v10 = vadd.f32 %v2508_v0, %v141_v61  ;;  %v3984_v3 = vadd.f32 %v2669_v27, %v141_v61  ;;  %v2820_v27 = vld [vmem:[%s5456_s2 + $0xa0] sm:$0xff] }
 0x6fe   :  { %v3874_v26 = vpack.c.bf16 %v2801_v52, %v2797_v57  ;;  %v3906_v5 = vpack.c.bf16 %v2803_v63, %v2799_v18  ;;  %v3953_v14 = vadd.f32 %v2510_v58, %v141_v61  ;;  %v3985_v12 = vadd.f32 %v2671_v60, %v141_v61 }
 0x6ff   :  { %v2804_v28 = vmax.f32 %v3952_v10, 0.0  ;;  %v2806_v56 = vmax.f32 %v3984_v3, 0.0 }
 0x700   :  { %v2514_v8 = vpop.f32.mrb[30].mxu0  ;;  %v2675_v41 = vpop.f32.mrb[26].mxu1  ;;  %3875 = vmatprep.subr.bf16.mxu0 %v3874_v26  ;;  %3907 = vmatprep.subr.bf16.mxu1 %v3906_v5  ;;  %v2805_v50 = vmax.f32 %v3953_v14, 0.0  ;;  %v2807_v32 = vmax.f32 %v3985_v12, 0.0 }
 0x701   :  { %v3954_v16 = vadd.f32 %v2514_v8, %v146_v7  ;;  %v3986_v17 = vadd.f32 %v2675_v41, %v146_v7  ;;  %v2516_v9 = vpop.f32.mrb[31].mxu0  ;;  %v2677_v24 = vpop.f32.mrb[27].mxu1  ;;  %3877 = vmatpush1.bf16.msra.mxu0 %v3876_v54  ;;  %3909 = vmatpush1.bf16.msra.mxu1 %v3908_v37  ;;  %v2821_v54 = vld [vmem:[%s5456_s2 + $0xa8] sm:$0xff] }
 0x702   :  { %v3955_v25 = vadd.f32 %v2516_v9, %v146_v7  ;;  %v3987_v21 = vadd.f32 %v2677_v24, %v146_v7  ;;  %v2827_v26 = vpop.permute.xlu0 %2826  ;;  %v2832_v5 = vpop.permute.xlu1 %2831 }
 0x703   :  { %v2808_v53 = vmax.f32 %v3954_v16, 0.0  ;;  %v2810_v31 = vmax.f32 %v3986_v17, 0.0 }
 0x704   :  { %v2809_v36 = vmax.f32 %v3955_v25, 0.0  ;;  %v2811_v38 = vmax.f32 %v3987_v21, 0.0  ;;  %v2520_v59 = vpop.f32.mrb[32].mxu0  ;;  %v2681_v1 = vpop.f32.mrb[28].mxu1 }
 0x705   :  { %v3880_v39 = vpack.c.bf16 %v2808_v53, %v2804_v28  ;;  %v3912_v44 = vpack.c.bf16 %v2810_v31, %v2806_v56  ;;  %v2522_v19 = vpop.f32.mrb[33].mxu0  ;;  %v2683_v22 = vpop.f32.mrb[29].mxu1  ;;  %v3956_v30 = vadd.f32 %v2520_v59, %v151_v42  ;;  %v3988_v34 = vadd.f32 %v2681_v1, %v151_v42 }
 0x706   :  { %v3878_v43 = vpack.c.bf16 %v2809_v36, %v2805_v50  ;;  %v3910_v62 = vpack.c.bf16 %v2811_v38, %v2807_v32  ;;  %v3957_v35 = vadd.f32 %v2522_v19, %v151_v42  ;;  %v3989_v13 = vadd.f32 %v2683_v22, %v151_v42  ;;  %v3001_v19 = vpop.permute.xlu0 %3000 }
 0x707   :  { %v2812_v40 = vmax.f32 %v3956_v30, 0.0  ;;  %v2814_v45 = vmax.f32 %v3988_v34, 0.0 }
 0x708   :  { %v2526_v4 = vpop.f32.mrb[34].mxu0  ;;  %v2687_v33 = vpop.f32.mrb[30].mxu1  ;;  %3879 = vmatprep.subr.bf16.mxu0 %v3878_v43  ;;  %3911 = vmatprep.subr.bf16.mxu1 %v3910_v62  ;;  %v2813_v55 = vmax.f32 %v3957_v35, 0.0  ;;  %v2815_v29 = vmax.f32 %v3989_v13, 0.0 }
 0x709   :  { %v3958_v46 = vadd.f32 %v2526_v4, %v156_v11  ;;  %v3990_v47 = vadd.f32 %v2687_v33, %v156_v11  ;;  %v2528_v20 = vpop.f32.mrb[35].mxu0  ;;  %v2689_v48 = vpop.f32.mrb[31].mxu1  ;;  %3881 = vmatpush1.bf16.msra.mxu0 %v3880_v39  ;;  %3913 = vmatpush1.bf16.msra.mxu1 %v3912_v44  ;;  %v2996_v44 = vld [vmem:[%s5457_s3 + $0x80] sm:$0x3]  ;;  %s4107_s3 = smov [#allocation2]  }
 0x70a   :  { %v3959_v6 = vadd.f32 %v2528_v20, %v156_v11  ;;  %v3991_v15 = vadd.f32 %v2689_v48, %v156_v11  ;;  %s3262_s30 = sshll.u32 %s4107_s3, 4  ;;  %s3263_s30 = int_to_ptr.vmem [resolvable:$true] %s3262_s30 }
 0x70b   :  { %v2816_v49 = vmax.f32 %v3958_v46, 0.0  ;;  %v2818_v51 = vmax.f32 %v3990_v47, 0.0  ;;  %s4080_s7 = scalar_lea.vmem %s3263_s30, 128  ;;  %p4085_p1 = scmp.lt.s32.totalorder %s3263_s30, %s3263_s30 }
 0x70c   :  { %v2817_v23 = vmax.f32 %v3959_v6, 0.0  ;;  %v2819_v57 = vmax.f32 %v3991_v15, 0.0  ;;  %p4081_p0 = scmp.ne.s32.totalorder %s3263_s30, %s4080_s7  ;;  %p4086_p2 = scmp.lt.s32.totalorder %s4080_s7, %s4080_s7 }
 0x70d   :  { %v3884_v18 = vpack.c.bf16 %v2816_v49, %v2812_v40  ;;  %v3916_v52 = vpack.c.bf16 %v2818_v51, %v2814_v45 }
 0x70e   :  { %v3882_v63 = vpack.c.bf16 %v2817_v23, %v2813_v55  ;;  %v3914_v0 = vpack.c.bf16 %v2819_v57, %v2815_v29  ;;  %p4087_p3 = por %p4086_p2, %p4085_p1 }
 0x710   :  { %3883 = vmatprep.subr.bf16.mxu0 %v3882_v63  ;;  %3915 = vmatprep.subr.bf16.mxu1 %v3914_v0  ;;  %p4088_p4 = pnand %p4087_p3, %p4081_p0 }
 0x711   :  { %3885 = vmatpush1.bf16.msra.mxu0 %v3884_v18  ;;  %3917 = vmatpush1.bf16.msra.mxu1 %v3916_v52 }
 0x714   :  { %2899 = vmatmul.mubr.f32.vlgmr.msra.gmra.mrb[140].mxu0 %v2820_v27  ;;  %2976 = vmatmul.mubr.f32.vlgmr.msra.gmra.mrb[144].mxu1 %v2820_v27 }
 0x715   :  { %2904 = vmatprep.mubr.f32.mxu0 %v4104_v2  ;;  %2981 = vmatprep.mubr.f32.mxu1 %v4104_v2 }
 0x718   :  { %2905 = vmatmul.mubr.f32.gmra.mrb[142].mxu0 %v2821_v54  ;;  %2982 = vmatmul.mubr.f32.gmra.mrb[146].mxu1 %v2821_v54 }
 0x719   :  { %3070 = vmatprep.mubr.f32.mxu0 %v4104_v2 }
 0x7e7   :  { %v2900_v37 = vpop.f32.mrb[140].mxu0  ;;  %v2977_v58 = vpop.f32.mrb[144].mxu1 }
 0x7e8   :  { %v2902_v60 = vpop.f32.mrb[141].mxu0  ;;  %v2979_v61 = vpop.f32.mrb[145].mxu1  ;;  %v2901_v7 = vadd.f32 %v2900_v37, %v2827_v26  ;;  %v2978_v10 = vadd.f32 %v2977_v58, %v2827_v26 }
 0x7e9   :  { %v2903_v3 = vadd.f32 %v2902_v60, %v2827_v26  ;;  %v2980_v14 = vadd.f32 %v2979_v61, %v2827_v26 }
 0x7ea   :  { %v2988_v21 = vmax.f32 %v2901_v7, 0.0  ;;  %v2990_v28 = vmax.f32 %v2978_v10, 0.0 }
 0x7eb   :  { %v2906_v12 = vpop.f32.mrb[142].mxu0  ;;  %v2983_v8 = vpop.f32.mrb[146].mxu1  ;;  %v2989_v31 = vmax.f32 %v2903_v3, 0.0  ;;  %v2991_v50 = vmax.f32 %v2980_v14, 0.0 }
 0x7ec   :  { %v2907_v41 = vadd.f32 %v2906_v12, %v2832_v5  ;;  %v2984_v16 = vadd.f32 %v2983_v8, %v2832_v5  ;;  %v2908_v17 = vpop.f32.mrb[143].mxu0  ;;  %v2985_v9 = vpop.f32.mrb[147].mxu1 }
 0x7ed   :  { %v2909_v24 = vadd.f32 %v2908_v17, %v2832_v5  ;;  %v2986_v25 = vadd.f32 %v2985_v9, %v2832_v5 }
 0x7ee   :  { %v2992_v56 = vmax.f32 %v2907_v41, 0.0  ;;  %v2994_v53 = vmax.f32 %v2984_v16, 0.0 }
 0x7ef   :  { %v2993_v32 = vmax.f32 %v2909_v24, 0.0  ;;  %v2995_v36 = vmax.f32 %v2986_v25, 0.0 }
 0x7f0   :  { %v3920_v38 = vpack.c.bf16 %v2992_v56, %v2988_v21  ;;  %v3924_v59 = vpack.c.bf16 %v2994_v53, %v2990_v28 }
 0x7f1   :  { %v3918_v1 = vpack.c.bf16 %v2993_v32, %v2989_v31  ;;  %v3922_v39 = vpack.c.bf16 %v2995_v36, %v2991_v50 }
 0x7f3   :  { %3919 = vmatprep.subr.bf16.mxu0 %v3918_v1 }
 0x7f4   :  { %3921 = vmatpush1.bf16.msra.mxu0 %v3920_v38 }
 0x7f5   :  { %3923 = vmatprep.subr.bf16.mxu0 %v3922_v39 }
 0x7f7   :  { %3390 = vmatmul.mubr.msk.f32.vlgmr.msra.gmra.mrb[144].mxu0 %vm692_vm2, %v2996_v44 }
 0x7f8   :  { %3925 = vmatpush1.bf16.msra.mxu0 %v3924_v59  ;;  %3141 = vmatprep.mubr.f32.mxu0 %v4104_v2 }
 0x7fb   :  { %3391 = vmatmul.mubr.msk.f32.vlgmr.msra.gmra.mrb[146].mxu0 %vm692_vm2, %v2996_v44 }
 0x8ca   :  { %v3072_v22 = vpop.f32.mrb[144].mxu0 }
 0x8cb   :  { %v5398_v42 = vadd.f32 %v3072_v22, %v3001_v19  ;;  %v3074_v43 = vpop.f32.mrb[145].mxu0 }
 0x8cc   :  { %v5400_v62 = vadd.f32 %v3074_v43, %v3001_v19 }
 0x8cd   :  { %v3149_v11 = vsel %vm3148_vm4, %v5398_v42, -inf }
 0x8ce   :  { %v3150_v30 = vrot.slane %v3149_v11, 4  ;;  %v3156_v34 = vsel %vm3148_vm4, %v5400_v62, -inf  ;;  %v3143_v35 = vpop.f32.mrb[146].mxu0 }
 0x8cf   :  { %v3157_v13 = vrot.slane %v3156_v34, 4  ;;  %v5406_v2 = vadd.f32 %v3143_v35, %v3001_v19  ;;  %v3145_v4 = vpop.f32.mrb[147].mxu0 }
 0x8d0   :  { %v3151_v33 = vmax.f32 %v3149_v11, %v3150_v30  ;;  %v5408_v46 = vadd.f32 %v3145_v4, %v3001_v19 }
 0x8d1   :  { %v3158_v47 = vmax.f32 %v3156_v34, %v3157_v13  ;;  %v3163_v20 = vsel %vm3148_vm4, %v5406_v2, -inf }
 0x8d2   :  { %v3152_v48 = vrot.slane %v3151_v33, 2  ;;  %v3164_v6 = vrot.slane %v3163_v20, 4  ;;  %v3170_v15 = vsel %vm3148_vm4, %v5408_v46, -inf }
 0x8d3   :  { %v3159_v40 = vrot.slane %v3158_v47, 2  ;;  %v3171_v45 = vrot.slane %v3170_v15, 4 }
 0x8d4   :  { %v3153_v49 = vmax.f32 %v3151_v33, %v3152_v48  ;;  %v3165_v51 = vmax.f32 %v3163_v20, %v3164_v6 }
 0x8d5   :  { %v3160_v55 = vmax.f32 %v3158_v47, %v3159_v40  ;;  %v3172_v29 = vmax.f32 %v3170_v15, %v3171_v45 }
 0x8d6   :  { %v3154_v23 = vrot.slane %v3153_v49, 1  ;;  %v3166_v57 = vrot.slane %v3165_v51, 2 }
 0x8d7   :  { %v3161_v18 = vrot.slane %v3160_v55, 1  ;;  %v3173_v52 = vrot.slane %v3172_v29, 2 }
 0x8d8   :  { %v5414_v63 = vmax.f32 %v3153_v49, %v3154_v23  ;;  %v3167_v0 = vmax.f32 %v3165_v51, %v3166_v57  ;;  %v4106_v49 = vmov 1983009808  }
 0x8d9   :  { %v5416_v27 = vmax.f32 %v3160_v55, %v3161_v18  ;;  %v3174_v54 = vmax.f32 %v3172_v29, %v3173_v52  ;;  %v3240_v51 = vunpack.c.l.s4 %v4106_v49  ;;  %v3242_v55 = vlaneseq }
 0x8da   :  { %v3177_v37 = vsub.f32 %v5398_v42, %v5414_v63  ;;  %v3168_v58 = vrot.slane %v3167_v0, 1 }
 0x8db   :  { %v3178_v60 = vsub.f32 %v5400_v62, %v5416_v27  ;;  %v3175_v61 = vrot.slane %v3174_v54, 1 }
 0x8dc   :  { %v3181_v26 = vmul.f32 1.442695, %v3177_v37  ;;  %v5422_v5 = vmax.f32 %v3167_v0, %v3168_v58  ;;  %v3241_v58 = vunpack.c.0.s8 %v3240_v51 }
 0x8dd   :  { %v3183_v7 = vmul.f32 1.442695, %v3178_v60  ;;  %v5424_v10 = vmax.f32 %v3174_v54, %v3175_v61  ;;  %v3243_v60 = vshrl.u32 %v3242_v55, 7 }
 0x8de   :  { %4064 = vpow2.f32 %v3181_v26  ;;  %v3179_v3 = vsub.f32 %v5406_v2, %v5422_v5 }
 0x8df   :  { %4066 = vpow2.f32 %v3183_v7  ;;  %v3180_v14 = vsub.f32 %v5408_v46, %v5424_v10 }
 0x8e0   :  { %v3185_v12 = vmul.f32 1.442695, %v3179_v3 }
 0x8e1   :  { %v3187_v8 = vmul.f32 1.442695, %v3180_v14  ;;  %v3244_v14 = vsub.s32 %v3241_v58, %v3243_v60 }
 0x8e2   :  { %4068 = vpow2.f32 %v3185_v12 }
 0x8e3   :  { %4070 = vpow2.f32 %v3187_v8 }
 0x8e8   :  { %v4065_v41 = vpop.eup %4064 }
 0x8e9   :  { %v4067_v16 = vpop.eup %4066  ;;  %v3189_v17 = vsel %vm3148_vm4, %v4065_v41, 0.0 }
 0x8ea   :  { %v3190_v9 = vrot.slane %v3189_v17, 4  ;;  %v3196_v24 = vsel %vm3148_vm4, %v4067_v16, 0.0 }
 0x8eb   :  { %v3197_v25 = vrot.slane %v3196_v24, 4 }
 0x8ec   :  { %v4069_v21 = vpop.eup %4068  ;;  %v3191_v28 = vadd.f32 %v3190_v9, %v3189_v17 }
 0x8ed   :  { %v4071_v56 = vpop.eup %4070  ;;  %v3198_v53 = vadd.f32 %v3197_v25, %v3196_v24  ;;  %v3203_v31 = vsel %vm3148_vm4, %v4069_v21, 0.0 }
 0x8ee   :  { %v3192_v50 = vrot.slane %v3191_v28, 2  ;;  %v3204_v32 = vrot.slane %v3203_v31, 4  ;;  %v3210_v36 = vsel %vm3148_vm4, %v4071_v56, 0.0 }
 0x8ef   :  { %v3199_v38 = vrot.slane %v3198_v53, 2  ;;  %v3211_v59 = vrot.slane %v3210_v36, 4 }
 0x8f0   :  { %v3193_v1 = vadd.f32 %v3192_v50, %v3191_v28  ;;  %v3205_v39 = vadd.f32 %v3204_v32, %v3203_v31 }
 0x8f1   :  { %v3200_v44 = vadd.f32 %v3199_v38, %v3198_v53  ;;  %v3212_v19 = vadd.f32 %v3211_v59, %v3210_v36 }
 0x8f2   :  { %v3194_v22 = vrot.slane %v3193_v1, 1  ;;  %v3206_v43 = vrot.slane %v3205_v39, 2 }
 0x8f3   :  { %v3201_v11 = vrot.slane %v3200_v44, 1  ;;  %v3213_v30 = vrot.slane %v3212_v19, 2 }
 0x8f4   :  { %v3195_v34 = vadd.f32 %v3194_v22, %v3193_v1  ;;  %v3207_v35 = vadd.f32 %v3206_v43, %v3205_v39 }
 0x8f5   :  { %v3202_v13 = vadd.f32 %v3201_v11, %v3200_v44  ;;  %v3214_v4 = vadd.f32 %v3213_v30, %v3212_v19 }
 0x8f6   :  { %4072 = vlog2.f32 %v3195_v34  ;;  %v3208_v33 = vrot.slane %v3207_v35, 1 }
 0x8f7   :  { %4074 = vlog2.f32 %v3202_v13  ;;  %v3215_v47 = vrot.slane %v3214_v4, 1 }
 0x8f8   :  { %v3209_v20 = vadd.f32 %v3208_v33, %v3207_v35 }
 0x8f9   :  { %v3216_v48 = vadd.f32 %v3215_v47, %v3214_v4 }
 0x8fa   :  { %4076 = vlog2.f32 %v3209_v20 }
 0x8fb   :  { %4078 = vlog2.f32 %v3216_v48 }
 0x900   :  { %v4073_v6 = vpop.eup %4072 }
 0x901   :  { %v4075_v15 = vpop.eup %4074  ;;  %v3218_v40 = vmul.f32 0.6931472, %v4073_v6 }
 0x902   :  { %v3220_v45 = vmul.f32 0.6931472, %v4075_v15 }
 0x903   :  { %v3225_v29 = vadd.f32 %v3218_v40, %v5414_v63 }
 0x904   :  { %v4077_v23 = vpop.eup %4076  ;;  %v3226_v57 = vadd.f32 %v3220_v45, %v5416_v27 }
 0x905   :  { %v4079_v18 = vpop.eup %4078  ;;  %v3229_v52 = vsub.f32 %v5398_v42, %v3225_v29  ;;  %v3222_v0 = vmul.f32 0.6931472, %v4077_v23 }
 0x906   :  { %v3230_v54 = vsub.f32 %v5400_v62, %v3226_v57  ;;  %v3224_v37 = vmul.f32 0.6931472, %v4079_v18 }
 0x907   :  { %v3227_v61 = vadd.f32 %v3222_v0, %v5422_v5 }
 0x908   :  { %v3228_v26 = vadd.f32 %v3224_v37, %v5424_v10  ;;  %v3237_v7 = vcombine.low %v3229_v52, %v3230_v54 }
 0x909   :  { %v3231_v3 = vsub.f32 %v5406_v2, %v3227_v61 }
 0x90a   :  { %v3232_v63 = vsub.f32 %v5408_v46, %v3228_v26  ;;  %v3245_v42 = vrot.slane %v3237_v7, %v3244_v14 }
 0x90c   :  { %v3238_v27 = vcombine.low %v3231_v3, %v3232_v63 }
 0x90e   :  { %v3252_v12 = vrot.slane %v3238_v27, %v3244_v14 }
 0x910   :  { %v3253_v8 = vcombine.low %v3245_v42, %v3252_v12 }
 0x912   :  { %3255 = vst [vmem:[#allocation2] sm:$0xff] %v3253_v8 }
 0x913   :  { %4091 = shalt.err (!%p4088_p4)
}
 0x914   :  { %s4092_s6 = scalar_lea.hbm %s5462_s8, 128 }
 0x915   :  { %p4093_p5 = scmp.ne.s32.totalorder %s5462_s8, %s4092_s6  ;;  %p4096_p6 = scmp.lt.u32.totalorder %s4092_s6, %s5462_s8 }
 0x917   :  { %p4098_p7 = pnand %p4096_p6, %p4093_p5 }
 0x919   :  { %4101 = shalt.err (!%p4098_p7)
}
 0x91a   :  { %3265 = dma.vmem_to_hbm [thread:$0]  %s3263_s30, 128, %s5462_s8, [#allocation3]  }
 0x91b   :  { %4102 = dma.done.wait [#allocation3], 128  }
 0x91c   :  { %4103 = vsyncadd [#allocation3], 4294967168 }
 0x91d   :  { %3269 = vsyncpa [#allocation3], 1 }

</bundles_post_ra>
